<compile_context>
chip_gen: v5e
topology: v5e:2x2
jax: 0.10.0
libtpu: 0.0.40
codegen_flags: <defaults>
</compile_context>

<pallas_src>
import functools
import math

import jax
import jax.numpy as jnp
from jax.experimental import pallas as pl
from jax.experimental.pallas import tpu as pltpu

PARAM_DTYPE = jnp.float32      # LN params, biases, logit_scale
MXU_DTYPE = jnp.bfloat16       # matmul weights
ACT_DTYPE = jnp.bfloat16       # activations carried between kernels

LN_EPS = 1e-5
NORM_EPS = 1e-12               # guards all-zero feature rows (NaN hazard)

# Tiling knobs (multiples of 8 / 128; sized to fit v7x's 64 MiB VMEM while
# amortizing the ~0.35 us/step grid overhead on v5e/v6e).
LIN_TILE = 1024                # final layernorm row tile
MLP_TILE = 512                 # MLP row tile (hidden is chunked, see below)
MLP_HIDDEN_CHUNK = 512         # fp32 hidden chunk width inside the MLP kernel
LOGITS_TILE = 512              # image-batch row tile for the logits kernel
TXT_TILE = 512                 # class tile for the text-projection kernel
CLASS_TILE = 8                 # classes per attention grid step

VMEM_LIMIT_BYTES = 48 * 1024 * 1024

_CP = pltpu.CompilerParams(
    dimension_semantics=("parallel",),
    vmem_limit_bytes=VMEM_LIMIT_BYTES,
)

# TODO(synk): pipeline_mode=pl.Buffered(1) on the constant-index_map weight
# specs would halve their VMEM footprint on v7x; left off here to keep the
# default (known-good) pallas_call pipelining path.


def _row_tile(m, target):
    """Row tile: full M if it fits, else a multiple-of-8 tile."""
    if m <= target:
        return m, 1
    tm = max(8, (target // 8) * 8)
    return tm, pl.cdiv(m, tm)


def _col_tile(n, target):
    """Lane tile: full N if it fits, else a multiple-of-128 tile."""
    if n <= target:
        return n, 1
    tn = max(128, (target // 128) * 128)
    return tn, pl.cdiv(n, tn)


def _class_tile(n, target=CLASS_TILE):
    """Classes per attention grid step; >= 2 grid steps when N >= 2 (v7x)."""
    if n <= 1:
        return 1
    return max(1, min(target, pl.cdiv(n, 2)))


# ----------------------------- Pallas kernels -----------------------------


def _ln_stats(x):
    mu = jnp.mean(x, axis=-1, keepdims=True)
    xc = x - mu
    var = jnp.mean(xc * xc, axis=-1, keepdims=True)
    return xc * jax.lax.rsqrt(var + LN_EPS)


def _attn_block_kernel(x_ref, g_ref, b_ref, wqkv_ref, bqkv_ref, wout_ref,
                       bout_ref, o_ref, attn_scr, *, heads, head_dim, scale):
    # Fused: LN1 -> qkv proj -> multi-head causal attention -> out-proj -> +residual
    cb, lp, d = x_ref.shape
    x = x_ref[...].astype(jnp.float32)                       # (Cb, Lp, D)
    y = _ln_stats(x) * g_ref[...].astype(jnp.float32) + b_ref[...].astype(jnp.float32)

    # qkv projection: one big MXU matmul over all Cb*Lp rows.
    y2 = y.reshape(cb * lp, d).astype(wqkv_ref.dtype)
    qkv = jnp.dot(y2, wqkv_ref[...], preferred_element_type=jnp.float32)
    qkv = (qkv + bqkv_ref[...].astype(jnp.float32)).astype(ACT_DTYPE)
    qkv = qkv.reshape(cb, lp, 3 * d)

    # Causal mask generated in-kernel (also masks padded context positions,
    # since padded keys have index > any valid query row).
    row = jax.lax.broadcasted_iota(jnp.int32, (lp, lp), 0)
    col = jax.lax.broadcasted_iota(jnp.int32, (lp, lp), 1)
    causal = (col <= row)[None]                              # (1, Lp, Lp)

    for h in range(heads):                                   # unrolled at trace time
        q = qkv[:, :, h * head_dim:(h + 1) * head_dim]
        k = qkv[:, :, d + h * head_dim:d + (h + 1) * head_dim]
        v = qkv[:, :, 2 * d + h * head_dim:2 * d + (h + 1) * head_dim]
        s = jnp.einsum("cqd,ckd->cqk", q, k,
                       preferred_element_type=jnp.float32) * scale
        s = jnp.where(causal, s, -1e30)
        s = s - jnp.max(s, axis=-1, keepdims=True)
        p = jnp.exp(s)
        p = p * pl.reciprocal(jnp.sum(p, axis=-1, keepdims=True), approx=True)
        oh = jnp.einsum("cqk,ckd->cqd", p.astype(v.dtype), v,
                        preferred_element_type=jnp.float32)
        # per-head store -> frees vregs immediately, no concat at the end
        attn_scr[:, :, h * head_dim:(h + 1) * head_dim] = oh.astype(attn_scr.dtype)

    # out-projection + residual add (single MXU matmul with K = D)
    a2 = attn_scr[...].reshape(cb * lp, d)
    out = jnp.dot(a2, wout_ref[...], preferred_element_type=jnp.float32)
    out = out + bout_ref[...].astype(jnp.float32)
    o_ref[...] = (out.reshape(cb, lp, d)
                  + x_ref[...].astype(jnp.float32)).astype(o_ref.dtype)


def attn_block(x, g, b, w_qkv, b_qkv, w_out, b_out, *, heads, head_dim, scale,
               class_tile):
    n, lp, d = x.shape
    gn = n // class_tile                                     # n padded to class_tile
    kern = functools.partial(_attn_block_kernel, heads=heads,
                             head_dim=head_dim, scale=scale)
    return pl.pallas_call(
        kern,
        out_shape=jax.ShapeDtypeStruct((n, lp, d), ACT_DTYPE),
        grid=(gn,),
        in_specs=[
            pl.BlockSpec((class_tile, lp, d), lambda i: (i, 0, 0)),
            pl.BlockSpec((1, d), lambda i: (0, 0)),
            pl.BlockSpec((1, d), lambda i: (0, 0)),
            pl.BlockSpec((d, 3 * d), lambda i: (0, 0)),
            pl.BlockSpec((1, 3 * d), lambda i: (0, 0)),
            pl.BlockSpec((d, d), lambda i: (0, 0)),
            pl.BlockSpec((1, d), lambda i: (0, 0)),
        ],
        out_specs=pl.BlockSpec((class_tile, lp, d), lambda i: (i, 0, 0)),
        scratch_shapes=[pltpu.VMEM((class_tile, lp, d), ACT_DTYPE)],
        compiler_params=_CP,
    )(x, g, b, w_qkv, b_qkv, w_out, b_out)


def _ln_mlp_residual_kernel(x_ref, g_ref, b_ref, w1_ref, b1_ref, w2_ref, b2_ref,
                            o_ref, *, hidden_chunk):
    # Fused LayerNorm -> fc -> QuickGELU -> proj -> residual add, with the
    # fp32 hidden chunked over 4D to bound live fp32 (v7x VMEM pressure).
    x = x_ref[...].astype(jnp.float32)
    y = (_ln_stats(x) * g_ref[...].astype(jnp.float32)
         + b_ref[...].astype(jnp.float32)).astype(w1_ref.dtype)
    d_hidden = w1_ref.shape[1]
    acc = jnp.zeros((x.shape[0], w2_ref.shape[1]), jnp.float32)
    for c0 in range(0, d_hidden, hidden_chunk):              # static unroll
        c1 = min(c0 + hidden_chunk, d_hidden)
        h = jnp.dot(y, w1_ref[:, c0:c1], preferred_element_type=jnp.float32)
        h = h + b1_ref[:, c0:c1].astype(jnp.float32)
        h = h * jax.nn.sigmoid(1.702 * h)                    # QuickGELU
        acc = acc + jnp.dot(h.astype(w2_ref.dtype), w2_ref[c0:c1, :],
                            preferred_element_type=jnp.float32)
    o_ref[...] = (x + acc + b2_ref[...].astype(jnp.float32)).astype(o_ref.dtype)


def ln_mlp_residual(x, g, b, w1, b1, w2, b2):
    m, d = x.shape
    dh = w1.shape[1]
    tm, gm = _row_tile(m, MLP_TILE)
    kern = functools.partial(_ln_mlp_residual_kernel,
                             hidden_chunk=MLP_HIDDEN_CHUNK)
    return pl.pallas_call(
        kern,
        out_shape=jax.ShapeDtypeStruct((m, d), ACT_DTYPE),
        grid=(gm,),
        in_specs=[
            pl.BlockSpec((tm, d), lambda i: (i, 0)),
            pl.BlockSpec((1, d), lambda i: (0, 0)),
            pl.BlockSpec((1, d), lambda i: (0, 0)),
            pl.BlockSpec((d, dh), lambda i: (0, 0)),
            pl.BlockSpec((1, dh), lambda i: (0, 0)),
            pl.BlockSpec((dh, d), lambda i: (0, 0)),
            pl.BlockSpec((1, d), lambda i: (0, 0)),
        ],
        out_specs=pl.BlockSpec((tm, d), lambda i: (i, 0)),
        compiler_params=_CP,
    )(x, g, b, w1, b1, w2, b2)


def _layernorm_kernel(x_ref, g_ref, b_ref, o_ref):
    x = x_ref[...].astype(jnp.float32)
    o_ref[...] = (_ln_stats(x) * g_ref[...].astype(jnp.float32)
                  + b_ref[...].astype(jnp.float32)).astype(o_ref.dtype)


def layernorm(x, g, b):
    m, d = x.shape
    tm, gm = _row_tile(m, LIN_TILE)
    return pl.pallas_call(
        _layernorm_kernel,
        out_shape=jax.ShapeDtypeStruct((m, d), ACT_DTYPE),
        grid=(gm,),
        in_specs=[
            pl.BlockSpec((tm, d), lambda i: (i, 0)),
            pl.BlockSpec((1, d), lambda i: (0, 0)),
            pl.BlockSpec((1, d), lambda i: (0, 0)),
        ],
        out_specs=pl.BlockSpec((tm, d), lambda i: (i, 0)),
        compiler_params=_CP,
    )(x, g, b)


def _proj_norm_scale_t_kernel(x_ref, w_ref, s_ref, o_ref):
    # text_projection (bias-less) + L2 normalize + exp(logit_scale) scaling,
    # emitted TRANSPOSED ([E, TN] bf16) so the logits kernel needs no per-tile
    # transpose and gets a bf16 MXU operand.
    y = jnp.dot(x_ref[...], w_ref[...], preferred_element_type=jnp.float32)
    inv = jax.lax.rsqrt(jnp.sum(y * y, axis=-1, keepdims=True) + NORM_EPS)
    y = y * inv * s_ref[0]
    o_ref[...] = y.T.astype(o_ref.dtype)


def proj_normalize_scale_t(feats, w, scale):
    n, d = feats.shape
    e = w.shape[1]
    tn, gn = _col_tile(n, TXT_TILE)
    return pl.pallas_call(
        _proj_norm_scale_t_kernel,
        out_shape=jax.ShapeDtypeStruct((e, n), MXU_DTYPE),
        grid=(gn,),
        in_specs=[
            pl.BlockSpec((tn, d), lambda i: (i, 0)),
            pl.BlockSpec((d, e), lambda i: (0, 0)),
            pl.BlockSpec(memory_space=pltpu.MemorySpace.SMEM),
        ],
        out_specs=pl.BlockSpec((e, tn), lambda i: (0, i)),
        compiler_params=_CP,
    )(feats, w, scale)


def _logits_kernel(img_ref, txt_ref, o_ref):
    # normalize the image tile (fp32 stats), bf16 MXU matmul, fp32 accumulate
    img = img_ref[...].astype(jnp.float32)
    inv = jax.lax.rsqrt(jnp.sum(img * img, axis=-1, keepdims=True) + NORM_EPS)
    img_n = (img * inv).astype(txt_ref.dtype)
    o_ref[...] = jnp.dot(img_n, txt_ref[...],
                         preferred_element_type=jnp.float32).astype(o_ref.dtype)


def clip_logits(batch_img, txt_t):
    b, e = batch_img.shape
    n = txt_t.shape[1]
    tb, gb = _row_tile(b, LOGITS_TILE)
    return pl.pallas_call(
        _logits_kernel,
        out_shape=jax.ShapeDtypeStruct((b, n), jnp.float32),
        grid=(gb,),
        in_specs=[
            pl.BlockSpec((tb, e), lambda i: (i, 0)),
            pl.BlockSpec((e, n), lambda i: (0, 0)),
        ],
        out_specs=pl.BlockSpec((tb, n), lambda i: (i, 0)),
        compiler_params=_CP,
    )(batch_img, txt_t)


# ------------------------ CustomTextEncoder (CLIP) ------------------------


def custom_text_encoder(params, cfg, token_ids, token_tensors=None,
                        enable_pos_emb=False):
    d, heads, ctx = cfg["width"], cfg["heads"], cfg["ctx_len"]
    head_dim = d // heads
    lp = ((ctx + 7) // 8) * 8                       # pad context to sublane granule

    if token_tensors is not None:
        x = token_tensors
    else:
        x = params["token_embedding"][token_ids]    # [N, L, D] glue gather
    x = x.astype(jnp.float32)
    if enable_pos_emb:
        x = x + params["positional_embedding"].astype(jnp.float32)

    n = x.shape[0]
    cb = _class_tile(n)
    n_pad = ((n + cb - 1) // cb) * cb               # pad class axis to the class tile
    if (lp - ctx) or (n_pad - n):
        x = jnp.pad(x, ((0, n_pad - n), (0, lp - ctx), (0, 0)))

    m = n_pad * lp
    scale = 1.0 / math.sqrt(head_dim)
    x3d = x.astype(ACT_DTYPE)                       # (N_pad, Lp, D)

    for blk in params["blocks"]:
        # fused attention residual sub-block
        x3d = attn_block(x3d, blk["ln1_g"], blk["ln1_b"],
                         blk["w_qkv"], blk["b_qkv"], blk["w_out"], blk["b_out"],
                         heads=heads, head_dim=head_dim, scale=scale,
                         class_tile=cb)
        # fused MLP residual sub-block
        x3d = ln_mlp_residual(x3d.reshape(m, d), blk["ln2_g"], blk["ln2_b"],
                              blk["w_fc"], blk["b_fc"],
                              blk["w_proj"], blk["b_proj"]).reshape(n_pad, lp, d)

    xf = layernorm(x3d.reshape(m, d),
                   params["lnf_g"], params["lnf_b"]).reshape(n_pad, lp, d)
    # EOT token = argmax of token ids (matches the CLIP tokenizer convention)
    eot = jnp.argmax(token_ids, axis=-1)
    feats = xf[jnp.arange(n), eot]                  # [N, D] glue gather
    return feats


# --------------------------- CLIPInterface port ----------------------------


def _clip_forward(params, token_ids, batch_img, *, cfg, enable_pos_emb):
    feats = custom_text_encoder(params, cfg, token_ids, None,
                                enable_pos_emb=enable_pos_emb)
    # exp(logit_scale) folded into the text-feature normalization kernel
    scale = jnp.exp(params["logit_scale"]).reshape(1).astype(jnp.float32)
    txt_t = proj_normalize_scale_t(feats, params["text_projection"], scale)  # [E,N] bf16
    return clip_logits(batch_img.astype(jnp.float32), txt_t)


class CLIPInterfacePallas:
    def __init__(self, clip_params, cfg, template_token_id,
                 soft_element_embeddings=None, dtype=jnp.float32,
                 enable_pos_emb=False):
        self.clip_params = clip_params
        self.cfg = cfg
        self.template_token_id = template_token_id
        self.soft_element_embeddings = soft_element_embeddings
        self.dtype = dtype
        self.enable_pos_emb = enable_pos_emb
        self._fwd = jax.jit(functools.partial(
            _clip_forward, cfg=cfg, enable_pos_emb=enable_pos_emb))

    def construct_token_tensors(self, idx):
        if self.soft_element_embeddings is None:
            return None
        # TODO(synk): soft-prompt path raises NotImplementedError in the reference too.
        raise NotImplementedError

    def forward(self, batch_img, pair_attr_obj_idx):
        pair_emb = self.construct_token_tensors(pair_attr_obj_idx)
        del pair_emb   # None in the supported (frozen-prompt) path
        return self._fwd(self.clip_params, self.template_token_id, batch_img)

    __call__ = forward


# -------------------------------- params -----------------------------------


def init_clip_params(key, *, vocab, ctx_len, width, heads, layers, embed_dim):
    keys = jax.random.split(key, 4 + layers)
    std = 0.02
    blocks = []
    for li in range(layers):
        bk = jax.random.split(keys[4 + li], 4)
        blocks.append(
            dict(
                ln1_g=jnp.ones((1, width), PARAM_DTYPE),
                ln1_b=jnp.zeros((1, width), PARAM_DTYPE),
                w_qkv=(std * jax.random.normal(bk[0], (width, 3 * width))).astype(MXU_DTYPE),
                b_qkv=jnp.zeros((1, 3 * width), PARAM_DTYPE),
                w_out=(std * jax.random.normal(bk[1], (width, width))).astype(MXU_DTYPE),
                b_out=jnp.zeros((1, width), PARAM_DTYPE),
                ln2_g=jnp.ones((1, width), PARAM_DTYPE),
                ln2_b=jnp.zeros((1, width), PARAM_DTYPE),
                w_fc=(std * jax.random.normal(bk[2], (width, 4 * width))).astype(MXU_DTYPE),
                b_fc=jnp.zeros((1, 4 * width), PARAM_DTYPE),
                w_proj=(std * jax.random.normal(bk[3], (4 * width, width))).astype(MXU_DTYPE),
                b_proj=jnp.zeros((1, width), PARAM_DTYPE),
            )
        )
    params = dict(
        token_embedding=std * jax.random.normal(keys[0], (vocab, width), PARAM_DTYPE),
        positional_embedding=0.01 * jax.random.normal(keys[1], (ctx_len, width), PARAM_DTYPE),
        blocks=blocks,
        lnf_g=jnp.ones((1, width), PARAM_DTYPE),
        lnf_b=jnp.zeros((1, width), PARAM_DTYPE),
        text_projection=((width ** -0.5)
                         * jax.random.normal(keys[2], (width, embed_dim))).astype(MXU_DTYPE),
        logit_scale=jnp.asarray(math.log(1.0 / 0.07), PARAM_DTYPE),
    )
    cfg = dict(width=width, heads=heads, ctx_len=ctx_len)
    return params, cfg


# --------------------------------- main -------------------------------------

if __name__ == "__main__":
    # small, CLIP-consistent shapes
    B = 2          # image batch
    E = 32         # joint embed dim (CLIP: 512)
    N = 5          # number of (attr, obj) pair classes
    L = 8          # context length (CLIP: 77)
    D = 64         # text transformer width (CLIP: 512)
    H = 4          # heads
    LAYERS = 2
    V = 100        # vocab size (CLIP: 49408)

    key = jax.random.PRNGKey(0)
    k_param, k_img, k_tok = jax.random.split(key, 3)

    params, cfg = init_clip_params(
        k_param, vocab=V, ctx_len=L, width=D, heads=H, layers=LAYERS, embed_dim=E)

    # batch_img: already-encoded image features (the reference forward
    # normalizes batch_img directly without calling encode_image).
    batch_img = jax.random.normal(k_img, (B, E), jnp.float32)

    # template_token_id: [N, L] with SOT, random tokens, EOT (= max id) and padding
    ids = jax.random.randint(k_tok, (N, L), 1, V - 2)
    ids = ids.at[:, 0].set(V - 2)                                  # SOT
    eot_pos = jnp.array([2, 3, 4, 5, 7], dtype=jnp.int32)
    ids = ids.at[jnp.arange(N), eot_pos].set(V - 1)                # EOT (argmax target)
    ids = jnp.where(jnp.arange(L)[None, :] > eot_pos[:, None], 0, ids)
    template_token_id = ids.astype(jnp.int32)

    pair_attr_obj_idx = jnp.arange(N, dtype=jnp.int32)

    model = CLIPInterfacePallas(
        params, cfg, template_token_id, soft_element_embeddings=None,
        dtype=jnp.float32, enable_pos_emb=False)

    logits = model(batch_img, pair_attr_obj_idx)
    logits = jax.block_until_ready(logits)
    assert logits.shape == (B, N), logits.shape
    assert bool(jnp.all(jnp.isfinite(logits)))
    # |logits| <= exp(logit_scale) * |cos| ~= 14.3
    assert bool(jnp.all(jnp.abs(logits) < 50.0))
    print("KERNEL_OK")
</pallas_src>

<mosaic_0001>
module attributes {stable_mosaic.version = 11 : i64} {
  func.func @_ln_mlp_residual_kernel(%arg0: i32, %arg1: memref<48x64xbf16, #tpu.memory_space<vmem>>, %arg2: memref<1x64xf32, #tpu.memory_space<vmem>>, %arg3: memref<1x64xf32, #tpu.memory_space<vmem>>, %arg4: memref<64x256xbf16, #tpu.memory_space<vmem>>, %arg5: memref<1x256xf32, #tpu.memory_space<vmem>>, %arg6: memref<256x64xbf16, #tpu.memory_space<vmem>>, %arg7: memref<1x64xf32, #tpu.memory_space<vmem>>, %arg8: memref<48x64xbf16, #tpu.memory_space<vmem>>) attributes {dimension_semantics = [#tpu.dimension_semantics<parallel>], iteration_bounds = array<i64: 1>, scalar_prefetch = 0 : i64, scratch_operands = 0 : i64, tpu.core_type = #tpu.core_type<tc>, window_params = [{transform_indices = @transform_0, window_bounds = array<i64: 48, 64>}, {pipeline_mode = #tpu.pipeline_mode<synchronous>, transform_indices = @transform_1, window_bounds = array<i64: 1, 64>}, {pipeline_mode = #tpu.pipeline_mode<synchronous>, transform_indices = @transform_2, window_bounds = array<i64: 1, 64>}, {pipeline_mode = #tpu.pipeline_mode<synchronous>, transform_indices = @transform_3, window_bounds = array<i64: 64, 256>}, {pipeline_mode = #tpu.pipeline_mode<synchronous>, transform_indices = @transform_4, window_bounds = array<i64: 1, 256>}, {pipeline_mode = #tpu.pipeline_mode<synchronous>, transform_indices = @transform_5, window_bounds = array<i64: 256, 64>}, {pipeline_mode = #tpu.pipeline_mode<synchronous>, transform_indices = @transform_6, window_bounds = array<i64: 1, 64>}, {transform_indices = @transform_7, window_bounds = array<i64: 48, 64>}]} {
    %c0 = arith.constant 0 : index
    %c0_0 = arith.constant 0 : index
    %0 = vector.load %arg1[%c0, %c0_0] : memref<48x64xbf16, #tpu.memory_space<vmem>>, vector<48x64xbf16>
    %1 = arith.extf %0 : vector<48x64xbf16> to vector<48x64xf32>
    %cst = arith.constant dense<0.000000e+00> : vector<48xf32>
    %2 = vector.multi_reduction <add>, %1, %cst [1] : vector<48x64xf32> to vector<48xf32>
    %3 = vector.shape_cast %2 : vector<48xf32> to vector<48x1xf32>
    %cst_1 = arith.constant 6.400000e+01 : f32
    %4 = vector.broadcast %cst_1 : f32 to vector<48x1xf32>
    %5 = arith.divf %3, %4 : vector<48x1xf32>
    %6 = vector.broadcast %5 : vector<48x1xf32> to vector<48x64xf32>
    %7 = arith.subf %1, %6 : vector<48x64xf32>
    %8 = arith.mulf %7, %7 : vector<48x64xf32>
    %cst_2 = arith.constant dense<0.000000e+00> : vector<48xf32>
    %9 = vector.multi_reduction <add>, %8, %cst_2 [1] : vector<48x64xf32> to vector<48xf32>
    %10 = vector.shape_cast %9 : vector<48xf32> to vector<48x1xf32>
    %cst_3 = arith.constant 6.400000e+01 : f32
    %11 = vector.broadcast %cst_3 : f32 to vector<48x1xf32>
    %12 = arith.divf %10, %11 : vector<48x1xf32>
    %cst_4 = arith.constant 9.99999974E-6 : f32
    %13 = vector.broadcast %cst_4 : f32 to vector<48x1xf32>
    %14 = arith.addf %12, %13 : vector<48x1xf32>
    %15 = math.rsqrt %14 : vector<48x1xf32>
    %16 = vector.broadcast %15 : vector<48x1xf32> to vector<48x64xf32>
    %17 = arith.mulf %7, %16 : vector<48x64xf32>
    %c0_5 = arith.constant 0 : index
    %c0_6 = arith.constant 0 : index
    %18 = vector.load %arg2[%c0_5, %c0_6] : memref<1x64xf32, #tpu.memory_space<vmem>>, vector<1x64xf32>
    %19 = vector.broadcast %18 : vector<1x64xf32> to vector<48x64xf32>
    %20 = arith.mulf %17, %19 : vector<48x64xf32>
    %c0_7 = arith.constant 0 : index
    %c0_8 = arith.constant 0 : index
    %21 = vector.load %arg3[%c0_7, %c0_8] : memref<1x64xf32, #tpu.memory_space<vmem>>, vector<1x64xf32>
    %22 = vector.broadcast %21 : vector<1x64xf32> to vector<48x64xf32>
    %23 = arith.addf %20, %22 : vector<48x64xf32>
    %24 = arith.truncf %23 : vector<48x64xf32> to vector<48x64xbf16>
    %cst_9 = arith.constant 0.000000e+00 : f32
    %25 = vector.broadcast %cst_9 : f32 to vector<48x64xf32>
    %c0_10 = arith.constant 0 : index
    %c0_11 = arith.constant 0 : index
    %26 = vector.load %arg4[%c0_10, %c0_11] : memref<64x256xbf16, #tpu.memory_space<vmem>>, vector<64x256xbf16>
    %cst_12 = arith.constant dense<0.000000e+00> : vector<48x256xf32>
    %27 = tpu.matmul %24, %26, %cst_12 {dimension_numbers = #tpu.dot_dimension_numbers<[1], [0], [0], [1], [0, 0, 1, 1], [], []>} : vector<48x64xbf16>, vector<64x256xbf16>, vector<48x256xf32> -> vector<48x256xf32>
    %c0_13 = arith.constant 0 : index
    %c0_14 = arith.constant 0 : index
    %28 = vector.load %arg5[%c0_13, %c0_14] : memref<1x256xf32, #tpu.memory_space<vmem>>, vector<1x256xf32>
    %29 = vector.broadcast %28 : vector<1x256xf32> to vector<48x256xf32>
    %30 = arith.addf %27, %29 : vector<48x256xf32>
    %cst_15 = arith.constant 1.702000e+00 : f32
    %31 = vector.broadcast %cst_15 : f32 to vector<48x256xf32>
    %32 = arith.mulf %31, %30 : vector<48x256xf32>
    %33 = arith.negf %32 : vector<48x256xf32>
    %34 = math.exp %33 : vector<48x256xf32>
    %cst_16 = arith.constant 1.000000e+00 : f32
    %35 = vector.broadcast %cst_16 : f32 to vector<48x256xf32>
    %36 = arith.addf %35, %34 : vector<48x256xf32>
    %37 = arith.divf %35, %36 : vector<48x256xf32>
    %38 = arith.mulf %30, %37 : vector<48x256xf32>
    %39 = arith.truncf %38 : vector<48x256xf32> to vector<48x256xbf16>
    %c0_17 = arith.constant 0 : index
    %c0_18 = arith.constant 0 : index
    %40 = vector.load %arg6[%c0_17, %c0_18] : memref<256x64xbf16, #tpu.memory_space<vmem>>, vector<256x64xbf16>
    %cst_19 = arith.constant dense<0.000000e+00> : vector<48x64xf32>
    %41 = tpu.matmul %39, %40, %cst_19 {dimension_numbers = #tpu.dot_dimension_numbers<[1], [0], [0], [1], [0, 0, 1, 1], [], []>} : vector<48x256xbf16>, vector<256x64xbf16>, vector<48x64xf32> -> vector<48x64xf32>
    %42 = arith.addf %25, %41 : vector<48x64xf32>
    %43 = arith.addf %1, %42 : vector<48x64xf32>
    %c0_20 = arith.constant 0 : index
    %c0_21 = arith.constant 0 : index
    %44 = vector.load %arg7[%c0_20, %c0_21] : memref<1x64xf32, #tpu.memory_space<vmem>>, vector<1x64xf32>
    %45 = vector.broadcast %44 : vector<1x64xf32> to vector<48x64xf32>
    %46 = arith.addf %43, %45 : vector<48x64xf32>
    %47 = arith.truncf %46 : vector<48x64xf32> to vector<48x64xbf16>
    %c0_22 = arith.constant 0 : index
    %c0_23 = arith.constant 0 : index
    %48 = vector.load %arg8[%c0_22, %c0_23] : memref<48x64xbf16, #tpu.memory_space<vmem>>, vector<48x64xbf16>
    tpu.vector_store %arg8[%c0_22, %c0_23], %47 {strides = array<i32>} : memref<48x64xbf16, #tpu.memory_space<vmem>>, vector<48x64xbf16>,
    return
  }
  func.func @transform_0(%arg0: i32) -> (i32, i32) {
    %c0_i32 = arith.constant 0 : i32
    %c0_i32_0 = arith.constant 0 : i32
    return %arg0, %c0_i32 : i32, i32
  }
  func.func @transform_1(%arg0: i32) -> (i32, i32) {
    %c0_i32 = arith.constant 0 : i32
    %c0_i32_0 = arith.constant 0 : i32
    %c0_i32_1 = arith.constant 0 : i32
    return %c0_i32, %c0_i32_0 : i32, i32
  }
  func.func @transform_2(%arg0: i32) -> (i32, i32) {
    %c0_i32 = arith.constant 0 : i32
    %c0_i32_0 = arith.constant 0 : i32
    %c0_i32_1 = arith.constant 0 : i32
    return %c0_i32, %c0_i32_0 : i32, i32
  }
  func.func @transform_3(%arg0: i32) -> (i32, i32) {
    %c0_i32 = arith.constant 0 : i32
    %c0_i32_0 = arith.constant 0 : i32
    %c0_i32_1 = arith.constant 0 : i32
    return %c0_i32, %c0_i32_0 : i32, i32
  }
  func.func @transform_4(%arg0: i32) -> (i32, i32) {
    %c0_i32 = arith.constant 0 : i32
    %c0_i32_0 = arith.constant 0 : i32
    %c0_i32_1 = arith.constant 0 : i32
    return %c0_i32, %c0_i32_0 : i32, i32
  }
  func.func @transform_5(%arg0: i32) -> (i32, i32) {
    %c0_i32 = arith.constant 0 : i32
    %c0_i32_0 = arith.constant 0 : i32
    %c0_i32_1 = arith.constant 0 : i32
    return %c0_i32, %c0_i32_0 : i32, i32
  }
  func.func @transform_6(%arg0: i32) -> (i32, i32) {
    %c0_i32 = arith.constant 0 : i32
    %c0_i32_0 = arith.constant 0 : i32
    %c0_i32_1 = arith.constant 0 : i32
    return %c0_i32, %c0_i32_0 : i32, i32
  }
  func.func @transform_7(%arg0: i32) -> (i32, i32) {
    %c0_i32 = arith.constant 0 : i32
    %c0_i32_0 = arith.constant 0 : i32
    return %arg0, %c0_i32 : i32, i32
  }
}

module attributes {stable_mosaic.version = 11 : i64} {
  func.func @_attn_block_kernel(%arg0: i32, %arg1: memref<3x8x64xbf16, #tpu.memory_space<vmem>>, %arg2: memref<1x64xf32, #tpu.memory_space<vmem>>, %arg3: memref<1x64xf32, #tpu.memory_space<vmem>>, %arg4: memref<64x192xbf16, #tpu.memory_space<vmem>>, %arg5: memref<1x192xf32, #tpu.memory_space<vmem>>, %arg6: memref<64x64xbf16, #tpu.memory_space<vmem>>, %arg7: memref<1x64xf32, #tpu.memory_space<vmem>>, %arg8: memref<3x8x64xbf16, #tpu.memory_space<vmem>>, %arg9: memref<3x8x64xbf16, #tpu.memory_space<vmem>>) attributes {dimension_semantics = [#tpu.dimension_semantics<parallel>], iteration_bounds = array<i64: 2>, scalar_prefetch = 0 : i64, scratch_operands = 1 : i64, tpu.core_type = #tpu.core_type<tc>, window_params = [{transform_indices = @transform_0, window_bounds = array<i64: 3, 8, 64>}, {pipeline_mode = #tpu.pipeline_mode<synchronous>, transform_indices = @transform_1, window_bounds = array<i64: 1, 64>}, {pipeline_mode = #tpu.pipeline_mode<synchronous>, transform_indices = @transform_2, window_bounds = array<i64: 1, 64>}, {pipeline_mode = #tpu.pipeline_mode<synchronous>, transform_indices = @transform_3, window_bounds = array<i64: 64, 192>}, {pipeline_mode = #tpu.pipeline_mode<synchronous>, transform_indices = @transform_4, window_bounds = array<i64: 1, 192>}, {pipeline_mode = #tpu.pipeline_mode<synchronous>, transform_indices = @transform_5, window_bounds = array<i64: 64, 64>}, {pipeline_mode = #tpu.pipeline_mode<synchronous>, transform_indices = @transform_6, window_bounds = array<i64: 1, 64>}, {transform_indices = @transform_7, window_bounds = array<i64: 3, 8, 64>}]} {
    %c0 = arith.constant 0 : index
    %c0_0 = arith.constant 0 : index
    %c0_1 = arith.constant 0 : index
    %0 = vector.load %arg1[%c0, %c0_0, %c0_1] : memref<3x8x64xbf16, #tpu.memory_space<vmem>>, vector<3x8x64xbf16>
    %1 = arith.extf %0 : vector<3x8x64xbf16> to vector<3x8x64xf32>
    %cst = arith.constant dense<0.000000e+00> : vector<3x8xf32>
    %2 = vector.multi_reduction <add>, %1, %cst [2] : vector<3x8x64xf32> to vector<3x8xf32>
    %3 = vector.shape_cast %2 : vector<3x8xf32> to vector<3x8x1xf32>
    %cst_2 = arith.constant 6.400000e+01 : f32
    %4 = vector.broadcast %cst_2 : f32 to vector<3x8x1xf32>
    %5 = arith.divf %3, %4 : vector<3x8x1xf32>
    %6 = vector.broadcast %5 : vector<3x8x1xf32> to vector<3x8x64xf32>
    %7 = arith.subf %1, %6 : vector<3x8x64xf32>
    %8 = arith.mulf %7, %7 : vector<3x8x64xf32>
    %cst_3 = arith.constant dense<0.000000e+00> : vector<3x8xf32>
    %9 = vector.multi_reduction <add>, %8, %cst_3 [2] : vector<3x8x64xf32> to vector<3x8xf32>
    %10 = vector.shape_cast %9 : vector<3x8xf32> to vector<3x8x1xf32>
    %cst_4 = arith.constant 6.400000e+01 : f32
    %11 = vector.broadcast %cst_4 : f32 to vector<3x8x1xf32>
    %12 = arith.divf %10, %11 : vector<3x8x1xf32>
    %cst_5 = arith.constant 9.99999974E-6 : f32
    %13 = vector.broadcast %cst_5 : f32 to vector<3x8x1xf32>
    %14 = arith.addf %12, %13 : vector<3x8x1xf32>
    %15 = math.rsqrt %14 : vector<3x8x1xf32>
    %16 = vector.broadcast %15 : vector<3x8x1xf32> to vector<3x8x64xf32>
    %17 = arith.mulf %7, %16 : vector<3x8x64xf32>
    %c0_6 = arith.constant 0 : index
    %c0_7 = arith.constant 0 : index
    %18 = vector.load %arg2[%c0_6, %c0_7] : memref<1x64xf32, #tpu.memory_space<vmem>>, vector<1x64xf32>
    %19 = vector.shape_cast %18 : vector<1x64xf32> to vector<1x1x64xf32>
    %20 = vector.broadcast %19 : vector<1x1x64xf32> to vector<3x8x64xf32>
    %21 = arith.mulf %17, %20 : vector<3x8x64xf32>
    %c0_8 = arith.constant 0 : index
    %c0_9 = arith.constant 0 : index
    %22 = vector.load %arg3[%c0_8, %c0_9] : memref<1x64xf32, #tpu.memory_space<vmem>>, vector<1x64xf32>
    %23 = vector.shape_cast %22 : vector<1x64xf32> to vector<1x1x64xf32>
    %24 = vector.broadcast %23 : vector<1x1x64xf32> to vector<3x8x64xf32>
    %25 = arith.addf %21, %24 : vector<3x8x64xf32>
    %26 = vector.shape_cast %25 : vector<3x8x64xf32> to vector<24x64xf32>
    %27 = arith.truncf %26 : vector<24x64xf32> to vector<24x64xbf16>
    %c0_10 = arith.constant 0 : index
    %c0_11 = arith.constant 0 : index
    %28 = vector.load %arg4[%c0_10, %c0_11] : memref<64x192xbf16, #tpu.memory_space<vmem>>, vector<64x192xbf16>
    %cst_12 = arith.constant dense<0.000000e+00> : vector<24x192xf32>
    %29 = tpu.matmul %27, %28, %cst_12 {dimension_numbers = #tpu.dot_dimension_numbers<[1], [0], [0], [1], [0, 0, 1, 1], [], []>} : vector<24x64xbf16>, vector<64x192xbf16>, vector<24x192xf32> -> vector<24x192xf32>
    %c0_13 = arith.constant 0 : index
    %c0_14 = arith.constant 0 : index
    %30 = vector.load %arg5[%c0_13, %c0_14] : memref<1x192xf32, #tpu.memory_space<vmem>>, vector<1x192xf32>
    %31 = vector.broadcast %30 : vector<1x192xf32> to vector<24x192xf32>
    %32 = arith.addf %29, %31 : vector<24x192xf32>
    %33 = arith.truncf %32 : vector<24x192xf32> to vector<24x192xbf16>
    %34 = vector.shape_cast %33 : vector<24x192xbf16> to vector<3x8x192xbf16>
    %35 = tpu.iota {dimensions = array<i32: 0>} : vector<8x8xi32>
    %36 = tpu.iota {dimensions = array<i32: 1>} : vector<8x8xi32>
    %37 = arith.cmpi sle, %36, %35 : vector<8x8xi32>
    %38 = vector.shape_cast %37 : vector<8x8xi1> to vector<1x8x8xi1>
    %39 = vector.extract_strided_slice %34 {offsets = [0, 0, 0], sizes = [3, 8, 16], strides = [1, 1, 1]} : vector<3x8x192xbf16> to vector<3x8x16xbf16>
    %40 = vector.extract_strided_slice %34 {offsets = [0, 0, 64], sizes = [3, 8, 16], strides = [1, 1, 1]} : vector<3x8x192xbf16> to vector<3x8x16xbf16>
    %41 = vector.extract_strided_slice %34 {offsets = [0, 0, 128], sizes = [3, 8, 16], strides = [1, 1, 1]} : vector<3x8x192xbf16> to vector<3x8x16xbf16>
    "tpu.trace_start"() <{level = 10 : i32, message = "cqd,ckd->cqk"}> : () -> ()
    %cst_15 = arith.constant dense<0.000000e+00> : vector<3x8x8xf32>
    %42 = tpu.matmul %39, %40, %cst_15 {dimension_numbers = #tpu.dot_dimension_numbers<[2], [2], [1], [1], [0, 0, 0, 1, 1, 1], [0], [0]>} : vector<3x8x16xbf16>, vector<3x8x16xbf16>, vector<3x8x8xf32> -> vector<3x8x8xf32>
    "tpu.trace_stop"() : () -> ()
    %cst_16 = arith.constant 2.500000e-01 : f32
    %43 = vector.broadcast %cst_16 : f32 to vector<3x8x8xf32>
    %44 = arith.mulf %42, %43 : vector<3x8x8xf32>
    %cst_17 = arith.constant -1.000000e+30 : f32
    %45 = vector.shape_cast %38 : vector<1x8x8xi1> to vector<1x8x8xi1>
    %46 = vector.broadcast %45 : vector<1x8x8xi1> to vector<3x8x8xi1>
    %47 = vector.broadcast %cst_17 : f32 to vector<3x8x8xf32>
    %48 = arith.select %46, %44, %47 : vector<3x8x8xi1>, vector<3x8x8xf32>
    %cst_18 = arith.constant dense<0xFF800000> : vector<3x8xf32>
    %49 = vector.multi_reduction <maximumf>, %48, %cst_18 [2] : vector<3x8x8xf32> to vector<3x8xf32>
    %50 = vector.shape_cast %49 : vector<3x8xf32> to vector<3x8x1xf32>
    %51 = vector.broadcast %50 : vector<3x8x1xf32> to vector<3x8x8xf32>
    %52 = arith.subf %48, %51 : vector<3x8x8xf32>
    %53 = math.exp %52 : vector<3x8x8xf32>
    %cst_19 = arith.constant dense<0.000000e+00> : vector<3x8xf32>
    %54 = vector.multi_reduction <add>, %53, %cst_19 [2] : vector<3x8x8xf32> to vector<3x8xf32>
    %55 = vector.shape_cast %54 : vector<3x8xf32> to vector<3x8x1xf32>
    %56 = tpu.reciprocal %55 {approx = true} : vector<3x8x1xf32> -> vector<3x8x1xf32>
    %57 = vector.broadcast %56 : vector<3x8x1xf32> to vector<3x8x8xf32>
    %58 = arith.mulf %53, %57 : vector<3x8x8xf32>
    %59 = arith.truncf %58 : vector<3x8x8xf32> to vector<3x8x8xbf16>
    "tpu.trace_start"() <{level = 10 : i32, message = "cqk,ckd->cqd"}> : () -> ()
    %cst_20 = arith.constant dense<0.000000e+00> : vector<3x8x16xf32>
    %60 = tpu.matmul %59, %41, %cst_20 {dimension_numbers = #tpu.dot_dimension_numbers<[2], [1], [1], [2], [0, 0, 0, 1, 1, 2], [0], [0]>} : vector<3x8x8xbf16>, vector<3x8x16xbf16>, vector<3x8x16xf32> -> vector<3x8x16xf32>
    "tpu.trace_stop"() : () -> ()
    %61 = arith.truncf %60 : vector<3x8x16xf32> to vector<3x8x16xbf16>
    %c0_21 = arith.constant 0 : index
    %c0_22 = arith.constant 0 : index
    %c0_23 = arith.constant 0 : index
    %62 = vector.load %arg9[%c0_21, %c0_22, %c0_23] : memref<3x8x64xbf16, #tpu.memory_space<vmem>>, vector<3x8x16xbf16>
    tpu.vector_store %arg9[%c0_21, %c0_22, %c0_23], %61 {strides = array<i32>} : memref<3x8x64xbf16, #tpu.memory_space<vmem>>, vector<3x8x16xbf16>,
    %63 = vector.extract_strided_slice %34 {offsets = [0, 0, 16], sizes = [3, 8, 16], strides = [1, 1, 1]} : vector<3x8x192xbf16> to vector<3x8x16xbf16>
    %64 = vector.extract_strided_slice %34 {offsets = [0, 0, 80], sizes = [3, 8, 16], strides = [1, 1, 1]} : vector<3x8x192xbf16> to vector<3x8x16xbf16>
    %65 = vector.extract_strided_slice %34 {offsets = [0, 0, 144], sizes = [3, 8, 16], strides = [1, 1, 1]} : vector<3x8x192xbf16> to vector<3x8x16xbf16>
    "tpu.trace_start"() <{level = 10 : i32, message = "cqd,ckd->cqk"}> : () -> ()
    %cst_24 = arith.constant dense<0.000000e+00> : vector<3x8x8xf32>
    %66 = tpu.matmul %63, %64, %cst_24 {dimension_numbers = #tpu.dot_dimension_numbers<[2], [2], [1], [1], [0, 0, 0, 1, 1, 1], [0], [0]>} : vector<3x8x16xbf16>, vector<3x8x16xbf16>, vector<3x8x8xf32> -> vector<3x8x8xf32>
    "tpu.trace_stop"() : () -> ()
    %cst_25 = arith.constant 2.500000e-01 : f32
    %67 = vector.broadcast %cst_25 : f32 to vector<3x8x8xf32>
    %68 = arith.mulf %66, %67 : vector<3x8x8xf32>
    %cst_26 = arith.constant -1.000000e+30 : f32
    %69 = vector.shape_cast %38 : vector<1x8x8xi1> to vector<1x8x8xi1>
    %70 = vector.broadcast %69 : vector<1x8x8xi1> to vector<3x8x8xi1>
    %71 = vector.broadcast %cst_26 : f32 to vector<3x8x8xf32>
    %72 = arith.select %70, %68, %71 : vector<3x8x8xi1>, vector<3x8x8xf32>
    %cst_27 = arith.constant dense<0xFF800000> : vector<3x8xf32>
    %73 = vector.multi_reduction <maximumf>, %72, %cst_27 [2] : vector<3x8x8xf32> to vector<3x8xf32>
    %74 = vector.shape_cast %73 : vector<3x8xf32> to vector<3x8x1xf32>
    %75 = vector.broadcast %74 : vector<3x8x1xf32> to vector<3x8x8xf32>
    %76 = arith.subf %72, %75 : vector<3x8x8xf32>
    %77 = math.exp %76 : vector<3x8x8xf32>
    %cst_28 = arith.constant dense<0.000000e+00> : vector<3x8xf32>
    %78 = vector.multi_reduction <add>, %77, %cst_28 [2] : vector<3x8x8xf32> to vector<3x8xf32>
    %79 = vector.shape_cast %78 : vector<3x8xf32> to vector<3x8x1xf32>
    %80 = tpu.reciprocal %79 {approx = true} : vector<3x8x1xf32> -> vector<3x8x1xf32>
    %81 = vector.broadcast %80 : vector<3x8x1xf32> to vector<3x8x8xf32>
    %82 = arith.mulf %77, %81 : vector<3x8x8xf32>
    %83 = arith.truncf %82 : vector<3x8x8xf32> to vector<3x8x8xbf16>
    "tpu.trace_start"() <{level = 10 : i32, message = "cqk,ckd->cqd"}> : () -> ()
    %cst_29 = arith.constant dense<0.000000e+00> : vector<3x8x16xf32>
    %84 = tpu.matmul %83, %65, %cst_29 {dimension_numbers = #tpu.dot_dimension_numbers<[2], [1], [1], [2], [0, 0, 0, 1, 1, 2], [0], [0]>} : vector<3x8x8xbf16>, vector<3x8x16xbf16>, vector<3x8x16xf32> -> vector<3x8x16xf32>
    "tpu.trace_stop"() : () -> ()
    %85 = arith.truncf %84 : vector<3x8x16xf32> to vector<3x8x16xbf16>
    %c0_30 = arith.constant 0 : index
    %c0_31 = arith.constant 0 : index
    %c16 = arith.constant 16 : index
    %86 = vector.load %arg9[%c0_30, %c0_31, %c16] : memref<3x8x64xbf16, #tpu.memory_space<vmem>>, vector<3x8x16xbf16>
    tpu.vector_store %arg9[%c0_30, %c0_31, %c16], %85 {strides = array<i32>} : memref<3x8x64xbf16, #tpu.memory_space<vmem>>, vector<3x8x16xbf16>,
    %87 = vector.extract_strided_slice %34 {offsets = [0, 0, 32], sizes = [3, 8, 16], strides = [1, 1, 1]} : vector<3x8x192xbf16> to vector<3x8x16xbf16>
    %88 = vector.extract_strided_slice %34 {offsets = [0, 0, 96], sizes = [3, 8, 16], strides = [1, 1, 1]} : vector<3x8x192xbf16> to vector<3x8x16xbf16>
    %89 = vector.extract_strided_slice %34 {offsets = [0, 0, 160], sizes = [3, 8, 16], strides = [1, 1, 1]} : vector<3x8x192xbf16> to vector<3x8x16xbf16>
    "tpu.trace_start"() <{level = 10 : i32, message = "cqd,ckd->cqk"}> : () -> ()
    %cst_32 = arith.constant dense<0.000000e+00> : vector<3x8x8xf32>
    %90 = tpu.matmul %87, %88, %cst_32 {dimension_numbers = #tpu.dot_dimension_numbers<[2], [2], [1], [1], [0, 0, 0, 1, 1, 1], [0], [0]>} : vector<3x8x16xbf16>, vector<3x8x16xbf16>, vector<3x8x8xf32> -> vector<3x8x8xf32>
    "tpu.trace_stop"() : () -> ()
    %cst_33 = arith.constant 2.500000e-01 : f32
    %91 = vector.broadcast %cst_33 : f32 to vector<3x8x8xf32>
    %92 = arith.mulf %90, %91 : vector<3x8x8xf32>
    %cst_34 = arith.constant -1.000000e+30 : f32
    %93 = vector.shape_cast %38 : vector<1x8x8xi1> to vector<1x8x8xi1>
    %94 = vector.broadcast %93 : vector<1x8x8xi1> to vector<3x8x8xi1>
    %95 = vector.broadcast %cst_34 : f32 to vector<3x8x8xf32>
    %96 = arith.select %94, %92, %95 : vector<3x8x8xi1>, vector<3x8x8xf32>
    %cst_35 = arith.constant dense<0xFF800000> : vector<3x8xf32>
    %97 = vector.multi_reduction <maximumf>, %96, %cst_35 [2] : vector<3x8x8xf32> to vector<3x8xf32>
    %98 = vector.shape_cast %97 : vector<3x8xf32> to vector<3x8x1xf32>
    %99 = vector.broadcast %98 : vector<3x8x1xf32> to vector<3x8x8xf32>
    %100 = arith.subf %96, %99 : vector<3x8x8xf32>
    %101 = math.exp %100 : vector<3x8x8xf32>
    %cst_36 = arith.constant dense<0.000000e+00> : vector<3x8xf32>
    %102 = vector.multi_reduction <add>, %101, %cst_36 [2] : vector<3x8x8xf32> to vector<3x8xf32>
    %103 = vector.shape_cast %102 : vector<3x8xf32> to vector<3x8x1xf32>
    %104 = tpu.reciprocal %103 {approx = true} : vector<3x8x1xf32> -> vector<3x8x1xf32>
    %105 = vector.broadcast %104 : vector<3x8x1xf32> to vector<3x8x8xf32>
    %106 = arith.mulf %101, %105 : vector<3x8x8xf32>
    %107 = arith.truncf %106 : vector<3x8x8xf32> to vector<3x8x8xbf16>
    "tpu.trace_start"() <{level = 10 : i32, message = "cqk,ckd->cqd"}> : () -> ()
    %cst_37 = arith.constant dense<0.000000e+00> : vector<3x8x16xf32>
    %108 = tpu.matmul %107, %89, %cst_37 {dimension_numbers = #tpu.dot_dimension_numbers<[2], [1], [1], [2], [0, 0, 0, 1, 1, 2], [0], [0]>} : vector<3x8x8xbf16>, vector<3x8x16xbf16>, vector<3x8x16xf32> -> vector<3x8x16xf32>
    "tpu.trace_stop"() : () -> ()
    %109 = arith.truncf %108 : vector<3x8x16xf32> to vector<3x8x16xbf16>
    %c0_38 = arith.constant 0 : index
    %c0_39 = arith.constant 0 : index
    %c32 = arith.constant 32 : index
    %110 = vector.load %arg9[%c0_38, %c0_39, %c32] : memref<3x8x64xbf16, #tpu.memory_space<vmem>>, vector<3x8x16xbf16>
    tpu.vector_store %arg9[%c0_38, %c0_39, %c32], %109 {strides = array<i32>} : memref<3x8x64xbf16, #tpu.memory_space<vmem>>, vector<3x8x16xbf16>,
    %111 = vector.extract_strided_slice %34 {offsets = [0, 0, 48], sizes = [3, 8, 16], strides = [1, 1, 1]} : vector<3x8x192xbf16> to vector<3x8x16xbf16>
    %112 = vector.extract_strided_slice %34 {offsets = [0, 0, 112], sizes = [3, 8, 16], strides = [1, 1, 1]} : vector<3x8x192xbf16> to vector<3x8x16xbf16>
    %113 = vector.extract_strided_slice %34 {offsets = [0, 0, 176], sizes = [3, 8, 16], strides = [1, 1, 1]} : vector<3x8x192xbf16> to vector<3x8x16xbf16>
    "tpu.trace_start"() <{level = 10 : i32, message = "cqd,ckd->cqk"}> : () -> ()
    %cst_40 = arith.constant dense<0.000000e+00> : vector<3x8x8xf32>
    %114 = tpu.matmul %111, %112, %cst_40 {dimension_numbers = #tpu.dot_dimension_numbers<[2], [2], [1], [1], [0, 0, 0, 1, 1, 1], [0], [0]>} : vector<3x8x16xbf16>, vector<3x8x16xbf16>, vector<3x8x8xf32> -> vector<3x8x8xf32>
    "tpu.trace_stop"() : () -> ()
    %cst_41 = arith.constant 2.500000e-01 : f32
    %115 = vector.broadcast %cst_41 : f32 to vector<3x8x8xf32>
    %116 = arith.mulf %114, %115 : vector<3x8x8xf32>
    %cst_42 = arith.constant -1.000000e+30 : f32
    %117 = vector.shape_cast %38 : vector<1x8x8xi1> to vector<1x8x8xi1>
    %118 = vector.broadcast %117 : vector<1x8x8xi1> to vector<3x8x8xi1>
    %119 = vector.broadcast %cst_42 : f32 to vector<3x8x8xf32>
    %120 = arith.select %118, %116, %119 : vector<3x8x8xi1>, vector<3x8x8xf32>
    %cst_43 = arith.constant dense<0xFF800000> : vector<3x8xf32>
    %121 = vector.multi_reduction <maximumf>, %120, %cst_43 [2] : vector<3x8x8xf32> to vector<3x8xf32>
    %122 = vector.shape_cast %121 : vector<3x8xf32> to vector<3x8x1xf32>
    %123 = vector.broadcast %122 : vector<3x8x1xf32> to vector<3x8x8xf32>
    %124 = arith.subf %120, %123 : vector<3x8x8xf32>
    %125 = math.exp %124 : vector<3x8x8xf32>
    %cst_44 = arith.constant dense<0.000000e+00> : vector<3x8xf32>
    %126 = vector.multi_reduction <add>, %125, %cst_44 [2] : vector<3x8x8xf32> to vector<3x8xf32>
    %127 = vector.shape_cast %126 : vector<3x8xf32> to vector<3x8x1xf32>
    %128 = tpu.reciprocal %127 {approx = true} : vector<3x8x1xf32> -> vector<3x8x1xf32>
    %129 = vector.broadcast %128 : vector<3x8x1xf32> to vector<3x8x8xf32>
    %130 = arith.mulf %125, %129 : vector<3x8x8xf32>
    %131 = arith.truncf %130 : vector<3x8x8xf32> to vector<3x8x8xbf16>
    "tpu.trace_start"() <{level = 10 : i32, message = "cqk,ckd->cqd"}> : () -> ()
    %cst_45 = arith.constant dense<0.000000e+00> : vector<3x8x16xf32>
    %132 = tpu.matmul %131, %113, %cst_45 {dimension_numbers = #tpu.dot_dimension_numbers<[2], [1], [1], [2], [0, 0, 0, 1, 1, 2], [0], [0]>} : vector<3x8x8xbf16>, vector<3x8x16xbf16>, vector<3x8x16xf32> -> vector<3x8x16xf32>
    "tpu.trace_stop"() : () -> ()
    %133 = arith.truncf %132 : vector<3x8x16xf32> to vector<3x8x16xbf16>
    %c0_46 = arith.constant 0 : index
    %c0_47 = arith.constant 0 : index
    %c48 = arith.constant 48 : index
    %134 = vector.load %arg9[%c0_46, %c0_47, %c48] : memref<3x8x64xbf16, #tpu.memory_space<vmem>>, vector<3x8x16xbf16>
    tpu.vector_store %arg9[%c0_46, %c0_47, %c48], %133 {strides = array<i32>} : memref<3x8x64xbf16, #tpu.memory_space<vmem>>, vector<3x8x16xbf16>,
    %c0_48 = arith.constant 0 : index
    %c0_49 = arith.constant 0 : index
    %c0_50 = arith.constant 0 : index
    %135 = vector.load %arg9[%c0_48, %c0_49, %c0_50] : memref<3x8x64xbf16, #tpu.memory_space<vmem>>, vector<3x8x64xbf16>
    %136 = vector.shape_cast %135 : vector<3x8x64xbf16> to vector<24x64xbf16>
    %c0_51 = arith.constant 0 : index
    %c0_52 = arith.constant 0 : index
    %137 = vector.load %arg6[%c0_51, %c0_52] : memref<64x64xbf16, #tpu.memory_space<vmem>>, vector<64x64xbf16>
    %cst_53 = arith.constant dense<0.000000e+00> : vector<24x64xf32>
    %138 = tpu.matmul %136, %137, %cst_53 {dimension_numbers = #tpu.dot_dimension_numbers<[1], [0], [0], [1], [0, 0, 1, 1], [], []>} : vector<24x64xbf16>, vector<64x64xbf16>, vector<24x64xf32> -> vector<24x64xf32>
    %c0_54 = arith.constant 0 : index
    %c0_55 = arith.constant 0 : index
    %139 = vector.load %arg7[%c0_54, %c0_55] : memref<1x64xf32, #tpu.memory_space<vmem>>, vector<1x64xf32>
    %140 = vector.broadcast %139 : vector<1x64xf32> to vector<24x64xf32>
    %141 = arith.addf %138, %140 : vector<24x64xf32>
    %142 = vector.shape_cast %141 : vector<24x64xf32> to vector<3x8x64xf32>
    %c0_56 = arith.constant 0 : index
    %c0_57 = arith.constant 0 : index
    %c0_58 = arith.constant 0 : index
    %143 = vector.load %arg1[%c0_56, %c0_57, %c0_58] : memref<3x8x64xbf16, #tpu.memory_space<vmem>>, vector<3x8x64xbf16>
    %144 = arith.extf %143 : vector<3x8x64xbf16> to vector<3x8x64xf32>
    %145 = arith.addf %142, %144 : vector<3x8x64xf32>
    %146 = arith.truncf %145 : vector<3x8x64xf32> to vector<3x8x64xbf16>
    %c0_59 = arith.constant 0 : index
    %c0_60 = arith.constant 0 : index
    %c0_61 = arith.constant 0 : index
    %147 = vector.load %arg8[%c0_59, %c0_60, %c0_61] : memref<3x8x64xbf16, #tpu.memory_space<vmem>>, vector<3x8x64xbf16>
    tpu.vector_store %arg8[%c0_59, %c0_60, %c0_61], %146 {strides = array<i32>} : memref<3x8x64xbf16, #tpu.memory_space<vmem>>, vector<3x8x64xbf16>,
    return
  }
  func.func @transform_0(%arg0: i32) -> (i32, i32, i32) {
    %c0_i32 = arith.constant 0 : i32
    %c0_i32_0 = arith.constant 0 : i32
    %c0_i32_1 = arith.constant 0 : i32
    return %arg0, %c0_i32, %c0_i32_0 : i32, i32, i32
  }
  func.func @transform_1(%arg0: i32) -> (i32, i32) {
    %c0_i32 = arith.constant 0 : i32
    %c0_i32_0 = arith.constant 0 : i32
    %c0_i32_1 = arith.constant 0 : i32
    return %c0_i32, %c0_i32_0 : i32, i32
  }
  func.func @transform_2(%arg0: i32) -> (i32, i32) {
    %c0_i32 = arith.constant 0 : i32
    %c0_i32_0 = arith.constant 0 : i32
    %c0_i32_1 = arith.constant 0 : i32
    return %c0_i32, %c0_i32_0 : i32, i32
  }
  func.func @transform_3(%arg0: i32) -> (i32, i32) {
    %c0_i32 = arith.constant 0 : i32
    %c0_i32_0 = arith.constant 0 : i32
    %c0_i32_1 = arith.constant 0 : i32
    return %c0_i32, %c0_i32_0 : i32, i32
  }
  func.func @transform_4(%arg0: i32) -> (i32, i32) {
    %c0_i32 = arith.constant 0 : i32
    %c0_i32_0 = arith.constant 0 : i32
    %c0_i32_1 = arith.constant 0 : i32
    return %c0_i32, %c0_i32_0 : i32, i32
  }
  func.func @transform_5(%arg0: i32) -> (i32, i32) {
    %c0_i32 = arith.constant 0 : i32
    %c0_i32_0 = arith.constant 0 : i32
    %c0_i32_1 = arith.constant 0 : i32
    return %c0_i32, %c0_i32_0 : i32, i32
  }
  func.func @transform_6(%arg0: i32) -> (i32, i32) {
    %c0_i32 = arith.constant 0 : i32
    %c0_i32_0 = arith.constant 0 : i32
    %c0_i32_1 = arith.constant 0 : i32
    return %c0_i32, %c0_i32_0 : i32, i32
  }
  func.func @transform_7(%arg0: i32) -> (i32, i32, i32) {
    %c0_i32 = arith.constant 0 : i32
    %c0_i32_0 = arith.constant 0 : i32
    %c0_i32_1 = arith.constant 0 : i32
    return %arg0, %c0_i32, %c0_i32_0 : i32, i32, i32
  }
}

module attributes {stable_mosaic.version = 11 : i64} {
  func.func @_layernorm_kernel(%arg0: i32, %arg1: memref<48x64xbf16, #tpu.memory_space<vmem>>, %arg2: memref<1x64xf32, #tpu.memory_space<vmem>>, %arg3: memref<1x64xf32, #tpu.memory_space<vmem>>, %arg4: memref<48x64xbf16, #tpu.memory_space<vmem>>) attributes {dimension_semantics = [#tpu.dimension_semantics<parallel>], iteration_bounds = array<i64: 1>, scalar_prefetch = 0 : i64, scratch_operands = 0 : i64, tpu.core_type = #tpu.core_type<tc>, window_params = [{transform_indices = @transform_0, window_bounds = array<i64: 48, 64>}, {pipeline_mode = #tpu.pipeline_mode<synchronous>, transform_indices = @transform_1, window_bounds = array<i64: 1, 64>}, {pipeline_mode = #tpu.pipeline_mode<synchronous>, transform_indices = @transform_2, window_bounds = array<i64: 1, 64>}, {transform_indices = @transform_3, window_bounds = array<i64: 48, 64>}]} {
    %c0 = arith.constant 0 : index
    %c0_0 = arith.constant 0 : index
    %0 = vector.load %arg1[%c0, %c0_0] : memref<48x64xbf16, #tpu.memory_space<vmem>>, vector<48x64xbf16>
    %1 = arith.extf %0 : vector<48x64xbf16> to vector<48x64xf32>
    %cst = arith.constant dense<0.000000e+00> : vector<48xf32>
    %2 = vector.multi_reduction <add>, %1, %cst [1] : vector<48x64xf32> to vector<48xf32>
    %3 = vector.shape_cast %2 : vector<48xf32> to vector<48x1xf32>
    %cst_1 = arith.constant 6.400000e+01 : f32
    %4 = vector.broadcast %cst_1 : f32 to vector<48x1xf32>
    %5 = arith.divf %3, %4 : vector<48x1xf32>
    %6 = vector.broadcast %5 : vector<48x1xf32> to vector<48x64xf32>
    %7 = arith.subf %1, %6 : vector<48x64xf32>
    %8 = arith.mulf %7, %7 : vector<48x64xf32>
    %cst_2 = arith.constant dense<0.000000e+00> : vector<48xf32>
    %9 = vector.multi_reduction <add>, %8, %cst_2 [1] : vector<48x64xf32> to vector<48xf32>
    %10 = vector.shape_cast %9 : vector<48xf32> to vector<48x1xf32>
    %cst_3 = arith.constant 6.400000e+01 : f32
    %11 = vector.broadcast %cst_3 : f32 to vector<48x1xf32>
    %12 = arith.divf %10, %11 : vector<48x1xf32>
    %cst_4 = arith.constant 9.99999974E-6 : f32
    %13 = vector.broadcast %cst_4 : f32 to vector<48x1xf32>
    %14 = arith.addf %12, %13 : vector<48x1xf32>
    %15 = math.rsqrt %14 : vector<48x1xf32>
    %16 = vector.broadcast %15 : vector<48x1xf32> to vector<48x64xf32>
    %17 = arith.mulf %7, %16 : vector<48x64xf32>
    %c0_5 = arith.constant 0 : index
    %c0_6 = arith.constant 0 : index
    %18 = vector.load %arg2[%c0_5, %c0_6] : memref<1x64xf32, #tpu.memory_space<vmem>>, vector<1x64xf32>
    %19 = vector.broadcast %18 : vector<1x64xf32> to vector<48x64xf32>
    %20 = arith.mulf %17, %19 : vector<48x64xf32>
    %c0_7 = arith.constant 0 : index
    %c0_8 = arith.constant 0 : index
    %21 = vector.load %arg3[%c0_7, %c0_8] : memref<1x64xf32, #tpu.memory_space<vmem>>, vector<1x64xf32>
    %22 = vector.broadcast %21 : vector<1x64xf32> to vector<48x64xf32>
    %23 = arith.addf %20, %22 : vector<48x64xf32>
    %24 = arith.truncf %23 : vector<48x64xf32> to vector<48x64xbf16>
    %c0_9 = arith.constant 0 : index
    %c0_10 = arith.constant 0 : index
    %25 = vector.load %arg4[%c0_9, %c0_10] : memref<48x64xbf16, #tpu.memory_space<vmem>>, vector<48x64xbf16>
    tpu.vector_store %arg4[%c0_9, %c0_10], %24 {strides = array<i32>} : memref<48x64xbf16, #tpu.memory_space<vmem>>, vector<48x64xbf16>,
    return
  }
  func.func @transform_0(%arg0: i32) -> (i32, i32) {
    %c0_i32 = arith.constant 0 : i32
    %c0_i32_0 = arith.constant 0 : i32
    return %arg0, %c0_i32 : i32, i32
  }
  func.func @transform_1(%arg0: i32) -> (i32, i32) {
    %c0_i32 = arith.constant 0 : i32
    %c0_i32_0 = arith.constant 0 : i32
    %c0_i32_1 = arith.constant 0 : i32
    return %c0_i32, %c0_i32_0 : i32, i32
  }
  func.func @transform_2(%arg0: i32) -> (i32, i32) {
    %c0_i32 = arith.constant 0 : i32
    %c0_i32_0 = arith.constant 0 : i32
    %c0_i32_1 = arith.constant 0 : i32
    return %c0_i32, %c0_i32_0 : i32, i32
  }
  func.func @transform_3(%arg0: i32) -> (i32, i32) {
    %c0_i32 = arith.constant 0 : i32
    %c0_i32_0 = arith.constant 0 : i32
    return %arg0, %c0_i32 : i32, i32
  }
}

module attributes {stable_mosaic.version = 11 : i64} {
  func.func @_proj_norm_scale_t_kernel(%arg0: i32, %arg1: memref<5x64xbf16, #tpu.memory_space<vmem>>, %arg2: memref<64x32xbf16, #tpu.memory_space<vmem>>, %arg3: memref<1xf32, #tpu.memory_space<smem>>, %arg4: memref<32x5xbf16, #tpu.memory_space<vmem>>) attributes {dimension_semantics = [#tpu.dimension_semantics<parallel>], iteration_bounds = array<i64: 1>, scalar_prefetch = 0 : i64, scratch_operands = 0 : i64, tpu.core_type = #tpu.core_type<tc>, window_params = [{transform_indices = @transform_0, window_bounds = array<i64: 5, 64>}, {pipeline_mode = #tpu.pipeline_mode<synchronous>, transform_indices = @transform_1, window_bounds = array<i64: 64, 32>}, {transform_indices = @transform_2, window_bounds = array<i64: 1>}, {transform_indices = @transform_3, window_bounds = array<i64: 32, 5>}]} {
    %c0 = arith.constant 0 : index
    %c0_0 = arith.constant 0 : index
    %0 = vector.load %arg1[%c0, %c0_0] : memref<5x64xbf16, #tpu.memory_space<vmem>>, vector<5x64xbf16>
    %c0_1 = arith.constant 0 : index
    %c0_2 = arith.constant 0 : index
    %1 = vector.load %arg2[%c0_1, %c0_2] : memref<64x32xbf16, #tpu.memory_space<vmem>>, vector<64x32xbf16>
    %cst = arith.constant dense<0.000000e+00> : vector<5x32xf32>
    %2 = tpu.matmul %0, %1, %cst {dimension_numbers = #tpu.dot_dimension_numbers<[1], [0], [0], [1], [0, 0, 1, 1], [], []>} : vector<5x64xbf16>, vector<64x32xbf16>, vector<5x32xf32> -> vector<5x32xf32>
    %3 = arith.mulf %2, %2 : vector<5x32xf32>
    %cst_3 = arith.constant dense<0.000000e+00> : vector<5xf32>
    %4 = vector.multi_reduction <add>, %3, %cst_3 [1] : vector<5x32xf32> to vector<5xf32>
    %5 = vector.shape_cast %4 : vector<5xf32> to vector<5x1xf32>
    %cst_4 = arith.constant 9.99999996E-13 : f32
    %6 = vector.broadcast %cst_4 : f32 to vector<5x1xf32>
    %7 = arith.addf %5, %6 : vector<5x1xf32>
    %8 = math.rsqrt %7 : vector<5x1xf32>
    %9 = vector.broadcast %8 : vector<5x1xf32> to vector<5x32xf32>
    %10 = arith.mulf %2, %9 : vector<5x32xf32>
    %c0_5 = arith.constant 0 : index
    %11 = memref.load %arg3[%c0_5] : memref<1xf32, #tpu.memory_space<smem>>
    %12 = vector.broadcast %11 : f32 to vector<5x32xf32>
    %13 = arith.mulf %10, %12 : vector<5x32xf32>
    %14 = tpu.transpose %13, [1, 0] : vector<5x32xf32> -> vector<32x5xf32>
    %15 = arith.truncf %14 : vector<32x5xf32> to vector<32x5xbf16>
    %c0_6 = arith.constant 0 : index
    %c0_7 = arith.constant 0 : index
    %16 = vector.load %arg4[%c0_6, %c0_7] : memref<32x5xbf16, #tpu.memory_space<vmem>>, vector<32x5xbf16>
    tpu.vector_store %arg4[%c0_6, %c0_7], %15 {strides = array<i32>} : memref<32x5xbf16, #tpu.memory_space<vmem>>, vector<32x5xbf16>,
    return
  }
  func.func @transform_0(%arg0: i32) -> (i32, i32) {
    %c0_i32 = arith.constant 0 : i32
    %c0_i32_0 = arith.constant 0 : i32
    return %arg0, %c0_i32 : i32, i32
  }
  func.func @transform_1(%arg0: i32) -> (i32, i32) {
    %c0_i32 = arith.constant 0 : i32
    %c0_i32_0 = arith.constant 0 : i32
    %c0_i32_1 = arith.constant 0 : i32
    return %c0_i32, %c0_i32_0 : i32, i32
  }
  func.func @transform_2(%arg0: i32) -> i32 {
    %c0_i32 = arith.constant 0 : i32
    %c0_i32_0 = arith.constant 0 : i32
    return %c0_i32 : i32
  }
  func.func @transform_3(%arg0: i32) -> (i32, i32) {
    %c0_i32 = arith.constant 0 : i32
    %c0_i32_0 = arith.constant 0 : i32
    return %c0_i32, %arg0 : i32, i32
  }
}

module attributes {stable_mosaic.version = 11 : i64} {
  func.func @_logits_kernel(%arg0: i32, %arg1: memref<2x32xf32, #tpu.memory_space<vmem>>, %arg2: memref<32x5xbf16, #tpu.memory_space<vmem>>, %arg3: memref<2x5xf32, #tpu.memory_space<vmem>>) attributes {dimension_semantics = [#tpu.dimension_semantics<parallel>], iteration_bounds = array<i64: 1>, scalar_prefetch = 0 : i64, scratch_operands = 0 : i64, tpu.core_type = #tpu.core_type<tc>, window_params = [{transform_indices = @transform_0, window_bounds = array<i64: 2, 32>}, {pipeline_mode = #tpu.pipeline_mode<synchronous>, transform_indices = @transform_1, window_bounds = array<i64: 32, 5>}, {transform_indices = @transform_2, window_bounds = array<i64: 2, 5>}]} {
    %c0 = arith.constant 0 : index
    %c0_0 = arith.constant 0 : index
    %0 = vector.load %arg1[%c0, %c0_0] : memref<2x32xf32, #tpu.memory_space<vmem>>, vector<2x32xf32>
    %1 = arith.mulf %0, %0 : vector<2x32xf32>
    %cst = arith.constant dense<0.000000e+00> : vector<2xf32>
    %2 = vector.multi_reduction <add>, %1, %cst [1] : vector<2x32xf32> to vector<2xf32>
    %3 = vector.shape_cast %2 : vector<2xf32> to vector<2x1xf32>
    %cst_1 = arith.constant 9.99999996E-13 : f32
    %4 = vector.broadcast %cst_1 : f32 to vector<2x1xf32>
    %5 = arith.addf %3, %4 : vector<2x1xf32>
    %6 = math.rsqrt %5 : vector<2x1xf32>
    %7 = vector.broadcast %6 : vector<2x1xf32> to vector<2x32xf32>
    %8 = arith.mulf %0, %7 : vector<2x32xf32>
    %9 = arith.truncf %8 : vector<2x32xf32> to vector<2x32xbf16>
    %c0_2 = arith.constant 0 : index
    %c0_3 = arith.constant 0 : index
    %10 = vector.load %arg2[%c0_2, %c0_3] : memref<32x5xbf16, #tpu.memory_space<vmem>>, vector<32x5xbf16>
    %cst_4 = arith.constant dense<0.000000e+00> : vector<2x5xf32>
    %11 = tpu.matmul %9, %10, %cst_4 {dimension_numbers = #tpu.dot_dimension_numbers<[1], [0], [0], [1], [0, 0, 1, 1], [], []>} : vector<2x32xbf16>, vector<32x5xbf16>, vector<2x5xf32> -> vector<2x5xf32>
    %c0_5 = arith.constant 0 : index
    %c0_6 = arith.constant 0 : index
    %12 = vector.load %arg3[%c0_5, %c0_6] : memref<2x5xf32, #tpu.memory_space<vmem>>, vector<2x5xf32>
    tpu.vector_store %arg3[%c0_5, %c0_6], %11 {strides = array<i32>} : memref<2x5xf32, #tpu.memory_space<vmem>>, vector<2x5xf32>,
    return
  }
  func.func @transform_0(%arg0: i32) -> (i32, i32) {
    %c0_i32 = arith.constant 0 : i32
    %c0_i32_0 = arith.constant 0 : i32
    return %arg0, %c0_i32 : i32, i32
  }
  func.func @transform_1(%arg0: i32) -> (i32, i32) {
    %c0_i32 = arith.constant 0 : i32
    %c0_i32_0 = arith.constant 0 : i32
    %c0_i32_1 = arith.constant 0 : i32
    return %c0_i32, %c0_i32_0 : i32, i32
  }
  func.func @transform_2(%arg0: i32) -> (i32, i32) {
    %c0_i32 = arith.constant 0 : i32
    %c0_i32_0 = arith.constant 0 : i32
    return %arg0, %c0_i32 : i32, i32
  }
}

</mosaic_0001>

<bundles_post_ra>
// kernel: _clip_forward.11
= control target key start
LH: loop header
LB: loop body
LE: loop exit
PB: predicated region body
PF: predicated region fallthrough
CT: control target
= control target key end

     0   :  { %vm26_vm0 = vcmask 523264   ;;  %v234_v15 = vmov 64.0   ;;  %vm192_vm8 = vcmask 519168   ;;  %s384_s0 = inlined_call_operand.vmem [shape: bf16[48,64], index: 0, kind: input, shape index: {}]   ;;  %s385_s1 = inlined_call_operand.vmem [shape: f32[1,64], index: 1, kind: input, shape index: {}]   ;;  %s386_s2 = inlined_call_operand.vmem [shape: f32[1,64], index: 2, kind: input, shape index: {}]   ;;  %s387_s3 = inlined_call_operand.vmem [shape: bf16[48,64], index: 3, kind: output, shape index: {}]  }
   0x1   :  { %v216_v0 = vld [vmem:[%s384_s0 + $0x10] sm:$0xff]   ;;  %v215_v1 = vld [vmem:[%s384_s0 + $0x8] sm:$0xff]   ;;  %v204_v2 = vld [vmem:[%s384_s0] sm:$0xff]   ;;  %220 = vrcp.f32 %v234_v15 }
   0x2   :  { %v213_v3 = vunpack.c.l.bf16 %v216_v0  ;;  %v209_v4 = vunpack.c.l.bf16 %v215_v1  ;;  %v205_v5 = vunpack.c.l.bf16 %v204_v2  ;;  %v214_v9 = vunpack.c.h.bf16 %v216_v0 }
   0x3   :  { %v210_v10 = vunpack.c.h.bf16 %v215_v1  ;;  %v206_v11 = vunpack.c.h.bf16 %v204_v2 }
   0x4   :  { %v39_v6 = vsel %vm26_vm0, %v213_v3, 0.0  ;;  %v33_v7 = vsel %vm26_vm0, %v209_v4, 0.0  ;;  %v27_v8 = vsel %vm26_vm0, %v205_v5, 0.0  ;;  %v42_v12 = vsel %vm26_vm0, %v214_v9, 0.0 }
   0x5   :  { %40 = vadd.xlane.f32.xlu2 %v39_v6  ;;  %34 = vadd.xlane.f32.xlu1 %v33_v7  ;;  %v36_v13 = vsel %vm26_vm0, %v210_v10, 0.0  ;;  %v30_v14 = vsel %vm26_vm0, %v206_v11, 0.0 }
   0x6   :  { %28 = vadd.xlane.f32.xlu0 %v27_v8 }
   0x7   :  { %v221_v16 = vpop.eup %220 }
   0x8   :  { %v46_v17 = vmul.f32 64.0, %v221_v16  ;;  %vm50_vm1 = vweird.f32 %v221_v16 }
   0xa   :  { %v47_v18 = vsub.f32 1.0, %v46_v17 }
   0xc   :  { %v48_v19 = vmul.f32 %v221_v16, %v47_v18 }
   0xd   :  { %43 = vadd.xlane.f32.xlu2 %v42_v12  ;;  %37 = vadd.xlane.f32.xlu1 %v36_v13 }
   0xe   :  { %31 = vadd.xlane.f32.xlu0 %v30_v14  ;;  %v49_v20 = vadd.f32 %v221_v16, %v48_v19 }
  0x10   :  { %v270_v21 = vsel %vm50_vm1, %v221_v16, %v49_v20 }
  0x78   :  { %v41_v22 = vpop.xlane.xlu2 %40  ;;  %v35_v23 = vpop.xlane.xlu1 %34 }
  0x79   :  { %v54_v24 = vmul.f32 %v270_v21, %v35_v23  ;;  %v29_v25 = vpop.xlane.xlu0 %28  ;;  %v56_v41 = vmul.f32 %v270_v21, %v41_v22  ;;  %v325_v22 = vld [vmem:[%s385_s1] ss:$0 sm:$0xff] }
  0x7a   :  { %v52_v26 = vmul.f32 %v270_v21, %v29_v25 }
  0x7b   :  { %v274_v27 = vsub.f32 %v209_v4, %v54_v24  ;;  %v302_v48 = vsub.f32 %v213_v3, %v56_v41 }
  0x7c   :  { %v276_v28 = vsub.f32 %v205_v5, %v52_v26 }
  0x7d   :  { %v66_v29 = vmul.f32 %v274_v27, %v274_v27  ;;  %v68_v50 = vmul.f32 %v302_v48, %v302_v48 }
  0x7e   :  { %v64_v30 = vmul.f32 %v276_v28, %v276_v28 }
  0x7f   :  { %v76_v31 = vsel %vm26_vm0, %v66_v29, 0.0  ;;  %v82_v51 = vsel %vm26_vm0, %v68_v50, 0.0  ;;  %v332_v29 = vld [vmem:[%s386_s2] ss:$0 sm:$0xff] }
  0x80   :  { %v44_v32 = vpop.xlane.xlu2 %43  ;;  %77 = vadd.xlane.f32.xlu2 %v76_v31  ;;  %v38_v33 = vpop.xlane.xlu1 %37  ;;  %v70_v34 = vsel %vm26_vm0, %v64_v30, 0.0 }
  0x81   :  { %v57_v35 = vmul.f32 %v270_v21, %v44_v32  ;;  %v55_v36 = vmul.f32 %v270_v21, %v38_v33  ;;  %71 = vadd.xlane.f32.xlu0 %v70_v34  ;;  %v32_v37 = vpop.xlane.xlu0 %31 }
  0x82   :  { %v53_v38 = vmul.f32 %v270_v21, %v32_v37 }
  0x83   :  { %v287_v39 = vsub.f32 %v214_v9, %v57_v35  ;;  %v289_v40 = vsub.f32 %v210_v10, %v55_v36 }
  0x84   :  { %v292_v42 = vsub.f32 %v206_v11, %v53_v38 }
  0x85   :  { %v69_v43 = vmul.f32 %v287_v39, %v287_v39  ;;  %v67_v44 = vmul.f32 %v289_v40, %v289_v40 }
  0x86   :  { %v65_v45 = vmul.f32 %v292_v42, %v292_v42 }
  0x87   :  { %v85_v46 = vsel %vm26_vm0, %v69_v43, 0.0  ;;  %v79_v47 = vsel %vm26_vm0, %v67_v44, 0.0 }
  0x88   :  { %86 = vadd.xlane.f32.xlu2 %v85_v46  ;;  %v73_v49 = vsel %vm26_vm0, %v65_v45, 0.0 }
  0x89   :  { %80 = vadd.xlane.f32.xlu0 %v79_v47  ;;  %74 = vadd.xlane.f32.xlu1 %v73_v49 }
  0x91   :  { %83 = vadd.xlane.f32.xlu1 %v82_v51 }
  0xf3   :  { %v78_v52 = vpop.xlane.xlu2 %77 }
  0xf4   :  { %v90_v53 = vmul.f32 %v78_v52, %v270_v21  ;;  %v72_v54 = vpop.xlane.xlu0 %71 }
  0xf5   :  { %v88_v55 = vmul.f32 %v72_v54, %v270_v21 }
  0xf6   :  { %v96_v56 = vadd.f32 1e-05, %v90_v53 }
  0xf7   :  { %v94_v57 = vadd.f32 1e-05, %v88_v55 }
  0xf8   :  { %222 = vrsqrt.f32 %v96_v56  ;;  %vm126_vm2 = vweird.f32 %v96_v56 }
  0xf9   :  { %224 = vrsqrt.f32 %v94_v57  ;;  %vm106_vm6 = vweird.f32 %v94_v57 }
  0xfb   :  { %v87_v58 = vpop.xlane.xlu2 %86 }
  0xfc   :  { %v93_v59 = vmul.f32 %v87_v58, %v270_v21  ;;  %v75_v60 = vpop.xlane.xlu1 %74  ;;  %v81_v61 = vpop.xlane.xlu0 %80 }
  0xfd   :  { %v89_v62 = vmul.f32 %v75_v60, %v270_v21  ;;  %v91_v63 = vmul.f32 %v81_v61, %v270_v21 }
  0xfe   :  { %v223_v0 = vpop.eup %222  ;;  %v99_v1 = vadd.f32 1e-05, %v93_v59 }
  0xff   :  { %v225_v2 = vpop.eup %224  ;;  %v121_v3 = vmul.f32 %v223_v0, %v96_v56  ;;  %v313_v4 = vadd.f32 1e-05, %v89_v62  ;;  %v315_v5 = vadd.f32 1e-05, %v91_v63  ;;  %vm127_vm3 = vweird.f32 %v223_v0 }
 0x100   :  { %v101_v6 = vmul.f32 %v225_v2, %v94_v57  ;;  %226 = vrsqrt.f32 %v99_v1  ;;  %vm107_vm4 = vweird.f32 %v225_v2  ;;  %vm128_vm5 = vmor %vm126_vm2, %vm127_vm3  ;;  %vm156_vm9 = vweird.f32 %v99_v1 }
 0x101   :  { %v122_v7 = vmul.f32 %v223_v0, %v121_v3  ;;  %228 = vrsqrt.f32 %v313_v4  ;;  %vm108_vm7 = vmor %vm106_vm6, %vm107_vm4  ;;  %vm136_vm12 = vweird.f32 %v315_v5  ;;  %vm116_vm15 = vweird.f32 %v313_v4 }
 0x102   :  { %v102_v8 = vmul.f32 %v225_v2, %v101_v6  ;;  %230 = vrsqrt.f32 %v315_v5 }
 0x103   :  { %v123_v9 = vmul.f32 0.5, %v122_v7 }
 0x104   :  { %v103_v10 = vmul.f32 0.5, %v102_v8  ;;  %v84_v11 = vpop.xlane.xlu1 %83 }
 0x105   :  { %v124_v12 = vsub.f32 1.5, %v123_v9  ;;  %v92_v13 = vmul.f32 %v84_v11, %v270_v21 }
 0x106   :  { %v227_v14 = vpop.eup %226  ;;  %v104_v15 = vsub.f32 1.5, %v103_v10 }
 0x107   :  { %v229_v16 = vpop.eup %228  ;;  %v125_v17 = vmul.f32 %v223_v0, %v124_v12  ;;  %v151_v18 = vmul.f32 %v227_v14, %v99_v1  ;;  %v320_v19 = vadd.f32 1e-05, %v92_v13  ;;  %vm157_vm10 = vweird.f32 %v227_v14 }
 0x108   :  { %v231_v20 = vpop.eup %230  ;;  %v105_v23 = vmul.f32 %v225_v2, %v104_v15  ;;  %v111_v24 = vmul.f32 %v229_v16, %v313_v4  ;;  %vm117_vm11 = vweird.f32 %v229_v16  ;;  %vm158_vm14 = vmor %vm156_vm9, %vm157_vm10 }
 0x109   :  { %v129_v21 = vsel %vm128_vm5, %v223_v0, %v125_v17  ;;  %v152_v25 = vmul.f32 %v227_v14, %v151_v18  ;;  %v131_v26 = vmul.f32 %v231_v20, %v315_v5  ;;  %232 = vrsqrt.f32 %v320_v19  ;;  %vm118_vm0 = vmor %vm116_vm15, %vm117_vm11 }
 0x10a   :  { %v162_v30 = vmul.f32 %v129_v21, %v274_v27  ;;  %v109_v31 = vsel %vm108_vm7, %v225_v2, %v105_v23  ;;  %v112_v32 = vmul.f32 %v229_v16, %v111_v24  ;;  %vm137_vm13 = vweird.f32 %v231_v20 }
 0x10b   :  { %v160_v33 = vmul.f32 %v109_v31, %v276_v28  ;;  %v153_v34 = vmul.f32 0.5, %v152_v25  ;;  %v132_v35 = vmul.f32 %v231_v20, %v131_v26  ;;  %vm138_vm1 = vmor %vm136_vm12, %vm137_vm13  ;;  %vm146_vm3 = vweird.f32 %v320_v19 }
 0x10c   :  { %v172_v36 = vmul.f32 %v325_v22, %v162_v30  ;;  %v113_v37 = vmul.f32 0.5, %v112_v32 }
 0x10d   :  { %v170_v38 = vmul.f32 %v325_v22, %v160_v33  ;;  %v154_v41 = vsub.f32 1.5, %v153_v34  ;;  %v133_v43 = vmul.f32 0.5, %v132_v35 }
 0x10e   :  { %v182_v27 = vadd.f32 %v332_v29, %v172_v36  ;;  %v114_v44 = vsub.f32 1.5, %v113_v37 }
 0x10f   :  { %v180_v28 = vadd.f32 %v332_v29, %v170_v38  ;;  %v155_v45 = vmul.f32 %v227_v14, %v154_v41  ;;  %v134_v46 = vsub.f32 1.5, %v133_v43  ;;  %v233_v47 = vpop.eup %232 }
 0x110   :  { %v188_v49 = vpack.c.bf16 %v182_v27, %v182_v27  ;;  %v115_v50 = vmul.f32 %v229_v16, %v114_v44  ;;  %v141_v54 = vmul.f32 %v233_v47, %v320_v19  ;;  %vm147_vm2 = vweird.f32 %v233_v47 }
 0x111   :  { %v186_v51 = vpack.c.bf16 %v180_v28, %v180_v28  ;;  %v159_v52 = vsel %vm158_vm14, %v227_v14, %v155_v45  ;;  %v135_v53 = vmul.f32 %v231_v20, %v134_v46  ;;  %vm148_vm4 = vmor %vm146_vm3, %vm147_vm2 }
 0x112   :  { %195 = vst.msk [vmem:[%s387_s3 + $0x8] sm:$0xf] %vm192_vm8, %v188_v49  ;;  %v165_v55 = vmul.f32 %v159_v52, %v287_v39  ;;  %v119_v56 = vsel %vm118_vm0, %v229_v16, %v115_v50  ;;  %v142_v59 = vmul.f32 %v233_v47, %v141_v54 }
 0x113   :  { %193 = vst.msk [vmem:[%s387_s3] sm:$0xf] %vm192_vm8, %v186_v51  ;;  %v161_v57 = vmul.f32 %v119_v56, %v292_v42  ;;  %v139_v58 = vsel %vm138_vm1, %v231_v20, %v135_v53 }
 0x114   :  { %v175_v60 = vmul.f32 %v325_v22, %v165_v55  ;;  %v163_v61 = vmul.f32 %v139_v58, %v289_v40  ;;  %v143_v39 = vmul.f32 0.5, %v142_v59 }
 0x115   :  { %v171_v62 = vmul.f32 %v325_v22, %v161_v57 }
 0x116   :  { %v185_v63 = vadd.f32 %v332_v29, %v175_v60  ;;  %v173_v0 = vmul.f32 %v325_v22, %v163_v61  ;;  %v144_v2 = vsub.f32 1.5, %v143_v39 }
 0x117   :  { %v181_v1 = vadd.f32 %v332_v29, %v171_v62 }
 0x118   :  { %v191_v3 = vpack.c.bf16 %v185_v63, %v185_v63  ;;  %v183_v42 = vadd.f32 %v332_v29, %v173_v0  ;;  %v145_v5 = vmul.f32 %v233_v47, %v144_v2 }
 0x119   :  { %v187_v4 = vpack.c.bf16 %v181_v1, %v181_v1 }
 0x11a   :  { %198 = vst.msk [vmem:[%s387_s3 + $0x14] sm:$0xf] %vm192_vm8, %v191_v3  ;;  %v189_v40 = vpack.c.bf16 %v183_v42, %v183_v42  ;;  %v149_v6 = vsel %vm148_vm4, %v233_v47, %v145_v5 }
 0x11b   :  { %194 = vst.msk [vmem:[%s387_s3 + $0x4] sm:$0xf] %vm192_vm8, %v187_v4  ;;  %v164_v7 = vmul.f32 %v149_v6, %v302_v48 }
 0x11c   :  { %196 = vst.msk [vmem:[%s387_s3 + $0xc] sm:$0xf] %vm192_vm8, %v189_v40 }
 0x11d   :  { %v174_v8 = vmul.f32 %v325_v22, %v164_v7 }
 0x11f   :  { %v184_v9 = vadd.f32 %v332_v29, %v174_v8 }
 0x121   :  { %v190_v10 = vpack.c.bf16 %v184_v9, %v184_v9 }
 0x123   :  { %197 = vst.msk [vmem:[%s387_s3 + $0x10] sm:$0xf] %vm192_vm8, %v190_v10 }

// kernel: _clip_forward.8
= control target key start
LH: loop header
LB: loop body
LE: loop exit
PB: predicated region body
PF: predicated region fallthrough
CT: control target
= control target key end

     0   :  { %vm39_vm0 = vcmask 523264   ;;  %v998_v15 = vmov 64.0   ;;  %s1539_s0 = inlined_call_operand.vmem [shape: bf16[48,64], index: 0, kind: input, shape index: {}]   ;;  %s1540_s1 = inlined_call_operand.vmem [shape: f32[1,64], index: 1, kind: input, shape index: {}]   ;;  %s1541_s2 = inlined_call_operand.vmem [shape: f32[1,64], index: 2, kind: input, shape index: {}]   ;;  %s1542_s3 = inlined_call_operand.vmem [shape: bf16[64,256], index: 3, kind: input, shape index: {}]   ;;  %s1543_s5 = inlined_call_operand.vmem [shape: bf16[256,64], index: 5, kind: input, shape index: {}]   ;;  %s1544_s4 = inlined_call_operand.vmem [shape: f32[1,256], index: 4, kind: input, shape index: {}]   ;;  %s1545_s6 = inlined_call_operand.vmem [shape: f32[1,64], index: 6, kind: input, shape index: {}]   ;;  %s1546_s7 = inlined_call_operand.vmem [shape: bf16[48,64], index: 7, kind: output, shape index: {}]  }
   0x1   :  { %v931_v0 = vld [vmem:[%s1539_s0 + $0x10] sm:$0xff]   ;;  %v930_v1 = vld [vmem:[%s1539_s0 + $0x8] sm:$0xff]   ;;  %v919_v2 = vld [vmem:[%s1539_s0] sm:$0xff]   ;;  %936 = vrcp.f32 %v998_v15 }
   0x2   :  { %v1048_v3 = vunpack.c.l.bf16 %v931_v0  ;;  %v1050_v4 = vunpack.c.l.bf16 %v930_v1  ;;  %v1052_v5 = vunpack.c.l.bf16 %v919_v2  ;;  %v1060_v9 = vunpack.c.h.bf16 %v931_v0  ;;  %v806_v52 = vld [vmem:[%s1542_s3 + $0x30] sm:$0xf]  ;;  %v901_v53 = vld [vmem:[%s1542_s3 + $0x34] sm:$0xf0]  ;;  %v900_v54 = vld [vmem:[%s1542_s3 + $0x34] sm:$0xf] }
   0x3   :  { %v1062_v10 = vunpack.c.h.bf16 %v930_v1  ;;  %v1064_v11 = vunpack.c.h.bf16 %v919_v2  ;;  %v807_v55 = vor.u32 %v901_v53, %v806_v52  ;;  %v808_v56 = vld [vmem:[%s1542_s3 + $0x38] sm:$0xf0]  ;;  %v798_v58 = vld [vmem:[%s1542_s3 + $0x20] sm:$0xf]  ;;  %v899_v59 = vld [vmem:[%s1542_s3 + $0x24] sm:$0xf0] }
   0x4   :  { %v52_v6 = vsel %vm39_vm0, %v1048_v3, 0.0  ;;  %v46_v7 = vsel %vm39_vm0, %v1050_v4, 0.0  ;;  %v40_v8 = vsel %vm39_vm0, %v1052_v5, 0.0  ;;  %v55_v12 = vsel %vm39_vm0, %v1060_v9, 0.0  ;;  %v898_v60 = vld [vmem:[%s1542_s3 + $0x24] sm:$0xf] }
   0x5   :  { %53 = vadd.xlane.f32.xlu2 %v52_v6  ;;  %47 = vadd.xlane.f32.xlu1 %v46_v7  ;;  %v49_v13 = vsel %vm39_vm0, %v1062_v10, 0.0  ;;  %v43_v14 = vsel %vm39_vm0, %v1064_v11, 0.0  ;;  %v811_v57 = vor.u32 %v900_v54, %v808_v56  ;;  %v799_v61 = vor.u32 %v899_v59, %v798_v58  ;;  %v800_v62 = vld [vmem:[%s1542_s3 + $0x28] sm:$0xf0]  ;;  %v790_v0 = vld [vmem:[%s1542_s3 + $0x10] sm:$0xf] }
   0x6   :  { %41 = vadd.xlane.f32.xlu0 %v40_v8  ;;  %269 = vmatpush.bf16.msra.mxu0 %v807_v55  ;;  %v803_v63 = vor.u32 %v898_v60, %v800_v62  ;;  %v897_v1 = vld [vmem:[%s1542_s3 + $0x14] sm:$0xf0]  ;;  %v896_v2 = vld [vmem:[%s1542_s3 + $0x14] sm:$0xf]  ;;  %v792_v7 = vld [vmem:[%s1542_s3 + $0x18] sm:$0xf0] }
   0x7   :  { %v937_v16 = vpop.eup %936  ;;  %293 = vmatpush.bf16.msra.mxu1 %v811_v57  ;;  %v791_v6 = vor.u32 %v897_v1, %v790_v0  ;;  %v782_v15 = vld [vmem:[%s1542_s3] sm:$0xf] }
   0x8   :  { %v59_v17 = vmul.f32 64.0, %v937_v16  ;;  %vm63_vm1 = vweird.f32 %v937_v16  ;;  %v933_v62 = vld [vmem:[%s1540_s1] ss:$0 sm:$0xff] }
   0xa   :  { %v60_v18 = vsub.f32 1.0, %v59_v17  ;;  %270 = vmatpush.bf16.msra.mxu0 %v799_v61 }
   0xb   :  { %294 = vmatpush.bf16.msra.mxu1 %v803_v63 }
   0xc   :  { %v61_v19 = vmul.f32 %v937_v16, %v60_v18 }
   0xd   :  { %56 = vadd.xlane.f32.xlu2 %v55_v12  ;;  %50 = vadd.xlane.f32.xlu1 %v49_v13  ;;  %v795_v13 = vor.u32 %v896_v2, %v792_v7 }
   0xe   :  { %44 = vadd.xlane.f32.xlu0 %v43_v14  ;;  %v62_v20 = vadd.f32 %v937_v16, %v61_v19  ;;  %271 = vmatpush.bf16.msra.mxu0 %v791_v6 }
   0xf   :  { %295 = vmatpush.bf16.msra.mxu1 %v795_v13 }
  0x10   :  { %v1072_v21 = vsel %vm63_vm1, %v937_v16, %v62_v20  ;;  %v895_v16 = vld [vmem:[%s1542_s3 + $0x4] sm:$0xf0]  ;;  %v894_v20 = vld [vmem:[%s1542_s3 + $0x4] sm:$0xf] }
  0x11   :  { %v783_v19 = vor.u32 %v895_v16, %v782_v15 }
  0x13   :  { %272 = vmatpush.bf16.msra.mxu0 %v783_v19 }
  0x78   :  { %v54_v22 = vpop.xlane.xlu2 %53  ;;  %v48_v23 = vpop.xlane.xlu1 %47 }
  0x79   :  { %v67_v24 = vmul.f32 %v1072_v21, %v48_v23  ;;  %v42_v25 = vpop.xlane.xlu0 %41  ;;  %v69_v38 = vmul.f32 %v1072_v21, %v54_v22  ;;  %v784_v22 = vld [vmem:[%s1542_s3 + $0x8] sm:$0xf0] }
  0x7a   :  { %v65_v26 = vmul.f32 %v1072_v21, %v42_v25  ;;  %v787_v23 = vor.u32 %v894_v20, %v784_v22 }
  0x7b   :  { %v1077_v27 = vsub.f32 %v1050_v4, %v67_v24  ;;  %v1106_v45 = vsub.f32 %v1048_v3, %v69_v38 }
  0x7c   :  { %v1080_v28 = vsub.f32 %v1052_v5, %v65_v26  ;;  %296 = vmatpush.bf16.msra.mxu1 %v787_v23 }
  0x7d   :  { %v79_v29 = vmul.f32 %v1077_v27, %v1077_v27  ;;  %v81_v50 = vmul.f32 %v1106_v45, %v1106_v45 }
  0x7e   :  { %v77_v30 = vmul.f32 %v1080_v28, %v1080_v28 }
  0x7f   :  { %v89_v31 = vsel %vm39_vm0, %v79_v29, 0.0  ;;  %v95_v51 = vsel %vm39_vm0, %v81_v50, 0.0 }
  0x80   :  { %v57_v32 = vpop.xlane.xlu2 %56  ;;  %90 = vadd.xlane.f32.xlu2 %v89_v31  ;;  %v51_v33 = vpop.xlane.xlu1 %50  ;;  %v83_v34 = vsel %vm39_vm0, %v77_v30, 0.0 }
  0x81   :  { %v70_v35 = vmul.f32 %v1072_v21, %v57_v32  ;;  %v68_v36 = vmul.f32 %v1072_v21, %v51_v33  ;;  %84 = vadd.xlane.f32.xlu0 %v83_v34  ;;  %v45_v37 = vpop.xlane.xlu0 %44 }
  0x82   :  { %v66_v39 = vmul.f32 %v1072_v21, %v45_v37 }
  0x83   :  { %v1093_v40 = vsub.f32 %v1060_v9, %v70_v35  ;;  %v1096_v41 = vsub.f32 %v1062_v10, %v68_v36 }
  0x84   :  { %v1099_v42 = vsub.f32 %v1064_v11, %v66_v39 }
  0x85   :  { %v82_v43 = vmul.f32 %v1093_v40, %v1093_v40  ;;  %v80_v44 = vmul.f32 %v1096_v41, %v1096_v41 }
  0x86   :  { %v78_v46 = vmul.f32 %v1099_v42, %v1099_v42 }
  0x87   :  { %v98_v47 = vsel %vm39_vm0, %v82_v43, 0.0  ;;  %v92_v48 = vsel %vm39_vm0, %v80_v44, 0.0 }
  0x88   :  { %99 = vadd.xlane.f32.xlu2 %v98_v47  ;;  %v86_v49 = vsel %vm39_vm0, %v78_v46, 0.0 }
  0x89   :  { %93 = vadd.xlane.f32.xlu0 %v92_v48  ;;  %87 = vadd.xlane.f32.xlu1 %v86_v49 }
  0x91   :  { %96 = vadd.xlane.f32.xlu1 %v95_v51 }
  0xf3   :  { %v91_v8 = vpop.xlane.xlu2 %90 }
  0xf4   :  { %v85_v12 = vpop.xlane.xlu0 %84  ;;  %v103_v17 = vmul.f32 %v91_v8, %v1072_v21 }
  0xf5   :  { %v101_v14 = vmul.f32 %v85_v12, %v1072_v21  ;;  %v934_v12 = vld [vmem:[%s1541_s2] ss:$0 sm:$0xff] }
  0xf6   :  { %v1166_v24 = vadd.f32 1e-05, %v103_v17 }
  0xf7   :  { %v107_v18 = vadd.f32 1e-05, %v101_v14 }
  0xf8   :  { %vm139_vm10 = vweird.f32 %v1166_v24 }
  0xf9   :  { %938 = vrsqrt.f32 %v107_v18  ;;  %vm119_vm3 = vweird.f32 %v107_v18 }
  0xfa   :  { %940 = vrsqrt.f32 %v1166_v24 }
  0xfb   :  { %v100_v37 = vpop.xlane.xlu2 %99 }
  0xfc   :  { %v88_v25 = vpop.xlane.xlu1 %87  ;;  %v94_v26 = vpop.xlane.xlu0 %93  ;;  %v106_v47 = vmul.f32 %v100_v37, %v1072_v21 }
  0xfd   :  { %v102_v29 = vmul.f32 %v88_v25, %v1072_v21  ;;  %v104_v30 = vmul.f32 %v94_v26, %v1072_v21 }
  0xfe   :  { %v112_v55 = vadd.f32 1e-05, %v106_v47 }
  0xff   :  { %v939_v31 = vpop.eup %938  ;;  %v108_v32 = vadd.f32 1e-05, %v102_v29  ;;  %v110_v33 = vadd.f32 1e-05, %v104_v30 }
 0x100   :  { %v114_v34 = vmul.f32 %v939_v31, %v107_v18  ;;  %v941_v39 = vpop.eup %940  ;;  %vm120_vm2 = vweird.f32 %v939_v31  ;;  %vm169_vm1 = vweird.f32 %v112_v55 }
 0x101   :  { %942 = vrsqrt.f32 %v108_v32  ;;  %v134_v49 = vmul.f32 %v941_v39, %v1166_v24  ;;  %vm121_vm4 = vmor %vm119_vm3, %vm120_vm2  ;;  %vm129_vm6 = vweird.f32 %v108_v32  ;;  %vm149_vm8 = vweird.f32 %v110_v33 }
 0x102   :  { %v115_v35 = vmul.f32 %v939_v31, %v114_v34  ;;  %944 = vrsqrt.f32 %v110_v33  ;;  %vm140_vm11 = vweird.f32 %v941_v39 }
 0x103   :  { %v135_v57 = vmul.f32 %v941_v39, %v134_v49  ;;  %vm141_vm13 = vmor %vm139_vm10, %vm140_vm11 }
 0x104   :  { %v116_v36 = vmul.f32 0.5, %v115_v35  ;;  %v97_v38 = vpop.xlane.xlu1 %96 }
 0x105   :  { %v105_v43 = vmul.f32 %v97_v38, %v1072_v21  ;;  %v136_v63 = vmul.f32 0.5, %v135_v57 }
 0x106   :  { %v117_v44 = vsub.f32 1.5, %v116_v36 }
 0x107   :  { %v943_v46 = vpop.eup %942  ;;  %v111_v53 = vadd.f32 1e-05, %v105_v43 }
 0x108   :  { %v945_v48 = vpop.eup %944  ;;  %v118_v50 = vmul.f32 %v939_v31, %v117_v44  ;;  %v124_v51 = vmul.f32 %v943_v46, %v108_v32  ;;  %vm130_vm5 = vweird.f32 %v943_v46 }
 0x109   :  { %v144_v52 = vmul.f32 %v945_v48, %v110_v33  ;;  %946 = vrsqrt.f32 %v111_v53  ;;  %vm131_vm7 = vmor %vm129_vm6, %vm130_vm5  ;;  %vm150_vm9 = vweird.f32 %v945_v48  ;;  %vm159_vm14 = vweird.f32 %v111_v53 }
 0x10a   :  { %v125_v54 = vmul.f32 %v943_v46, %v124_v51  ;;  %v122_v58 = vsel %vm121_vm4, %v939_v31, %v118_v50  ;;  %948 = vrsqrt.f32 %v112_v55  ;;  %vm151_vm12 = vmor %vm149_vm8, %vm150_vm9 }
 0x10b   :  { %v145_v56 = vmul.f32 %v945_v48, %v144_v52  ;;  %v173_v61 = vmul.f32 %v122_v58, %v1080_v28  ;;  %v137_v28 = vsub.f32 1.5, %v136_v63  ;;  %v909_v52 = vld [vmem:[%s1543_s5 + $0x38] sm:$0xff] }
 0x10c   :  { %v126_v59 = vmul.f32 0.5, %v125_v54  ;;  %699 = vmatpush.bf16.msra.mxu2 %v909_v52  ;;  %v210_v54 = vld [vmem:[%s1544_s4] sm:$0x3] }
 0x10d   :  { %v146_v21 = vmul.f32 0.5, %v145_v56  ;;  %v183_v8 = vmul.f32 %v933_v62, %v173_v61  ;;  %v138_v19 = vmul.f32 %v941_v39, %v137_v28  ;;  %v915_v56 = vld [vmem:[%s1543_s5 + $0x68] sm:$0xff]  ;;  %v1214_v57 = vperm.slane %v210_v54, 0 }
 0x10e   :  { %v127_v60 = vsub.f32 1.5, %v126_v59  ;;  %v1216_v58 = vperm.slane %v210_v54, 1  ;;  %v906_v59 = vld [vmem:[%s1543_s5 + $0x20] sm:$0xff] }
 0x10f   :  { %v147_v2 = vsub.f32 1.5, %v146_v21  ;;  %v947_v6 = vpop.eup %946  ;;  %v193_v17 = vadd.f32 %v934_v12, %v183_v8  ;;  %v142_v25 = vsel %vm141_vm13, %v941_v39, %v138_v19 }
 0x110   :  { %v128_v0 = vmul.f32 %v943_v46, %v127_v60  ;;  %v949_v13 = vpop.eup %948  ;;  %v154_v16 = vmul.f32 %v947_v6, %v111_v53  ;;  %v175_v30 = vmul.f32 %v142_v25, %v1077_v27  ;;  %vm160_vm15 = vweird.f32 %v947_v6  ;;  %v917_v53 = vld [vmem:[%s1543_s5 + $0x78] sm:$0xff]  ;;  %v914_v60 = vld [vmem:[%s1543_s5 + $0x60] sm:$0xff] }
 0x111   :  { %v148_v15 = vmul.f32 %v945_v48, %v147_v2  ;;  %vm170_vm2 = vweird.f32 %v949_v13  ;;  %vm161_vm3 = vmor %vm159_vm14, %vm160_vm15  ;;  %723 = vmatpush.bf16.msra.mxu3 %v917_v53  ;;  %v905_v2 = vld [vmem:[%s1543_s5 + $0x18] sm:$0xff] }
 0x112   :  { %v132_v1 = vsel %vm131_vm7, %v943_v46, %v128_v0  ;;  %v155_v23 = vmul.f32 %v947_v6, %v154_v16  ;;  %v185_v34 = vmul.f32 %v933_v62, %v175_v30  ;;  %vm171_vm4 = vmor %vm169_vm1, %vm170_vm2 }
 0x113   :  { %v174_v7 = vmul.f32 %v132_v1, %v1099_v42  ;;  %v164_v42 = vmul.f32 %v949_v13, %v112_v55  ;;  %v152_v22 = vsel %vm151_vm12, %v945_v48, %v148_v15  ;;  %v907_v55 = vld [vmem:[%s1543_s5 + $0x28] sm:$0xff] }
 0x114   :  { %v176_v24 = vmul.f32 %v152_v22, %v1096_v41  ;;  %v156_v29 = vmul.f32 0.5, %v155_v23  ;;  %v195_v38 = vadd.f32 %v934_v12, %v185_v34  ;;  %v902_v34 = vld [vmem:[%s1543_s5] sm:$0xff] }
 0x115   :  { %v184_v14 = vmul.f32 %v933_v62, %v174_v7  ;;  %v165_v26 = vmul.f32 %v949_v13, %v164_v42 }
 0x116   :  { %v186_v32 = vmul.f32 %v933_v62, %v176_v24  ;;  %v157_v33 = vsub.f32 1.5, %v156_v29  ;;  %v911_v24 = vld [vmem:[%s1543_s5 + $0x48] sm:$0xff] }
 0x117   :  { %v194_v18 = vadd.f32 %v934_v12, %v184_v14  ;;  %v166_v31 = vmul.f32 0.5, %v165_v26  ;;  %v903_v26 = vld [vmem:[%s1543_s5 + $0x8] sm:$0xff] }
 0x118   :  { %v196_v36 = vadd.f32 %v934_v12, %v186_v32  ;;  %v158_v37 = vmul.f32 %v947_v6, %v157_v33 }
 0x119   :  { %v199_v20 = vpack.c.bf16 %v194_v18, %v193_v17  ;;  %v167_v35 = vsub.f32 1.5, %v166_v31  ;;  %v904_v17 = vld [vmem:[%s1543_s5 + $0x10] sm:$0xff] }
 0x11a   :  { %v200_v43 = vpack.c.bf16 %v196_v36, %v195_v38  ;;  %v162_v41 = vsel %vm161_vm3, %v947_v6, %v158_v37  ;;  %v913_v6 = vld [vmem:[%s1543_s5 + $0x58] sm:$0xff]  ;;  %v912_v18 = vld [vmem:[%s1543_s5 + $0x50] sm:$0xff] }
 0x11b   :  { %812 = vmatmul.msk.bf16.vlgmr.msra.gmra.mxu0 %vm39_vm0, %v199_v20  ;;  %815 = vmatmul.msk.bf16.vlgmr.msra.gmra.mxu1 %vm39_vm0, %v199_v20  ;;  %v168_v39 = vmul.f32 %v949_v13, %v167_v35  ;;  %v177_v44 = vmul.f32 %v162_v41, %v1106_v45  ;;  %v916_v45 = vld [vmem:[%s1543_s5 + $0x70] sm:$0xff]  ;;  %v910_v35 = vld [vmem:[%s1543_s5 + $0x40] sm:$0xff] }
 0x11c   :  { %724 = vmatpush.bf16.msra.mxu3 %v916_v45 }
 0x11d   :  { %v172_v27 = vsel %vm171_vm4, %v949_v13, %v168_v39  ;;  %v187_v47 = vmul.f32 %v933_v62, %v177_v44 }
 0x11e   :  { %v178_v46 = vmul.f32 %v172_v27, %v1093_v40  ;;  %v908_v40 = vld [vmem:[%s1543_s5 + $0x30] sm:$0xff] }
 0x11f   :  { %v197_v49 = vadd.f32 %v934_v12, %v187_v47  ;;  %700 = vmatpush.bf16.msra.mxu2 %v908_v40 }
 0x120   :  { %v188_v48 = vmul.f32 %v933_v62, %v178_v46  ;;  %725 = vmatpush.bf16.msra.mxu3 %v915_v56 }
 0x122   :  { %v198_v50 = vadd.f32 %v934_v12, %v188_v48 }
 0x123   :  { %701 = vmatpush.bf16.msra.mxu2 %v907_v55 }
 0x124   :  { %v201_v51 = vpack.c.bf16 %v198_v50, %v197_v49  ;;  %726 = vmatpush.bf16.msra.mxu3 %v914_v60 }
 0x127   :  { %702 = vmatpush.bf16.msra.mxu2 %v906_v59 }
 0x128   :  { %727 = vmatpush.bf16.msra.mxu3 %v913_v6 }
 0x12b   :  { %813 = vmatmul.msk.bf16.gmra.mxu0 %vm39_vm0, %v200_v43  ;;  %816 = vmatmul.msk.bf16.gmra.mxu1 %vm39_vm0, %v200_v43 }
 0x12c   :  { %703 = vmatpush.bf16.msra.mxu2 %v905_v2  ;;  %728 = vmatpush.bf16.msra.mxu3 %v912_v18 }
 0x130   :  { %704 = vmatpush.bf16.msra.mxu2 %v904_v17  ;;  %729 = vmatpush.bf16.msra.mxu3 %v911_v24 }
 0x134   :  { %705 = vmatpush.bf16.msra.mxu2 %v903_v26  ;;  %730 = vmatpush.bf16.msra.mxu3 %v910_v35 }
 0x138   :  { %706 = vmatpush.bf16.msra.mxu2 %v902_v34 }
 0x13b   :  { %814 = vmatmul.msk.bf16.gmra.mxu0 %vm39_vm0, %v201_v51  ;;  %817 = vmatmul.msk.bf16.gmra.mxu1 %vm39_vm0, %v201_v51 }
 0x198   :  { %v274_v21 = vpop.f32.mrf.mxu0  ;;  %v298_v61 = vpop.f32.mrf.mxu1 }
 0x199   :  { %v1225_v62 = vadd.f32 %v274_v21, %v1214_v57  ;;  %v1228_v63 = vadd.f32 %v298_v61, %v1216_v58 }
 0x19b   :  { %v818_v0 = vmul.f32 -1.702, %v1225_v62  ;;  %v819_v1 = vmul.f32 -1.702, %v1228_v63 }
 0x19d   :  { %v337_v7 = vmul.f32 1.442695, %v818_v0  ;;  %v339_v8 = vmul.f32 1.442695, %v819_v1 }
 0x19f   :  { %950 = vpow2.f32 %v337_v7 }
 0x1a0   :  { %952 = vpow2.f32 %v339_v8  ;;  %v276_v12 = vpop.f32.mrf.mxu0  ;;  %v300_v28 = vpop.f32.mrf.mxu1 }
 0x1a1   :  { %v1239_v13 = vadd.f32 %v276_v12, %v1214_v57  ;;  %v1242_v14 = vadd.f32 %v300_v28, %v1216_v58 }
 0x1a3   :  { %v820_v15 = vmul.f32 -1.702, %v1239_v13  ;;  %v821_v16 = vmul.f32 -1.702, %v1242_v14 }
 0x1a5   :  { %v951_v19 = vpop.eup %950  ;;  %v341_v42 = vmul.f32 1.442695, %v820_v15  ;;  %v343_v23 = vmul.f32 1.442695, %v821_v16 }
 0x1a6   :  { %v953_v20 = vpop.eup %952  ;;  %v1252_v22 = vadd.f32 1.0, %v951_v19 }
 0x1a7   :  { %v1254_v25 = vadd.f32 1.0, %v953_v20  ;;  %954 = vpow2.f32 %v341_v42 }
 0x1a8   :  { %956 = vrcp.f32 %v1252_v22  ;;  %v279_v29 = vpop.f32.mrf.mxu0  ;;  %v303_v30 = vpop.f32.mrf.mxu1  ;;  %v384_v40 = vand.u32 2147483648, %v1252_v22  ;;  %vm378_vm0 = vweird.f32 %v1252_v22  ;;  %v382_v59 = vand.u32 2147483647, %v1252_v22 }
 0x1a9   :  { %958 = vrcp.f32 %v1254_v25  ;;  %v1265_v31 = vadd.f32 %v279_v29, %v1214_v57  ;;  %v1268_v32 = vadd.f32 %v303_v30, %v1216_v58  ;;  %vm393_vm5 = vweird.f32 %v1254_v25 }
 0x1aa   :  { %960 = vpow2.f32 %v343_v23  ;;  %v397_v60 = vand.u32 2147483647, %v1254_v25  ;;  %v399_v61 = vand.u32 2147483648, %v1254_v25  ;;  %v385_v6 = vor.u32 1.1754944e-38, %v384_v40 }
 0x1ab   :  { %v822_v33 = vmul.f32 -1.702, %v1265_v31  ;;  %v823_v37 = vmul.f32 -1.702, %v1268_v32  ;;  %vm1314_vm8 = vcmp.eq.f32.partialorder %v382_v59, 8.507059e+37 }
 0x1ac   :  { %vm1318_vm9 = vcmp.eq.f32.partialorder %v397_v60, 8.507059e+37 }
 0x1ad   :  { %v955_v36 = vpop.eup %954  ;;  %v345_v43 = vmul.f32 1.442695, %v822_v33  ;;  %v347_v50 = vmul.f32 1.442695, %v823_v37 }
 0x1ae   :  { %v1278_v38 = vpop.eup %956  ;;  %v1280_v39 = vadd.f32 1.0, %v955_v36 }
 0x1af   :  { %v1282_v41 = vpop.eup %958  ;;  %v374_v27 = vmul.f32 %v1278_v38, %v1252_v22  ;;  %vm379_vm6 = vweird.f32 %v1278_v38 }
 0x1b0   :  { %v961_v44 = vpop.eup %960  ;;  %v389_v46 = vmul.f32 %v1282_v41, %v1254_v25  ;;  %962 = vrcp.f32 %v1280_v39  ;;  %v281_v47 = vpop.f32.mrf.mxu0  ;;  %vm394_vm7 = vweird.f32 %v1282_v41  ;;  %v412_v15 = vand.u32 2147483647, %v1280_v39  ;;  %vm1334_vm12 = vmor %vm378_vm0, %vm379_vm6 }
 0x1b1   :  { %v305_v48 = vpop.f32.mrf.mxu1  ;;  %v1289_v49 = vadd.f32 1.0, %v961_v44  ;;  %964 = vpow2.f32 %v345_v43  ;;  %v1292_v51 = vadd.f32 %v281_v47, %v1214_v57  ;;  %v375_v53 = vsub.f32 1.0, %v374_v27  ;;  %vm1358_vm1 = vmor %vm393_vm5, %vm394_vm7 }
 0x1b2   :  { %v1295_v52 = vadd.f32 %v305_v48, %v1216_v58  ;;  %v390_v45 = vsub.f32 1.0, %v389_v46  ;;  %vm408_vm10 = vweird.f32 %v1280_v39  ;;  %v414_v19 = vand.u32 2147483648, %v1280_v39 }
 0x1b3   :  { %966 = vrcp.f32 %v1289_v49  ;;  %v824_v54 = vmul.f32 -1.702, %v1292_v51  ;;  %v376_v21 = vmul.f32 %v1278_v38, %v375_v53  ;;  %vm1338_vm13 = vcmp.eq.f32.partialorder %v412_v15, 8.507059e+37 }
 0x1b4   :  { %968 = vpow2.f32 %v347_v50  ;;  %v825_v55 = vmul.f32 -1.702, %v1295_v52  ;;  %v391_v7 = vmul.f32 %v1282_v41, %v390_v45  ;;  %v427_v43 = vand.u32 2147483647, %v1289_v49 }
 0x1b5   :  { %v349_v1 = vmul.f32 1.442695, %v824_v54  ;;  %v377_v26 = vadd.f32 %v1278_v38, %v376_v21  ;;  %v429_v46 = vand.u32 2147483648, %v1289_v49  ;;  %v415_v48 = vor.u32 1.1754944e-38, %v414_v19 }
 0x1b6   :  { %v963_v56 = vpop.eup %962  ;;  %v351_v8 = vmul.f32 1.442695, %v825_v55  ;;  %v392_v30 = vadd.f32 %v1282_v41, %v391_v7  ;;  %vm423_vm2 = vweird.f32 %v1289_v49  ;;  %vm428_vm4 = vcmp.eq.f32.partialorder %v427_v43, 8.507059e+37 }
 0x1b7   :  { %v404_v0 = vmul.f32 %v963_v56, %v1280_v39  ;;  %v965_v2 = vpop.eup %964  ;;  %970 = vpow2.f32 %v349_v1  ;;  %vm409_vm11 = vweird.f32 %v963_v56  ;;  %v381_v45 = vsel %vm1334_vm12, %v1278_v38, %v377_v26 }
 0x1b8   :  { %v1312_v16 = vadd.f32 1.0, %v965_v2  ;;  %v284_v20 = vpop.f32.mrf.mxu0  ;;  %vm1348_vm14 = vmor %vm408_vm10, %vm409_vm11  ;;  %v396_v25 = vsel %vm1358_vm1, %v1282_v41, %v392_v30 }
 0x1b9   :  { %v967_v12 = vpop.eup %966  ;;  %v405_v28 = vsub.f32 1.0, %v404_v0  ;;  %v308_v29 = vpop.f32.mrf.mxu1  ;;  %v1344_v27 = vadd.f32 %v284_v20, %v1214_v57  ;;  %v430_v0 = vor.u32 1.1754944e-38, %v429_v46 }
 0x1ba   :  { %v419_v42 = vmul.f32 %v967_v12, %v1289_v49  ;;  %v969_v23 = vpop.eup %968  ;;  %972 = vrcp.f32 %v1312_v16  ;;  %vm424_vm15 = vweird.f32 %v967_v12  ;;  %v1366_v53 = vadd.f32 %v308_v29, %v1216_v58 }
 0x1bb   :  { %v406_v24 = vmul.f32 %v963_v56, %v405_v28  ;;  %v1328_v34 = vadd.f32 1.0, %v969_v23  ;;  %974 = vpow2.f32 %v351_v8  ;;  %v826_v50 = vmul.f32 -1.702, %v1344_v27  ;;  %vm425_vm3 = vmor %vm423_vm2, %vm424_vm15 }
 0x1bc   :  { %v420_v33 = vsub.f32 1.0, %v419_v42  ;;  %v386_v49 = vsel %vm1314_vm8, %v385_v6, %v381_v45  ;;  %v827_v2 = vmul.f32 -1.702, %v1366_v53  ;;  %v442_v19 = vand.u32 2147483647, %v1312_v16 }
 0x1bd   :  { %v407_v36 = vadd.f32 %v963_v56, %v406_v24  ;;  %976 = vrcp.f32 %v1328_v34  ;;  %v971_v40 = vpop.eup %970  ;;  %v353_v1 = vmul.f32 1.442695, %v826_v50  ;;  %v444_v17 = vand.u32 2147483648, %v1312_v16 }
 0x1be   :  { %v421_v22 = vmul.f32 %v967_v12, %v420_v33  ;;  %v1380_v60 = vadd.f32 1.0, %v971_v40  ;;  %v553_v20 = vmul.f32 %v386_v49, %v1225_v62  ;;  %vm438_vm0 = vweird.f32 %v1312_v16 }
 0x1bf   :  { %v411_v39 = vsel %vm1348_vm14, %v963_v56, %v407_v36  ;;  %v400_v56 = vor.u32 1.1754944e-38, %v399_v61  ;;  %v355_v24 = vmul.f32 1.442695, %v827_v2  ;;  %vm1411_vm5 = vcmp.eq.f32.partialorder %v442_v19, 8.507059e+37 }
 0x1c0   :  { %v422_v54 = vadd.f32 %v967_v12, %v421_v22  ;;  %v1375_v55 = vpop.eup %972  ;;  %v416_v59 = vsel %vm1338_vm13, %v415_v48, %v411_v39  ;;  %978 = vrcp.f32 %v1380_v60  ;;  %v286_v18 = vpop.f32.mrf.mxu0  ;;  %v445_v37 = vor.u32 1.1754944e-38, %v444_v17 }
 0x1c1   :  { %v975_v21 = vpop.eup %974  ;;  %v434_v41 = vmul.f32 %v1375_v55, %v1312_v16  ;;  %v401_v61 = vsel %vm1318_vm9, %v400_v56, %v396_v25  ;;  %v555_v8 = vmul.f32 %v416_v59, %v1239_v13  ;;  %980 = vpow2.f32 %v353_v1  ;;  %v310_v42 = vpop.f32.mrf.mxu1 }
 0x1c2   :  { %v426_v38 = vsel %vm425_vm3, %v967_v12, %v422_v54  ;;  %v1393_v15 = vadd.f32 1.0, %v975_v21  ;;  %v554_v13 = vmul.f32 %v401_v61, %v1228_v63  ;;  %v1406_v30 = vadd.f32 %v286_v18, %v1214_v57 }
 0x1c3   :  { %v1390_v7 = vpop.eup %976  ;;  %v431_v12 = vsel %vm428_vm4, %v430_v0, %v426_v38  ;;  %v435_v28 = vsub.f32 1.0, %v434_v41  ;;  %v1409_v33 = vadd.f32 %v310_v42, %v1216_v58  ;;  %v565_v35 = vpack.c.bf16 %v555_v8, %v553_v20 }
 0x1c4   :  { %v449_v6 = vmul.f32 %v1390_v7, %v1328_v34  ;;  %982 = vrcp.f32 %v1393_v15  ;;  %v556_v26 = vmul.f32 %v431_v12, %v1242_v14  ;;  %v459_v63 = vand.u32 2147483648, %v1328_v34 }
 0x1c5   :  { %v436_v23 = vmul.f32 %v1375_v55, %v435_v28  ;;  %984 = vpow2.f32 %v355_v24  ;;  %vm439_vm6 = vweird.f32 %v1375_v55  ;;  %vm453_vm7 = vweird.f32 %v1328_v34  ;;  %707 = vmatmul.bf16.vlgmr.msra.gmra.mxu2 %v565_v35 }
 0x1c6   :  { %v450_v29 = vsub.f32 1.0, %v449_v6  ;;  %v979_v62 = vpop.eup %978  ;;  %v828_v58 = vmul.f32 -1.702, %v1406_v30  ;;  %vm468_vm8 = vweird.f32 %v1380_v60  ;;  %v474_v44 = vand.u32 2147483648, %v1380_v60  ;;  %vm1431_vm9 = vmor %vm438_vm0, %vm439_vm6 }
 0x1c7   :  { %v437_v14 = vadd.f32 %v1375_v55, %v436_v23  ;;  %v464_v57 = vmul.f32 %v979_v62, %v1380_v60  ;;  %v981_v43 = vpop.eup %980  ;;  %v829_v22 = vmul.f32 -1.702, %v1409_v33  ;;  %v566_v46 = vpack.c.bf16 %v556_v26, %v554_v13 }
 0x1c8   :  { %v451_v39 = vmul.f32 %v1390_v7, %v450_v29  ;;  %v1425_v50 = vadd.f32 1.0, %v981_v43  ;;  %v357_v40 = vmul.f32 1.442695, %v828_v58  ;;  %vm454_vm10 = vweird.f32 %v1390_v7 }
 0x1c9   :  { %v465_v48 = vsub.f32 1.0, %v464_v57  ;;  %v472_v25 = vand.u32 2147483647, %v1380_v60  ;;  %v359_v56 = vmul.f32 1.442695, %v829_v22  ;;  %731 = vmatmul.bf16.vlgmr.msra.gmra.mxu3 %v566_v46  ;;  %v441_v59 = vsel %vm1431_vm9, %v1375_v55, %v437_v14  ;;  %vm1457_vm15 = vmor %vm453_vm7, %vm454_vm10 }
 0x1ca   :  { %v983_v47 = vpop.eup %982  ;;  %vm469_vm11 = vweird.f32 %v979_v62  ;;  %986 = vrcp.f32 %v1425_v50  ;;  %v475_v38 = vor.u32 1.1754944e-38, %v474_v44  ;;  %v487_v41 = vand.u32 2147483647, %v1393_v15 }
 0x1cb   :  { %v479_v54 = vmul.f32 %v983_v47, %v1393_v15  ;;  %v466_v21 = vmul.f32 %v979_v62, %v465_v48  ;;  %v985_v16 = vpop.eup %984  ;;  %v489_v1 = vand.u32 2147483648, %v1393_v15  ;;  %v452_v49 = vadd.f32 %v1390_v7, %v451_v39  ;;  %vm470_vm12 = vmor %vm468_vm8, %vm469_vm11 }
 0x1cc   :  { %v1445_v2 = vadd.f32 1.0, %v985_v16  ;;  %988 = vpow2.f32 %v357_v40  ;;  %v446_v55 = vsel %vm1411_vm5, %v445_v37, %v441_v59  ;;  %vm484_vm13 = vweird.f32 %v983_v47 }
 0x1cd   :  { %v480_v0 = vsub.f32 1.0, %v479_v54  ;;  %v467_v61 = vadd.f32 %v979_v62, %v466_v21  ;;  %990 = vpow2.f32 %v359_v56  ;;  %v457_v12 = vand.u32 2147483647, %v1328_v34 }
 0x1ce   :  { %vm473_vm14 = vcmp.eq.f32.partialorder %v472_v25, 8.507059e+37  ;;  %992 = vrcp.f32 %v1445_v2  ;;  %vm483_vm1 = vweird.f32 %v1393_v15  ;;  %v557_v18 = vmul.f32 %v446_v55, %v1265_v31 }
 0x1cf   :  { %v481_v8 = vmul.f32 %v983_v47, %v480_v0  ;;  %v471_v28 = vsel %vm470_vm12, %v979_v62, %v467_v61  ;;  %v456_v42 = vsel %vm1457_vm15, %v1390_v7, %v452_v49  ;;  %vm485_vm2 = vmor %vm483_vm1, %vm484_vm13  ;;  %v490_v34 = vor.u32 1.1754944e-38, %v489_v1 }
 0x1d0   :  { %v476_v17 = vsel %vm473_vm14, %v475_v38, %v471_v28  ;;  %v1462_v6 = vpop.eup %986  ;;  %v460_v23 = vor.u32 1.1754944e-38, %v459_v63  ;;  %vm488_vm3 = vcmp.eq.f32.partialorder %v487_v41, 8.507059e+37  ;;  %vm458_vm4 = vcmp.eq.f32.partialorder %v457_v12, 8.507059e+37 }
 0x1d1   :  { %v482_v60 = vadd.f32 %v983_v47, %v481_v8  ;;  %v559_v20 = vmul.f32 %v476_v17, %v1292_v51  ;;  %v494_v26 = vmul.f32 %v1462_v6, %v1425_v50  ;;  %v502_v44 = vand.u32 2147483647, %v1425_v50 }
 0x1d2   :  { %v989_v24 = vpop.eup %988  ;;  %v461_v31 = vsel %vm458_vm4, %v460_v23, %v456_v42  ;;  %v504_v46 = vand.u32 2147483648, %v1425_v50  ;;  %vm498_vm0 = vweird.f32 %v1425_v50  ;;  %vm499_vm5 = vweird.f32 %v1462_v6 }
 0x1d3   :  { %v486_v13 = vsel %vm485_vm2, %v983_v47, %v482_v60  ;;  %v567_v29 = vpack.c.bf16 %v559_v20, %v557_v18  ;;  %v991_v35 = vpop.eup %990  ;;  %v371_v62 = vadd.f32 1.0, %v989_v24  ;;  %v495_v37 = vsub.f32 1.0, %v494_v26  ;;  %vm1486_vm8 = vmor %vm498_vm0, %vm499_vm5 }
 0x1d4   :  { %v491_v15 = vsel %vm488_vm3, %v490_v34, %v486_v13  ;;  %v993_v36 = vpop.eup %992  ;;  %v372_v51 = vadd.f32 1.0, %v991_v35  ;;  %v558_v63 = vmul.f32 %v461_v31, %v1268_v32  ;;  %vm1480_vm6 = vcmp.eq.f32.partialorder %v502_v44, 8.507059e+37 }
 0x1d5   :  { %v560_v7 = vmul.f32 %v491_v15, %v1295_v52  ;;  %v509_v14 = vmul.f32 %v993_v36, %v1445_v2  ;;  %994 = vrcp.f32 %v371_v62  ;;  %712 = vmatmul.bf16.gmra.mxu2 %v567_v29  ;;  %v496_v58 = vmul.f32 %v1462_v6, %v495_v37 }
 0x1d6   :  { %996 = vrcp.f32 %v372_v51  ;;  %vm514_vm7 = vweird.f32 %v993_v36  ;;  %v505_v25 = vor.u32 1.1754944e-38, %v504_v46  ;;  %v517_v54 = vand.u32 2147483647, %v1445_v2 }
 0x1d7   :  { %v510_v57 = vsub.f32 1.0, %v509_v14  ;;  %v568_v43 = vpack.c.bf16 %v560_v7, %v558_v63  ;;  %v497_v39 = vadd.f32 %v1462_v6, %v496_v58  ;;  %v519_v56 = vand.u32 2147483648, %v1445_v2 }
 0x1d8   :  { %vm513_vm9 = vweird.f32 %v1445_v2  ;;  %v532_v50 = vand.u32 2147483647, %v371_v62  ;;  %v534_v16 = vand.u32 2147483648, %v371_v62  ;;  %v549_v49 = vand.u32 2147483648, %v372_v51 }
 0x1d9   :  { %v511_v22 = vmul.f32 %v993_v36, %v510_v57  ;;  %736 = vmatmul.bf16.gmra.mxu3 %v568_v43  ;;  %v501_v0 = vsel %vm1486_vm8, %v1462_v6, %v497_v39  ;;  %vm1494_vm10 = vmor %vm513_vm9, %vm514_vm7  ;;  %v547_v2 = vand.u32 2147483647, %v372_v51  ;;  %vm518_vm13 = vcmp.eq.f32.partialorder %v517_v54, 8.507059e+37 }
 0x1da   :  { %v520_v8 = vor.u32 1.1754944e-38, %v519_v56  ;;  %vm528_vm14 = vweird.f32 %v371_v62  ;;  %v506_v28 = vsel %vm1480_vm6, %v505_v25, %v501_v0  ;;  %v535_v19 = vor.u32 1.1754944e-38, %v534_v16 }
 0x1db   :  { %v995_v52 = vpop.eup %994  ;;  %v512_v40 = vadd.f32 %v993_v36, %v511_v22  ;;  %vm543_vm1 = vweird.f32 %v372_v51  ;;  %vm533_vm2 = vcmp.eq.f32.partialorder %v532_v50, 8.507059e+37  ;;  %v550_v18 = vor.u32 1.1754944e-38, %v549_v49 }
 0x1dc   :  { %v997_v47 = vpop.eup %996  ;;  %v524_v32 = vmul.f32 %v995_v52, %v371_v62  ;;  %vm529_vm11 = vweird.f32 %v995_v52  ;;  %vm548_vm4 = vcmp.eq.f32.partialorder %v547_v2, 8.507059e+37  ;;  %v561_v34 = vmul.f32 %v506_v28, %v1344_v27 }
 0x1dd   :  { %v539_v45 = vmul.f32 %v997_v47, %v372_v51  ;;  %v516_v61 = vsel %vm1494_vm10, %v993_v36, %v512_v40  ;;  %vm544_vm12 = vweird.f32 %v997_v47  ;;  %vm530_vm15 = vmor %vm528_vm14, %vm529_vm11  ;;  %v935_v36 = vld [vmem:[%s1545_s6] ss:$0 sm:$0xff]  ;;  %vm769_vm0 = vcmask 519168  }
 0x1de   :  { %v525_v59 = vsub.f32 1.0, %v524_v32  ;;  %v521_v60 = vsel %vm518_vm13, %v520_v8, %v516_v61  ;;  %vm545_vm3 = vmor %vm543_vm1, %vm544_vm12 }
 0x1df   :  { %v540_v38 = vsub.f32 1.0, %v539_v45  ;;  %v562_v26 = vmul.f32 %v521_v60, %v1366_v53 }
 0x1e0   :  { %v526_v1 = vmul.f32 %v995_v52, %v525_v59 }
 0x1e1   :  { %v541_v55 = vmul.f32 %v997_v47, %v540_v38 }
 0x1e2   :  { %v527_v12 = vadd.f32 %v995_v52, %v526_v1 }
 0x1e3   :  { %v542_v17 = vadd.f32 %v997_v47, %v541_v55 }
 0x1e4   :  { %v531_v6 = vsel %vm530_vm15, %v995_v52, %v527_v12 }
 0x1e5   :  { %v536_v42 = vsel %vm533_vm2, %v535_v19, %v531_v6  ;;  %v546_v20 = vsel %vm545_vm3, %v997_v47, %v542_v17 }
 0x1e6   :  { %v563_v23 = vmul.f32 %v536_v42, %v1406_v30  ;;  %v551_v13 = vsel %vm548_vm4, %v550_v18, %v546_v20 }
 0x1e7   :  { %v564_v24 = vmul.f32 %v551_v13, %v1409_v33 }
 0x1e8   :  { %v569_v15 = vpack.c.bf16 %v563_v23, %v561_v34 }
 0x1e9   :  { %v570_v29 = vpack.c.bf16 %v564_v24, %v562_v26 }
 0x1ea   :  { %717 = vmatmul.bf16.gmra.mxu2 %v569_v15 }
 0x1eb   :  { %741 = vmatmul.bf16.gmra.mxu3 %v570_v29 }
 0x248   :  { %v708_v35 = vpop.f32.mrf.mxu2 }
 0x24c   :  { %v732_v31 = vpop.f32.mrf.mxu3 }
 0x24d   :  { %v733_v62 = vadd.f32 %v732_v31, %v708_v35 }
 0x24f   :  { %v747_v27 = vadd.f32 %v1052_v5, %v733_v62 }
 0x250   :  { %v710_v30 = vpop.f32.mrf.mxu2 }
 0x251   :  { %v757_v7 = vadd.f32 %v935_v36, %v747_v27 }
 0x253   :  { %v763_v37 = vpack.c.bf16 %v757_v7, %v757_v7 }
 0x254   :  { %v734_v53 = vpop.f32.mrf.mxu3 }
 0x255   :  { %770 = vst.msk [vmem:[%s1546_s7] sm:$0xf] %vm769_vm0, %v763_v37  ;;  %v735_v33 = vadd.f32 %v734_v53, %v710_v30 }
 0x257   :  { %v748_v51 = vadd.f32 %v1064_v11, %v735_v33 }
 0x258   :  { %v713_v63 = vpop.f32.mrf.mxu2 }
 0x259   :  { %v758_v14 = vadd.f32 %v935_v36, %v748_v51 }
 0x25b   :  { %v764_v57 = vpack.c.bf16 %v758_v14, %v758_v14 }
 0x25c   :  { %v737_v5 = vpop.f32.mrf.mxu3 }
 0x25d   :  { %771 = vst.msk [vmem:[%s1546_s7 + $0x4] sm:$0xf] %vm769_vm0, %v764_v57  ;;  %v738_v58 = vadd.f32 %v737_v5, %v713_v63 }
 0x25f   :  { %v749_v43 = vadd.f32 %v1050_v4, %v738_v58 }
 0x260   :  { %v715_v22 = vpop.f32.mrf.mxu2 }
 0x261   :  { %v759_v44 = vadd.f32 %v935_v36, %v749_v43 }
 0x263   :  { %v765_v46 = vpack.c.bf16 %v759_v44, %v759_v44 }
 0x264   :  { %v739_v52 = vpop.f32.mrf.mxu3 }
 0x265   :  { %772 = vst.msk [vmem:[%s1546_s7 + $0x8] sm:$0xf] %vm769_vm0, %v765_v46  ;;  %v740_v11 = vadd.f32 %v739_v52, %v715_v22 }
 0x267   :  { %v750_v47 = vadd.f32 %v1062_v10, %v740_v11 }
 0x269   :  { %v760_v39 = vadd.f32 %v935_v36, %v750_v47 }
 0x26b   :  { %v766_v32 = vpack.c.bf16 %v760_v39, %v760_v39 }
 0x26d   :  { %v718_v48 = vpop.f32.mrf.mxu2  ;;  %773 = vst.msk [vmem:[%s1546_s7 + $0xc] sm:$0xf] %vm769_vm0, %v766_v32 }
 0x26e   :  { %v742_v4 = vpop.f32.mrf.mxu3 }
 0x26f   :  { %v743_v40 = vadd.f32 %v742_v4, %v718_v48 }
 0x271   :  { %v751_v45 = vadd.f32 %v1048_v3, %v743_v40 }
 0x273   :  { %v761_v25 = vadd.f32 %v935_v36, %v751_v45 }
 0x275   :  { %v767_v54 = vpack.c.bf16 %v761_v25, %v761_v25  ;;  %v720_v56 = vpop.f32.mrf.mxu2 }
 0x276   :  { %v744_v59 = vpop.f32.mrf.mxu3 }
 0x277   :  { %774 = vst.msk [vmem:[%s1546_s7 + $0x10] sm:$0xf] %vm769_vm0, %v767_v54  ;;  %v745_v10 = vadd.f32 %v744_v59, %v720_v56 }
 0x279   :  { %v752_v21 = vadd.f32 %v1060_v9, %v745_v10 }
 0x27b   :  { %v762_v50 = vadd.f32 %v935_v36, %v752_v21 }
 0x27d   :  { %v768_v16 = vpack.c.bf16 %v762_v50, %v762_v50 }
 0x27f   :  { %775 = vst.msk [vmem:[%s1546_s7 + $0x14] sm:$0xf] %vm769_vm0, %v768_v16 }

// kernel: _clip_forward.12
= control target key start
LH: loop header
LB: loop body
LE: loop exit
PB: predicated region body
PF: predicated region fallthrough
CT: control target
= control target key end

     0   :  { %vm49_vm0 = vcmask 523264   ;;  %vm67_vm1 = vcmask 258048   ;;  %vm122_vm5 = vcmask 35840   ;;  %s205_s1 = inlined_call_operand.vmem [shape: bf16[64,32], index: 1, kind: input, shape index: {}]   ;;  %s206_s0 = inlined_call_operand.vmem [shape: bf16[5,64], index: 0, kind: input, shape index: {}]   ;;  %s207_s2 = inlined_call_operand.<no memory space> [shape: f32[1], index: 2, kind: input, shape index: {}]   ;;  %s208_s3 = inlined_call_operand.vmem [shape: bf16[32,5], index: 3, kind: output, shape index: {}]  }
   0x1   :  { %v151_v0 = vld [vmem:[%s205_s1 + $0x18] sm:$0xff]  ;;  %v150_v1 = vld [vmem:[%s205_s1 + $0x10] sm:$0xff]  ;;  %v149_v2 = vld [vmem:[%s205_s1 + $0x8] sm:$0xff]  ;;  %v84_v18 = vstv %s207_s2 }
   0x2   :  { %57 = vmatpush.bf16.msra.mxu0 %v151_v0  ;;  %v148_v3 = vld [vmem:[%s205_s1] sm:$0xff] }
   0x3   :  { %v16_v4 = vld [vmem:[%s206_s0] sm:$0x7] }
   0x6   :  { %58 = vmatpush.bf16.msra.mxu0 %v150_v1 }
   0xa   :  { %59 = vmatpush.bf16.msra.mxu0 %v149_v2 }
   0xe   :  { %60 = vmatpush.bf16.msra.mxu0 %v148_v3 }
  0x11   :  { %147 = vmatmul.msk.bf16.vlgmr.msra.gmra.mxu0 %vm49_vm0, %v16_v4 }
  0x8e   :  { %v62_v5 = vpop.f32.mrf.mxu0 }
  0x8f   :  { %v66_v6 = vmul.f32 %v62_v5, %v62_v5 }
  0x91   :  { %v68_v7 = vsel %vm67_vm1, %v66_v6, 0.0 }
  0x92   :  { %69 = vadd.xlane.f32.xlu0 %v68_v7 }
  0x96   :  { %v64_v8 = vpop.f32.mrf.mxu0 }
 0x105   :  { %v70_v9 = vpop.xlane.xlu0 %69 }
 0x106   :  { %v71_v10 = vadd.f32 1e-12, %v70_v9 }
 0x108   :  { %153 = vrsqrt.f32 %v71_v10  ;;  %vm78_vm3 = vweird.f32 %v71_v10 }
 0x10e   :  { %v154_v11 = vpop.eup %153 }
 0x10f   :  { %v73_v12 = vmul.f32 %v154_v11, %v71_v10  ;;  %vm79_vm2 = vweird.f32 %v154_v11 }
 0x110   :  { %vm80_vm4 = vmor %vm78_vm3, %vm79_vm2 }
 0x111   :  { %v74_v13 = vmul.f32 %v154_v11, %v73_v12 }
 0x113   :  { %v75_v14 = vmul.f32 0.5, %v74_v13 }
 0x115   :  { %v76_v15 = vsub.f32 1.5, %v75_v14 }
 0x117   :  { %v77_v16 = vmul.f32 %v154_v11, %v76_v15 }
 0x119   :  { %v81_v17 = vsel %vm80_vm4, %v154_v11, %v77_v16 }
 0x11a   :  { %v82_v19 = vmul.f32 %v81_v17, %v62_v5 }
 0x11c   :  { %v85_v20 = vmul.f32 %v84_v18, %v82_v19 }
 0x11e   :  { %86 = vxpose.xlu0.b32.start.end [1/1] (short) (narrow) %v85_v20, 32 }
 0x1c2   :  { %v102_v21 = vpop.trf.xlu0 }
 0x1c3   :  { %v118_v22 = vpack.c.bf16 %v102_v21, %v102_v21 }
 0x1c5   :  { %123 = vst.msk [vmem:[%s208_s3] sm:$0xf] %vm122_vm5, %v118_v22 }
 0x1ca   :  { %v103_v23 = vpop.trf.xlu0 }
 0x1cb   :  { %v119_v24 = vpack.c.bf16 %v103_v23, %v103_v23 }
 0x1cd   :  { %124 = vst.msk [vmem:[%s208_s3 + $0x4] sm:$0xf] %vm122_vm5, %v119_v24 }
 0x1d2   :  { %v104_v25 = vpop.trf.xlu0 }
 0x1d3   :  { %v120_v26 = vpack.c.bf16 %v104_v25, %v104_v25 }
 0x1d5   :  { %125 = vst.msk [vmem:[%s208_s3 + $0x8] sm:$0xf] %vm122_vm5, %v120_v26 }
 0x1da   :  { %v105_v27 = vpop.trf.xlu0 }
 0x1db   :  { %v121_v28 = vpack.c.bf16 %v105_v27, %v105_v27 }
 0x1dd   :  { %126 = vst.msk [vmem:[%s208_s3 + $0xc] sm:$0xf] %vm122_vm5, %v121_v28 }

// kernel: _clip_forward.7
= control target key start
LH: loop header
LB: loop body
LE: loop exit
PB: predicated region body
PF: predicated region fallthrough
CT: control target
= control target key end

     0   :  { %s1643_s24 = smov 0   ;;  %s1989_s0 = inlined_call_operand.vmem [shape: bf16[6,8,64], index: 0, kind: input, shape index: {}]   ;;  %s1990_s1 = inlined_call_operand.vmem [shape: f32[1,64], index: 1, kind: input, shape index: {}]   ;;  %s1991_s2 = inlined_call_operand.vmem [shape: f32[1,64], index: 2, kind: input, shape index: {}]   ;;  %s1992_s3 = inlined_call_operand.vmem [shape: bf16[64,192], index: 3, kind: input, shape index: {}]   ;;  %s1993_s4 = inlined_call_operand.vmem [shape: f32[1,192], index: 4, kind: input, shape index: {}]   ;;  %s1994_s5 = inlined_call_operand.vmem [shape: bf16[64,64], index: 5, kind: input, shape index: {}]   ;;  %s1995_s6 = inlined_call_operand.vmem [shape: f32[1,64], index: 6, kind: input, shape index: {}]   ;;  %s1996_s7 = inlined_call_operand.vmem [shape: bf16[6,8,64], index: 7, kind: output, shape index: {}]  }
   0x1 LB: > { %s1400_s25 = sadd.s32 4294967295, %s1593_s24   ;;  %p1404_p0 = scmp.ge.s32.totalorder %s1593_s24, 1  ;;  %s1593_s24 = sphi %s1643_s24, %s17_s24  }
   0x2   : > { %p238_p1 = scmp.lt.s32.totalorder %s1593_s24, 3 }
   0x4   : > { %p239_p2 = pnand %p1404_p0, %p238_p1 }
   0x5   : > { %s270_s26 = smul.u32 (!%p239_p2), 3, %s1400_s25  ;;  %s1596_s8 = smov (!%p239_p2), 64  }
   0x6   : > { %242 = sbr.rel (%p239_p2) target bundleno = 2318 (0x90e), region = 48  ;;  %s1597_s9 = smov (!%p239_p2), 48  }
   0x7   : > { %p271_p3 = scmp.lt.s32.totalorder (!%p239_p2), %s270_s26, 5  ;;  %s1598_s10 = smov (!%p239_p2), 112  }
   0x8   : > { %s1599_s11 = smov (!%p239_p2), 32   ;;  %s1600_s12 = smov (!%p239_p2), 96  }
   0x9   : > { %s1601_s13 = smov (!%p239_p2), 16   ;;  %s1602_s14 = smov (!%p239_p2), 80  }
   0xb   : > { %s2000_s26 = smov (!%p271_p3, %s270_s26), 5  ;;  %vm289_vm0 = vcmask 523264   ;;  %v1595_v8 = vmov 64.0   ;;  %v1433_v30 = vld [vmem:[%s1992_s3 + $0x30] sm:$0xf]  ;;  %vm488_vm11 = vcmask 130048  }
   0xc   : > { %s1405_s27 = sshll.u32 %s2000_s26, 2  ;;  %1531 = vrcp.f32 %v1595_v8  ;;  %v1498_v31 = vld [vmem:[%s1992_s3 + $0x34] sm:$0xf0]  ;;  %v1497_v32 = vld [vmem:[%s1992_s3 + $0x34] sm:$0xf]  ;;  %vm605_vm12 = vcmask 1043456  }
   0xd   : > { %s1659_s30 = scalar_lea.vmem %s1989_s0, %s1405_s27  ;;  %v1434_v33 = vor.u32 %v1498_v31, %v1433_v30  ;;  %v1435_v34 = vld [vmem:[%s1992_s3 + $0x38] sm:$0xf0]  ;;  %v1425_v36 = vld [vmem:[%s1992_s3 + $0x20] sm:$0xf]  ;;  %v1496_v37 = vld [vmem:[%s1992_s3 + $0x24] sm:$0xf0] }
   0xe   : > { %v1505_v0 = vld [vmem:[%s1659_s30] sm:$0xff]   ;;  %v285_v1 = vld [vmem:[%s1659_s30 + $0x8] sm:$0xf]  ;;  %v1438_v35 = vor.u32 %v1497_v32, %v1435_v34  ;;  %v1426_v39 = vor.u32 %v1496_v37, %v1425_v36  ;;  %v1427_v40 = vld [vmem:[%s1992_s3 + $0x28] sm:$0xf0]  ;;  %vm564_vm14 = vcmask 64512  }
   0xf   : > { %v1506_v2 = vunpack.c.l.bf16 %v1505_v0  ;;  %v288_v3 = vunpack.c.l.bf16 %v285_v1  ;;  %v1507_v6 = vunpack.c.h.bf16 %v1505_v0  ;;  %443 = vmatpush.bf16.msra.mxu0 %v1434_v33  ;;  %v1495_v38 = vld [vmem:[%s1992_s3 + $0x24] sm:$0xf]  ;;  %v1417_v42 = vld [vmem:[%s1992_s3 + $0x10] sm:$0xf]  ;;  %v1494_v43 = vld [vmem:[%s1992_s3 + $0x14] sm:$0xf0] }
  0x10   : > { %461 = vmatpush.bf16.msra.mxu1 %v1438_v35  ;;  %v1430_v41 = vor.u32 %v1495_v38, %v1427_v40  ;;  %v1493_v44 = vld [vmem:[%s1992_s3 + $0x14] sm:$0xf]  ;;  %v1418_v45 = vor.u32 %v1494_v43, %v1417_v42  ;;  %v1419_v46 = vld [vmem:[%s1992_s3 + $0x18] sm:$0xf0]  ;;  %v1409_v50 = vld [vmem:[%s1992_s3] sm:$0xf] }
  0x11   : > { %v290_v4 = vsel %vm289_vm0, %v1506_v2, 0.0  ;;  %v296_v5 = vsel %vm289_vm0, %v288_v3, 0.0  ;;  %v293_v7 = vsel %vm289_vm0, %v1507_v6, 0.0  ;;  %v1422_v47 = vor.u32 %v1493_v44, %v1419_v46  ;;  %v1492_v51 = vld [vmem:[%s1992_s3 + $0x4] sm:$0xf0] }
  0x12   : > { %291 = vadd.xlane.f32.xlu0 %v290_v4  ;;  %297 = vadd.xlane.f32.xlu1 %v296_v5  ;;  %v1532_v9 = vpop.eup %1531  ;;  %v1491_v52 = vld [vmem:[%s1992_s3 + $0x4] sm:$0xf]  ;;  %v1410_v53 = vor.u32 %v1492_v51, %v1409_v50  ;;  %v1411_v54 = vld [vmem:[%s1992_s3 + $0x8] sm:$0xf0]  ;;  %v387_v34 = vld [vmem:[%s1993_s4] sm:$0x3] }
  0x13   : > { %v300_v10 = vmul.f32 64.0, %v1532_v9  ;;  %vm304_vm1 = vweird.f32 %v1532_v9  ;;  %444 = vmatpush.bf16.msra.mxu0 %v1426_v39  ;;  %v1414_v56 = vor.u32 %v1491_v52, %v1411_v54  ;;  %v389_v35 = vperm.slane %v387_v34, 0 }
  0x14   : > { %462 = vmatpush.bf16.msra.mxu1 %v1430_v41  ;;  %v390_v36 = vperm.slane %v387_v34, 1  ;;  %vm665_vm15 = vcmask 125952  }
  0x15   : > { %v301_v11 = vsub.f32 1.0, %v300_v10 }
  0x17   : > { %v302_v12 = vmul.f32 %v1532_v9, %v301_v11  ;;  %445 = vmatpush.bf16.msra.mxu0 %v1418_v45 }
  0x18   : > { %463 = vmatpush.bf16.msra.mxu1 %v1422_v47 }
  0x19   : > { %v303_v13 = vadd.f32 %v1532_v9, %v302_v12 }
  0x1a   : > { %294 = vadd.xlane.f32.xlu0 %v293_v7 }
  0x1b   : > { %v1666_v14 = vsel %vm304_vm1, %v1532_v9, %v303_v13  ;;  %446 = vmatpush.bf16.msra.mxu0 %v1410_v53  ;;  %v1528_v13 = vld [vmem:[%s1990_s1] ss:$0 sm:$0xff]  ;;  %vm861_vm1 = vcmask 257152  }
  0x1c   : > { %464 = vmatpush.bf16.msra.mxu1 %v1414_v56 }
  0x85   : > { %v292_v15 = vpop.xlane.xlu0 %291  ;;  %v298_v19 = vpop.xlane.xlu1 %297 }
  0x86   : > { %v306_v16 = vmul.f32 %v1666_v14, %v292_v15  ;;  %v308_v23 = vmul.f32 %v1666_v14, %v298_v19 }
  0x88   : > { %v1669_v17 = vsub.f32 %v1506_v2, %v306_v16  ;;  %v1678_v25 = vsub.f32 %v288_v3, %v308_v23 }
  0x8a   : > { %v312_v18 = vmul.f32 %v1669_v17, %v1669_v17  ;;  %v314_v28 = vmul.f32 %v1678_v25, %v1678_v25 }
  0x8c   : > { %v315_v20 = vsel %vm289_vm0, %v312_v18, 0.0  ;;  %v321_v29 = vsel %vm289_vm0, %v314_v28, 0.0 }
  0x8d   : > { %316 = vadd.xlane.f32.xlu1 %v315_v20  ;;  %v295_v21 = vpop.xlane.xlu0 %294 }
  0x8e   : > { %v307_v22 = vmul.f32 %v1666_v14, %v295_v21  ;;  %v1529_v21 = vld [vmem:[%s1991_s2] ss:$0 sm:$0xff] }
  0x90   : > { %v1676_v24 = vsub.f32 %v1507_v6, %v307_v22 }
  0x92   : > { %v313_v26 = vmul.f32 %v1676_v24, %v1676_v24 }
  0x94   : > { %v318_v27 = vsel %vm289_vm0, %v313_v26, 0.0 }
  0x95   : > { %319 = vadd.xlane.f32.xlu2 %v318_v27 }
  0x9d   : > { %322 = vadd.xlane.f32.xlu2 %v321_v29 }
 0x100   : > { %v317_v48 = vpop.xlane.xlu1 %316 }
 0x101   : > { %v324_v49 = vmul.f32 %v317_v48, %v1666_v14 }
 0x103   : > { %v327_v55 = vadd.f32 1e-05, %v324_v49 }
 0x105   : > { %1533 = vrsqrt.f32 %v327_v55  ;;  %vm336_vm3 = vweird.f32 %v327_v55 }
 0x108   : > { %v320_v57 = vpop.xlane.xlu2 %319 }
 0x109   : > { %v325_v58 = vmul.f32 %v320_v57, %v1666_v14 }
 0x10b   : > { %v1534_v59 = vpop.eup %1533  ;;  %v328_v60 = vadd.f32 1e-05, %v325_v58 }
 0x10c   : > { %v331_v61 = vmul.f32 %v1534_v59, %v327_v55  ;;  %vm337_vm2 = vweird.f32 %v1534_v59 }
 0x10d   : > { %1535 = vrsqrt.f32 %v328_v60  ;;  %vm338_vm4 = vmor %vm336_vm3, %vm337_vm2  ;;  %vm346_vm6 = vweird.f32 %v328_v60  ;;  %vm1057_vm2 = vcmask 388352   ;;  %vm1253_vm3 = vcmask 519552  }
 0x10e   : > { %v332_v62 = vmul.f32 %v1534_v59, %v331_v61 }
 0x110   : > { %v333_v63 = vmul.f32 0.5, %v332_v62  ;;  %v323_v0 = vpop.xlane.xlu2 %322 }
 0x111   : > { %v326_v1 = vmul.f32 %v323_v0, %v1666_v14 }
 0x112   : > { %v334_v2 = vsub.f32 1.5, %v333_v63 }
 0x113   : > { %v1536_v3 = vpop.eup %1535  ;;  %v329_v4 = vadd.f32 1e-05, %v326_v1 }
 0x114   : > { %v335_v5 = vmul.f32 %v1534_v59, %v334_v2  ;;  %v341_v6 = vmul.f32 %v1536_v3, %v328_v60  ;;  %vm347_vm5 = vweird.f32 %v1536_v3 }
 0x115   : > { %1537 = vrsqrt.f32 %v329_v4  ;;  %vm348_vm7 = vmor %vm346_vm6, %vm347_vm5  ;;  %vm356_vm8 = vweird.f32 %v329_v4 }
 0x116   : > { %v342_v7 = vmul.f32 %v1536_v3, %v341_v6  ;;  %v339_v8 = vsel %vm338_vm4, %v1534_v59, %v335_v5  ;;  %vm1340_vm4 = vcmask 519168  }
 0x117   : > { %v360_v12 = vmul.f32 %v339_v8, %v1669_v17 }
 0x118   : > { %v343_v9 = vmul.f32 0.5, %v342_v7 }
 0x119   : > { %v367_v20 = vmul.f32 %v1528_v13, %v360_v12 }
 0x11a   : > { %v344_v10 = vsub.f32 1.5, %v343_v9 }
 0x11b   : > { %v1538_v11 = vpop.eup %1537  ;;  %v374_v26 = vadd.f32 %v1529_v21, %v367_v20 }
 0x11c   : > { %v345_v14 = vmul.f32 %v1536_v3, %v344_v10  ;;  %v351_v15 = vmul.f32 %v1538_v11, %v329_v4  ;;  %vm357_vm9 = vweird.f32 %v1538_v11  ;;  %v478_v10 = vlaneseq }
 0x11d   : > { %vm358_vm10 = vmor %vm356_vm8, %vm357_vm9 }
 0x11e   : > { %v349_v16 = vsel %vm348_vm7, %v1536_v3, %v345_v14  ;;  %v352_v18 = vmul.f32 %v1538_v11, %v351_v15  ;;  %v481_v12 = vand.u32 127, %v478_v10 }
 0x11f   : > { %v361_v19 = vmul.f32 %v349_v16, %v1676_v24 }
 0x120   : > { %v353_v22 = vmul.f32 0.5, %v352_v18 }
 0x121   : > { %v368_v17 = vmul.f32 %v1528_v13, %v361_v19 }
 0x122   : > { %v354_v23 = vsub.f32 1.5, %v353_v22 }
 0x123   : > { %v375_v27 = vadd.f32 %v1529_v21, %v368_v17 }
 0x124   : > { %v355_v28 = vmul.f32 %v1538_v11, %v354_v23 }
 0x125   : > { %v377_v29 = vpack.c.bf16 %v375_v27, %v374_v26 }
 0x126   : > { %v359_v30 = vsel %vm358_vm10, %v1538_v11, %v355_v28  ;;  %v479_v11 = vshrl.u32 %v478_v10, 7 }
 0x127   : > { %1439 = vmatmul.msk.bf16.vlgmr.msra.gmra.mxu0 %vm289_vm0, %v377_v29  ;;  %1441 = vmatmul.msk.bf16.vlgmr.msra.gmra.mxu1 %vm289_vm0, %v377_v29  ;;  %v362_v24 = vmul.f32 %v359_v30, %v1678_v25 }
 0x128   : > { %vm1792_vm13 = vcmp.le.s32.totalorder %v481_v12, %v479_v11 }
 0x129   : > { %v369_v31 = vmul.f32 %v1528_v13, %v362_v24 }
 0x12b   : > { %v376_v32 = vadd.f32 %v1529_v21, %v369_v31 }
 0x12d   : > { %v378_v33 = vpack.c.bf16 %v376_v32, %v376_v32 }
 0x137   : > { %1440 = vmatmul.msk.bf16.gmra.mxu0 %vm289_vm0, %v378_v33  ;;  %1442 = vmatmul.msk.bf16.gmra.mxu1 %vm289_vm0, %v378_v33 }
 0x1a4   : > { %v448_v37 = vpop.f32.mrf.mxu0  ;;  %v466_v38 = vpop.f32.mrf.mxu1 }
 0x1a5   : > { %v449_v39 = vadd.f32 %v448_v37, %v389_v35  ;;  %v467_v40 = vadd.f32 %v466_v38, %v390_v36 }
 0x1a7   : > { %v1753_v41 = vpack.c.bf16 %v467_v40, %v449_v39 }
 0x1a9   : > { %v484_v25 = vunpack.c.l.b16 %v1753_v41  ;;  %v601_v1 = vrot.slane %v1753_v41, 4 }
 0x1ab   : > { %v1756_v42 = vpack.c.b16 %v484_v25, %v484_v25  ;;  %v607_v6 = vsel %vm605_vm12, %v601_v1, 0 }
 0x1ac   : > { %v450_v43 = vpop.f32.mrf.mxu0  ;;  %v468_v44 = vpop.f32.mrf.mxu1 }
 0x1ad   : > { %v451_v45 = vadd.f32 %v450_v43, %v389_v35  ;;  %v469_v46 = vadd.f32 %v468_v44, %v390_v36  ;;  %486 = vrot.lane.b32.xlu0 %v1756_v42, %s1596_s8 }
 0x1af   : > { %v1759_v47 = vpack.c.bf16 %v469_v46, %v451_v45 }
 0x1b1   : > { %v509_v48 = vunpack.c.l.b16 %v1759_v47  ;;  %v622_v59 = vrot.slane %v1759_v47, 4 }
 0x1b3   : > { %v1762_v49 = vpack.c.b16 %v509_v48, %v509_v48  ;;  %v627_v62 = vsel %vm605_vm12, %v622_v59, 0 }
 0x1b4   : > { %v453_v50 = vpop.f32.mrf.mxu0  ;;  %v471_v51 = vpop.f32.mrf.mxu1 }
 0x1b5   : > { %v454_v52 = vadd.f32 %v453_v50, %v389_v35  ;;  %v472_v53 = vadd.f32 %v471_v51, %v390_v36  ;;  %511 = vrot.lane.b32.xlu1 %v1762_v49, %s1596_s8  ;;  %671 = vrot.lane.b32.xlu0 %v1756_v42, %s1597_s9 }
 0x1b7   : > { %v1767_v54 = vpack.c.bf16 %v472_v53, %v454_v52 }
 0x1b9   : > { %v533_v55 = vunpack.c.l.b16 %v1767_v54  ;;  %v642_v8 = vrot.slane %v1767_v54, 4 }
 0x1bb   : > { %v1770_v56 = vpack.c.b16 %v533_v55, %v533_v55  ;;  %v647_v9 = vsel %vm605_vm12, %v642_v8, 0 }
 0x1bc   : > { %v455_v57 = vpop.f32.mrf.mxu0  ;;  %v473_v58 = vpop.f32.mrf.mxu1 }
 0x1bd   : > { %535 = vrot.lane.b32.xlu2 %v1770_v56, %s1596_s8  ;;  %s280_s8 = scalar_lea.vmem %s1996_s7, %s1405_s27 }
 0x1c5   : > { %669 = vrot.lane.b32.xlu2 %v1756_v42, %s1598_s10 }
 0x217   : > { %v536_v60 = vpop.permute.xlu2 %535 }
 0x218   : > { %v541_v61 = vsel %vm488_vm11, %v536_v60, 0 }
 0x219   : > { %550 = vmatpush.bf16.xpose.msra.mxu2 %v541_v61 }
 0x21f   : > { %v487_v63 = vpop.permute.xlu0 %486  ;;  %v670_v7 = vpop.permute.xlu2 %669 }
 0x220   : > { %1445 = vmatmul.msk.bf16.vlgmr.msra.gmra.mxu2 %vm488_vm11, %v1767_v54  ;;  %v493_v0 = vsel %vm488_vm11, %v487_v63, 0 }
 0x221   : > { %636 = vmatpush.bf16.msrb.mxu2 %v627_v62  ;;  %502 = vmatpush.bf16.xpose.msra.mxu3 %v493_v0 }
 0x227   : > { %v512_v2 = vpop.permute.xlu1 %511  ;;  %v672_v3 = vpop.permute.xlu0 %671 }
 0x228   : > { %1443 = vmatmul.msk.bf16.vlgmr.msra.gmra.mxu3 %vm488_vm11, %v1753_v41  ;;  %v517_v4 = vsel %vm488_vm11, %v512_v2, 0  ;;  %v677_v5 = vsel %vm488_vm11, %v672_v3, 0 }
 0x229   : > { %526 = vmatpush.bf16.xpose.msrb.mxu3 %v517_v4  ;;  %686 = vmatpush.bf16.xpose.msrb.mxu0 %v677_v5 }
 0x230   : > { %1449 = vmatmul.msk.bf16.vlgmr.msrb.gmra.mxu0 %vm488_vm11, %v670_v7 }
 0x231   : > { %616 = vmatpush.bf16.msra.mxu3 %v607_v6 }
 0x238   : > { %1444 = vmatmul.msk.bf16.vlgmr.msrb.gmra.mxu3 %vm488_vm11, %v1759_v47 }
 0x239   : > { %656 = vmatpush.bf16.msrb.mxu3 %v647_v9 }
 0x2a3   : > { %v552_v13 = vpop.f32.mrf.mxu2 }
 0x2a4   : > { %v558_v15 = vmul.f32 0.25, %v552_v13 }
 0x2a6   : > { %v563_v16 = vsel %vm1792_vm13, %v558_v15, -1e+30 }
 0x2a7   : > { %v571_v18 = vsel %vm564_vm14, %v563_v16, -inf }
 0x2a8   : > { %572 = vmax.xlane.f32.xlu2 %v571_v18 }
 0x2ab   : > { %v504_v19 = vpop.f32.mrf.mxu3  ;;  %v554_v20 = vpop.f32.mrf.mxu2 }
 0x2ac   : > { %v556_v21 = vmul.f32 0.25, %v504_v19 }
 0x2ad   : > { %v688_v22 = vpop.f32.mrf.mxu0 }
 0x2ae   : > { %v561_v17 = vsel %vm1792_vm13, %v556_v21, -1e+30  ;;  %v738_v26 = vmul.f32 0.25, %v688_v22 }
 0x2af   : > { %v565_v23 = vsel %vm564_vm14, %v561_v17, -inf }
 0x2b0   : > { %566 = vmax.xlane.f32.xlu1 %v565_v23  ;;  %v741_v28 = vsel %vm1792_vm13, %v738_v26, -1e+30 }
 0x2b1   : > { %v744_v30 = vsel %vm564_vm14, %v741_v28, -inf }
 0x2b3   : > { %v506_v27 = vpop.f32.mrf.mxu3 }
 0x2b5   : > { %v690_v29 = vpop.f32.mrf.mxu0 }
 0x2b8   : > { %745 = vmax.xlane.f32.xlu1 %v744_v30 }
 0x2bb   : > { %v528_v24 = vpop.f32.mrf.mxu3 }
 0x2bc   : > { %v557_v31 = vmul.f32 0.25, %v528_v24 }
 0x2be   : > { %v562_v32 = vsel %vm1792_vm13, %v557_v31, -1e+30 }
 0x2bf   : > { %v568_v33 = vsel %vm564_vm14, %v562_v32, -inf }
 0x2c0   : > { %569 = vmax.xlane.f32.xlu0 %v568_v33  ;;  %717 = vrot.lane.b32.xlu2 %v1770_v56, %s1597_s9 }
 0x2c3   : > { %v530_v34 = vpop.f32.mrf.mxu3 }
 0x2d4   : > { %694 = vrot.lane.b32.xlu0 %v1762_v49, %s1597_s9 }
 0x31b   : > { %v573_v35 = vpop.xlane.xlu2 %572 }
 0x31c   : > { %v576_v45 = vsub.f32 %v563_v16, %v573_v35 }
 0x31e   : > { %v581_v50 = vmul.f32 1.442695, %v576_v45 }
 0x323   : > { %v567_v36 = vpop.xlane.xlu1 %566  ;;  %v718_v37 = vpop.permute.xlu2 %717 }
 0x324   : > { %v574_v38 = vsub.f32 %v561_v17, %v567_v36  ;;  %v723_v39 = vsel %vm488_vm11, %v718_v37, 0 }
 0x325   : > { %732 = vmatpush.bf16.xpose.msra.mxu2 %v723_v39 }
 0x326   : > { %v577_v40 = vmul.f32 1.442695, %v574_v38 }
 0x328   : > { %1539 = vpow2.f32 %v577_v40 }
 0x32b   : > { %v746_v25 = vpop.xlane.xlu1 %745 }
 0x32c   : > { %v753_v43 = vsub.f32 %v741_v28, %v746_v25 }
 0x32e   : > { %v1540_v44 = vpop.eup %1539  ;;  %v756_v46 = vmul.f32 1.442695, %v753_v43 }
 0x32f   : > { %v583_v48 = vsel %vm564_vm14, %v1540_v44, 0.0 }
 0x330   : > { %1541 = vpow2.f32 %v756_v46  ;;  %584 = vadd.xlane.f32.xlu0 %v583_v48 }
 0x331   : > { %1543 = vpow2.f32 %v581_v50 }
 0x333   : > { %v570_v51 = vpop.xlane.xlu0 %569 }
 0x334   : > { %v575_v52 = vsub.f32 %v562_v32, %v570_v51 }
 0x336   : > { %v1542_v53 = vpop.eup %1541  ;;  %v579_v55 = vmul.f32 1.442695, %v575_v52 }
 0x337   : > { %v762_v57 = vsel %vm564_vm14, %v1542_v53, 0.0  ;;  %v1544_v58 = vpop.eup %1543 }
 0x338   : > { %1545 = vpow2.f32 %v579_v55  ;;  %763 = vadd.xlane.f32.xlu1 %v762_v57  ;;  %v589_v61 = vsel %vm564_vm14, %v1544_v58, 0.0 }
 0x33e   : > { %v1546_v59 = vpop.eup %1545 }
 0x33f   : > { %v586_v60 = vsel %vm564_vm14, %v1546_v59, 0.0 }
 0x340   : > { %587 = vadd.xlane.f32.xlu2 %v586_v60  ;;  %590 = vadd.xlane.f32.xlu1 %v589_v61 }
 0x344   : > { %715 = vrot.lane.b32.xlu0 %v1770_v56, %s1598_s10 }
 0x346   : > { %v695_v62 = vpop.permute.xlu0 %694 }
 0x347   : > { %v700_v63 = vsel %vm488_vm11, %v695_v62, 0 }
 0x348   : > { %709 = vmatpush.bf16.xpose.msrb.mxu1 %v700_v63 }
 0x34c   : > { %867 = vrot.lane.b32.xlu0 %v1756_v42, %s1599_s11 }
 0x354   : > { %890 = vrot.lane.b32.xlu0 %v1762_v49, %s1599_s11 }
 0x358   : > { %780 = vrot.lane.b32.xlu2 %v1753_v41, %s1598_s10 }
 0x359   : > { %692 = vrot.lane.b32.xlu1 %v1762_v49, %s1598_s10 }
 0x360   : > { %865 = vrot.lane.b32.xlu2 %v1756_v42, %s1600_s12 }
 0x361   : > { %888 = vrot.lane.b32.xlu1 %v1762_v49, %s1600_s12 }
 0x369   : > { %913 = vrot.lane.b32.xlu1 %v1770_v56, %s1599_s11 }
 0x3a3   : > { %v585_v0 = vpop.xlane.xlu0 %584 }
 0x3a4   : > { %1547 = vrcp.f32 %v585_v0 }
 0x3aa   : > { %v1548_v1 = vpop.eup %1547 }
 0x3ab   : > { %v595_v2 = vmul.f32 %v1548_v1, %v1540_v44  ;;  %v764_v3 = vpop.xlane.xlu1 %763 }
 0x3ad   : > { %v598_v4 = vpack.c.bf16 %v595_v2, %v595_v2 }
 0x3af   : > { %1446 = vmatmul.msk.bf16.vlgmr.msra.gmra.mxu3 %vm564_vm14, %v598_v4 }
 0x3b3   : > { %v591_v5 = vpop.xlane.xlu1 %590  ;;  %v588_v6 = vpop.xlane.xlu2 %587 }
 0x3b4   : > { %1549 = vrcp.f32 %v591_v5 }
 0x3b5   : > { %1551 = vrcp.f32 %v588_v6 }
 0x3b6   : > { %v716_v7 = vpop.permute.xlu0 %715  ;;  %1553 = vrcp.f32 %v764_v3 }
 0x3ba   : > { %v1550_v8 = vpop.eup %1549 }
 0x3bb   : > { %v1552_v9 = vpop.eup %1551  ;;  %v597_v10 = vmul.f32 %v1550_v8, %v1544_v58  ;;  %v781_v11 = vpop.permute.xlu2 %780 }
 0x3bc   : > { %v596_v12 = vmul.f32 %v1552_v9, %v1546_v59  ;;  %v782_v13 = vrot.slane %v781_v11, 4  ;;  %v1554_v21 = vpop.eup %1553 }
 0x3bd   : > { %v600_v15 = vpack.c.bf16 %v597_v10, %v597_v10  ;;  %v774_v23 = vmul.f32 %v1554_v21, %v1542_v53 }
 0x3be   : > { %v787_v16 = vsel %vm605_vm12, %v782_v13, 0  ;;  %v868_v18 = vpop.permute.xlu0 %867  ;;  %v599_v19 = vpack.c.bf16 %v596_v12, %v596_v12 }
 0x3bf   : > { %v873_v20 = vsel %vm488_vm11, %v868_v18, 0  ;;  %1448 = vmatmul.msk.bf16.vlgmr.msrb.gmra.mxu3 %vm564_vm14, %v600_v15  ;;  %v777_v27 = vpack.c.bf16 %v774_v23, %v774_v23 }
 0x3c0   : > { %1447 = vmatmul.msk.bf16.vlgmr.msrb.gmra.mxu2 %vm564_vm14, %v599_v19  ;;  %796 = vmatpush.bf16.msra.mxu3 %v787_v16 }
 0x3c1   : > { %882 = vmatpush.bf16.xpose.msrb.mxu2 %v873_v20 }
 0x3c3   : > { %v866_v29 = vpop.permute.xlu2 %865 }
 0x3c6   : > { %v891_v22 = vpop.permute.xlu0 %890 }
 0x3c7   : > { %v896_v17 = vsel %vm488_vm11, %v891_v22, 0 }
 0x3c8   : > { %905 = vmatpush.bf16.xpose.msrb.mxu3 %v896_v17 }
 0x3cb   : > { %v693_v26 = vpop.permute.xlu1 %692 }
 0x3cc   : > { %1450 = vmatmul.msk.bf16.vlgmr.msrb.gmra.mxu1 %vm488_vm11, %v693_v26 }
 0x3cf   : > { %1452 = vmatmul.msk.bf16.vlgmr.msra.gmra.mxu3 %vm564_vm14, %v777_v27 }
 0x3d0   : > { %1451 = vmatmul.msk.bf16.vlgmr.msra.gmra.mxu2 %vm488_vm11, %v716_v7 }
 0x3d3   : > { %v889_v28 = vpop.permute.xlu1 %888 }
 0x3db   : > { %v914_v2 = vpop.permute.xlu1 %913 }
 0x3dc   : > { %v919_v6 = vsel %vm488_vm11, %v914_v2, 0 }
 0x3df   : > { %1456 = vmatmul.msk.bf16.vlgmr.msrb.gmra.mxu3 %vm488_vm11, %v889_v28 }
 0x3e0   : > { %1455 = vmatmul.msk.bf16.vlgmr.msrb.gmra.mxu2 %vm488_vm11, %v866_v29 }
 0x432   : > { %v618_v30 = vpop.f32.mrf.mxu3 }
 0x433   : > { %v662_v24 = vpack.c.bf16 %v618_v30, %v618_v30 }
 0x435   : > { %666 = vst.msk [vmem:[#allocation2] sm:$0xf] %vm665_vm15, %v662_v24 }
 0x43a   : > { %v620_v31 = vpop.f32.mrf.mxu3 }
 0x442   : > { %v658_v32 = vpop.f32.mrf.mxu3 }
 0x443   : > { %v638_v33 = vpop.f32.mrf.mxu2  ;;  %v664_v34 = vpack.c.bf16 %v658_v32, %v658_v32 }
 0x444   : > { %v663_v35 = vpack.c.bf16 %v638_v33, %v638_v33 }
 0x445   : > { %668 = vst.msk [vmem:[#allocation2 + $0x8] sm:$0xf] %vm665_vm15, %v664_v34 }
 0x446   : > { %667 = vst.msk [vmem:[#allocation2 + $0x4] sm:$0xf] %vm665_vm15, %v663_v35 }
 0x449   : > { %v711_v36 = vpop.f32.mrf.mxu1 }
 0x44a   : > { %v739_v37 = vmul.f32 0.25, %v711_v36  ;;  %v660_v38 = vpop.f32.mrf.mxu3 }
 0x44b   : > { %v640_v39 = vpop.f32.mrf.mxu2 }
 0x44c   : > { %v742_v40 = vsel %vm1792_vm13, %v739_v37, -1e+30 }
 0x44d   : > { %v747_v25 = vsel %vm564_vm14, %v742_v40, -inf }
 0x44e   : > { %748 = vmax.xlane.f32.xlu2 %v747_v25 }
 0x451   : > { %v713_v43 = vpop.f32.mrf.mxu1 }
 0x452   : > { %v1848_v44 = vpop.f32.mrf.mxu3 }
 0x453   : > { %v734_v45 = vpop.f32.mrf.mxu2 }
 0x454   : > { %v740_v8 = vmul.f32 0.25, %v734_v45 }
 0x456   : > { %v743_v9 = vsel %vm1792_vm13, %v740_v8, -1e+30 }
 0x457   : > { %v750_v10 = vsel %vm564_vm14, %v743_v9, -inf }
 0x45a   : > { %v800_v46 = vpop.f32.mrf.mxu3 }
 0x45b   : > { %v736_v48 = vpop.f32.mrf.mxu2 }
 0x462   : > { %v907_v50 = vpop.f32.mrf.mxu3 }
 0x463   : > { %v884_v51 = vpop.f32.mrf.mxu2  ;;  %v935_v59 = vmul.f32 0.25, %v907_v50 }
 0x464   : > { %v934_v52 = vmul.f32 0.25, %v884_v51 }
 0x465   : > { %v938_v60 = vsel %vm1792_vm13, %v935_v59, -1e+30 }
 0x466   : > { %802 = vrot.lane.b32.xlu2 %v1759_v47, %s1598_s10  ;;  %v937_v53 = vsel %vm1792_vm13, %v934_v52, -1e+30  ;;  %v943_v61 = vsel %vm564_vm14, %v938_v60, -inf }
 0x467   : > { %v940_v55 = vsel %vm564_vm14, %v937_v53, -inf }
 0x468   : > { %941 = vmax.xlane.f32.xlu1 %v940_v55 }
 0x46a   : > { %v909_v57 = vpop.f32.mrf.mxu3 }
 0x46b   : > { %v886_v58 = vpop.f32.mrf.mxu2 }
 0x481   : > { %976 = vrot.lane.b32.xlu1 %v1753_v41, %s1600_s12 }
 0x489   : > { %998 = vrot.lane.b32.xlu1 %v1759_v47, %s1600_s12 }
 0x48f   : > { %944 = vmax.xlane.f32.xlu2 %v943_v61 }
 0x491   : > { %1063 = vrot.lane.b32.xlu1 %v1756_v42, %s1601_s13 }
 0x499   : > { %1086 = vrot.lane.b32.xlu1 %v1762_v49, %s1601_s13 }
 0x4a7   : > { %911 = vrot.lane.b32.xlu2 %v1770_v56, %s1600_s12 }
 0x4c1   : > { %v749_v62 = vpop.xlane.xlu2 %748 }
 0x4c2   : > { %v754_v63 = vsub.f32 %v742_v40, %v749_v62 }
 0x4c4   : > { %v758_v0 = vmul.f32 1.442695, %v754_v63 }
 0x4c6   : > { %1555 = vpow2.f32 %v758_v0 }
 0x4c9   : > { %v803_v1 = vpop.permute.xlu2 %802 }
 0x4ca   : > { %v804_v3 = vrot.slane %v803_v1, 4 }
 0x4cc   : > { %v1556_v4 = vpop.eup %1555  ;;  %v809_v5 = vsel %vm605_vm12, %v804_v3, 0 }
 0x4cd   : > { %818 = vmatpush.bf16.msra.mxu0 %v809_v5  ;;  %v765_v7 = vsel %vm564_vm14, %v1556_v4, 0.0 }
 0x4ce   : > { %766 = vadd.xlane.f32.xlu0 %v765_v7 }
 0x4d1   : > { %928 = vmatpush.bf16.xpose.msrb.mxu0 %v919_v6 }
 0x4d6   : > { %751 = vmax.xlane.f32.xlu0 %v750_v10 }
 0x4db   : > { %v942_v11 = vpop.xlane.xlu1 %941 }
 0x4dc   : > { %v949_v18 = vsub.f32 %v937_v53, %v942_v11 }
 0x4de   : > { %v952_v22 = vmul.f32 1.442695, %v949_v18 }
 0x4ea   : > { %824 = vrot.lane.b32.xlu0 %v1767_v54, %s1598_s10 }
 0x4f3   : > { %v977_v12 = vpop.permute.xlu1 %976 }
 0x4fb   : > { %v999_v13 = vpop.permute.xlu1 %998 }
 0x4fc   : > { %v1000_v15 = vrot.slane %v999_v13, 4 }
 0x4fe   : > { %v1005_v16 = vsel %vm605_vm12, %v1000_v15, 0 }
 0x4ff   : > { %1014 = vmatpush.bf16.msra.mxu2 %v1005_v16 }
 0x502   : > { %v945_v19 = vpop.xlane.xlu2 %944 }
 0x503   : > { %v950_v20 = vsub.f32 %v938_v60, %v945_v19  ;;  %v1064_v31 = vpop.permute.xlu1 %1063 }
 0x504   : > { %v1069_v35 = vsel %vm488_vm11, %v1064_v31, 0 }
 0x505   : > { %v954_v21 = vmul.f32 1.442695, %v950_v20 }
 0x507   : > { %1557 = vpow2.f32 %v954_v21 }
 0x508   : > { %1559 = vpow2.f32 %v952_v22 }
 0x50a   : > { %v912_v38 = vpop.permute.xlu2 %911 }
 0x50b   : > { %v1087_v51 = vpop.permute.xlu1 %1086 }
 0x50c   : > { %v1092_v60 = vsel %vm488_vm11, %v1087_v51, 0 }
 0x50d   : > { %v1558_v17 = vpop.eup %1557 }
 0x50e   : > { %v961_v23 = vsel %vm564_vm14, %v1558_v17, 0.0  ;;  %v1560_v26 = vpop.eup %1559 }
 0x50f   : > { %962 = vadd.xlane.f32.xlu2 %v961_v23  ;;  %v958_v27 = vsel %vm564_vm14, %v1560_v26, 0.0 }
 0x514   : > { %959 = vadd.xlane.f32.xlu0 %v958_v27 }
 0x527   : > { %1107 = vrot.lane.b32.xlu2 %v1770_v56, %s1602_s14 }
 0x528   : > { %1084 = vrot.lane.b32.xlu0 %v1762_v49, %s1602_s14  ;;  %v978_v49 = vrot.slane %v977_v12, 4 }
 0x52a   : > { %v983_v43 = vsel %vm605_vm12, %v978_v49, 0 }
 0x541   : > { %v767_v28 = vpop.xlane.xlu0 %766 }
 0x542   : > { %1561 = vrcp.f32 %v767_v28 }
 0x548   : > { %v1562_v29 = vpop.eup %1561 }
 0x549   : > { %v775_v30 = vmul.f32 %v1562_v29, %v1556_v4  ;;  %v752_v24 = vpop.xlane.xlu0 %751 }
 0x54a   : > { %v755_v32 = vsub.f32 %v743_v9, %v752_v24 }
 0x54b   : > { %v778_v33 = vpack.c.bf16 %v775_v30, %v775_v30 }
 0x54c   : > { %v760_v34 = vmul.f32 1.442695, %v755_v32 }
 0x54d   : > { %1453 = vmatmul.msk.bf16.vlgmr.msra.gmra.mxu0 %vm564_vm14, %v778_v33 }
 0x54e   : > { %1563 = vpow2.f32 %v760_v34  ;;  %1078 = vmatpush.bf16.xpose.msra.mxu0 %v1069_v35 }
 0x554   : > { %v1564_v36 = vpop.eup %1563 }
 0x555   : > { %v768_v37 = vsel %vm564_vm14, %v1564_v36, 0.0 }
 0x556   : > { %769 = vadd.xlane.f32.xlu1 %v768_v37 }
 0x55c   : > { %v825_v39 = vpop.permute.xlu0 %824 }
 0x55d   : > { %v826_v40 = vrot.slane %v825_v39, 4  ;;  %1457 = vmatmul.msk.bf16.vlgmr.msrb.gmra.mxu0 %vm488_vm11, %v912_v38 }
 0x55f   : > { %v831_v25 = vsel %vm605_vm12, %v826_v40, 0 }
 0x560   : > { %840 = vmatpush.bf16.msra.mxu1 %v831_v25 }
 0x564   : > { %992 = vmatpush.bf16.msrb.mxu1 %v983_v43 }
 0x56f   : > { %1061 = vrot.lane.b32.xlu1 %v1756_v42, %s1602_s14 }
 0x577   : > { %1109 = vrot.lane.b32.xlu1 %v1770_v56, %s1601_s13 }
 0x582   : > { %v963_v45 = vpop.xlane.xlu2 %962 }
 0x583   : > { %1565 = vrcp.f32 %v963_v45 }
 0x587   : > { %v960_v59 = vpop.xlane.xlu0 %959 }
 0x589   : > { %v1566_v46 = vpop.eup %1565 }
 0x58a   : > { %v971_v48 = vmul.f32 %v1566_v46, %v1558_v17  ;;  %v1108_v7 = vpop.permute.xlu2 %1107 }
 0x58c   : > { %v974_v50 = vpack.c.bf16 %v971_v48, %v971_v48 }
 0x58e   : > { %1459 = vmatmul.msk.bf16.vlgmr.msra.gmra.mxu2 %vm564_vm14, %v974_v50 }
 0x59a   : > { %v1085_v8 = vpop.permute.xlu0 %1084 }
 0x5c9   : > { %v770_v52 = vpop.xlane.xlu1 %769 }
 0x5ca   : > { %1567 = vrcp.f32 %v770_v52  ;;  %v1894_v53 = vpop.f32.mrf.mxu0 }
 0x5cb   : > { %1569 = vrcp.f32 %v960_v59 }
 0x5d0   : > { %v1568_v55 = vpop.eup %1567 }
 0x5d1   : > { %v776_v57 = vmul.f32 %v1568_v55, %v1564_v36  ;;  %v1570_v62 = vpop.eup %1569 }
 0x5d2   : > { %v822_v58 = vpop.f32.mrf.mxu0  ;;  %v970_v1 = vmul.f32 %v1570_v62, %v1560_v26 }
 0x5d3   : > { %v779_v42 = vpack.c.bf16 %v776_v57, %v776_v57 }
 0x5d4   : > { %v973_v4 = vpack.c.bf16 %v970_v1, %v970_v1 }
 0x5d5   : > { %1454 = vmatmul.msk.bf16.vlgmr.msra.gmra.mxu1 %vm564_vm14, %v779_v42  ;;  %v846_v42 = vpack.c.bf16 %v1848_v44, %v1848_v44 }
 0x5d6   : > { %1101 = vmatpush.bf16.xpose.msra.mxu1 %v1092_v60 }
 0x5da   : > { %v930_v56 = vpop.f32.mrf.mxu0 }
 0x5db   : > { %v936_v61 = vmul.f32 0.25, %v930_v56 }
 0x5dd   : > { %v939_v63 = vsel %vm1792_vm13, %v936_v61, -1e+30 }
 0x5de   : > { %v946_v0 = vsel %vm564_vm14, %v939_v63, -inf }
 0x5df   : > { %947 = vmax.xlane.f32.xlu1 %v946_v0 }
 0x5e1   : > { %v1062_v2 = vpop.permute.xlu1 %1061 }
 0x5e2   : > { %v932_v3 = vpop.f32.mrf.mxu0  ;;  %1461 = vmatmul.msk.bf16.vlgmr.msra.gmra.mxu0 %vm488_vm11, %v1062_v2 }
 0x5e5   : > { %1458 = vmatmul.msk.bf16.vlgmr.msrb.gmra.mxu1 %vm564_vm14, %v973_v4 }
 0x5e9   : > { %v1110_v5 = vpop.permute.xlu1 %1109 }
 0x5ea   : > { %v1115_v6 = vsel %vm488_vm11, %v1110_v5, 0 }
 0x5eb   : > { %1124 = vmatpush.bf16.xpose.msrb.mxu2 %v1115_v6 }
 0x5f2   : > { %1463 = vmatmul.msk.bf16.vlgmr.msrb.gmra.mxu2 %vm488_vm11, %v1108_v7 }
 0x5f5   : > { %1462 = vmatmul.msk.bf16.vlgmr.msra.gmra.mxu1 %vm488_vm11, %v1085_v8 }
 0x611   : > { %v1906_v9 = vpop.f32.mrf.mxu2 }
 0x612   : > { %v1043_v44 = vpack.c.bf16 %v1906_v9, %v1906_v9 }
 0x619   : > { %v1018_v10 = vpop.f32.mrf.mxu2 }
 0x652   : > { %v1908_v11 = vpop.f32.mrf.mxu1  ;;  %v948_v12 = vpop.xlane.xlu1 %947 }
 0x653   : > { %v951_v13 = vsub.f32 %v939_v63, %v948_v12 }
 0x655   : > { %v956_v16 = vmul.f32 1.442695, %v951_v13 }
 0x657   : > { %1571 = vpow2.f32 %v956_v16 }
 0x65a   : > { %v844_v15 = vpop.f32.mrf.mxu1 }
 0x65d   : > { %v1572_v23 = vpop.eup %1571 }
 0x65e   : > { %v964_v27 = vsel %vm564_vm14, %v1572_v23, 0.0 }
 0x65f   : > { %v1080_v18 = vpop.f32.mrf.mxu0 }
 0x660   : > { %v1130_v19 = vmul.f32 0.25, %v1080_v18 }
 0x662   : > { %v994_v20 = vpop.f32.mrf.mxu1  ;;  %v1133_v21 = vsel %vm1792_vm13, %v1130_v19, -1e+30 }
 0x663   : > { %v1136_v22 = vsel %vm564_vm14, %v1133_v21, -inf  ;;  %v1042_v62 = vpack.c.bf16 %v994_v20, %v994_v20 }
 0x664   : > { %1137 = vmax.xlane.f32.xlu0 %v1136_v22 }
 0x667   : > { %v1082_v17 = vpop.f32.mrf.mxu0 }
 0x66a   : > { %v996_v26 = vpop.f32.mrf.mxu1 }
 0x66c   : > { %965 = vadd.xlane.f32.xlu0 %v964_v27 }
 0x672   : > { %v1103_v28 = vpop.f32.mrf.mxu1 }
 0x673   : > { %v1131_v29 = vmul.f32 0.25, %v1103_v28 }
 0x675   : > { %v1126_v30 = vpop.f32.mrf.mxu2  ;;  %v1134_v24 = vsel %vm1792_vm13, %v1131_v29, -1e+30 }
 0x676   : > { %v1132_v31 = vmul.f32 0.25, %v1126_v30  ;;  %v1139_v32 = vsel %vm564_vm14, %v1134_v24, -inf }
 0x677   : > { %1140 = vmax.xlane.f32.xlu2 %v1139_v32 }
 0x678   : > { %v1135_v33 = vsel %vm1792_vm13, %v1132_v31, -1e+30 }
 0x679   : > { %v1142_v34 = vsel %vm564_vm14, %v1135_v33, -inf }
 0x67a   : > { %v1105_v35 = vpop.f32.mrf.mxu1  ;;  %1143 = vmax.xlane.f32.xlu1 %v1142_v34  ;;  %v848_v34 = vpack.c.bf16 %v1908_v11, %v1908_v11  ;;  %v1501_v11 = vld [vmem:[%s1994_s5 + $0x8] sm:$0xff] }
 0x67d   : > { %v1128_v36 = vpop.f32.mrf.mxu2 }
 0x693   : > { %1020 = vrot.lane.b32.xlu1 %v1767_v54, %s1600_s12 }
 0x6d7   : > { %v1138_v37 = vpop.xlane.xlu0 %1137 }
 0x6d8   : > { %v1145_v49 = vsub.f32 %v1133_v21, %v1138_v37 }
 0x6da   : > { %v1148_v38 = vmul.f32 1.442695, %v1145_v49  ;;  %v1503_v49 = vld [vmem:[%s1994_s5 + $0x18] sm:$0xff] }
 0x6db   : > { %1314 = vmatpush.bf16.msra.mxu2 %v1503_v49 }
 0x6dc   : > { %1573 = vpow2.f32 %v1148_v38  ;;  %v1502_v38 = vld [vmem:[%s1994_s5 + $0x10] sm:$0xff] }
 0x6df   : > { %v966_v57 = vpop.xlane.xlu0 %965  ;;  %1315 = vmatpush.bf16.msra.mxu2 %v1502_v38 }
 0x6e2   : > { %v1574_v39 = vpop.eup %1573 }
 0x6e3   : > { %v1154_v40 = vsel %vm564_vm14, %v1574_v39, 0.0  ;;  %1316 = vmatpush.bf16.msra.mxu2 %v1501_v11 }
 0x6e4   : > { %1155 = vadd.xlane.f32.xlu0 %v1154_v40 }
 0x6ea   : > { %v1141_v25 = vpop.xlane.xlu2 %1140 }
 0x6eb   : > { %v1146_v43 = vsub.f32 %v1134_v24, %v1141_v25 }
 0x6ed   : > { %v1150_v14 = vmul.f32 1.442695, %v1146_v43  ;;  %v1144_v45 = vpop.xlane.xlu1 %1143 }
 0x6ee   : > { %v1147_v46 = vsub.f32 %v1135_v33, %v1144_v45 }
 0x6ef   : > { %1575 = vpow2.f32 %v1150_v14 }
 0x6f0   : > { %v1152_v48 = vmul.f32 1.442695, %v1147_v46 }
 0x6f2   : > { %1577 = vpow2.f32 %v1152_v48 }
 0x6f3   : > { %1579 = vrcp.f32 %v966_v57 }
 0x6f5   : > { %v1576_v50 = vpop.eup %1575 }
 0x6f6   : > { %v1157_v51 = vsel %vm564_vm14, %v1576_v50, 0.0 }
 0x6f7   : > { %1158 = vadd.xlane.f32.xlu2 %v1157_v51 }
 0x6f8   : > { %v1578_v52 = vpop.eup %1577  ;;  %1172 = vrot.lane.b32.xlu0 %v1753_v41, %s1602_s14 }
 0x6f9   : > { %v1160_v55 = vsel %vm564_vm14, %v1578_v52, 0.0  ;;  %v1580_v58 = vpop.eup %1579 }
 0x6fa   : > { %1161 = vadd.xlane.f32.xlu1 %v1160_v55  ;;  %v972_v60 = vmul.f32 %v1580_v58, %v1572_v23  ;;  %v1530_v55 = vld [vmem:[%s1995_s6] ss:$0 sm:$0xff] }
 0x6fc   : > { %v975_v41 = vpack.c.bf16 %v972_v60, %v972_v60 }
 0x700   : > { %1216 = vrot.lane.b32.xlu0 %v1767_v54, %s1602_s14  ;;  %v847_v54 = vpack.c.bf16 %v1894_v53, %v1894_v53 }
 0x705   : > { %v1021_v59 = vpop.permute.xlu1 %1020 }
 0x706   : > { %v1022_v56 = vrot.slane %v1021_v59, 4 }
 0x708   : > { %v1027_v61 = vsel %vm605_vm12, %v1022_v56, 0  ;;  %852 = vrot.lane.b32.xlu0 %v846_v42, %s1601_s13 }
 0x709   : > { %1036 = vmatpush.bf16.msra.mxu3 %v1027_v61 }
 0x70c   : > { %1460 = vmatmul.msk.bf16.vlgmr.msra.gmra.mxu3 %vm564_vm14, %v975_v41 }
 0x70f   : > { %1194 = vrot.lane.b32.xlu2 %v1759_v47, %s1602_s14 }
 0x710   : > { %1048 = vrot.lane.b32.xlu0 %v1042_v62, %s1599_s11 }
 0x717   : > { %854 = vrot.lane.b32.xlu2 %v847_v54, %s1601_s13  ;;  %v1330_v54 = vld [vmem:[%s1659_s30 + $0x8] sm:$0xf] }
 0x71f   : > { %1050 = vrot.lane.b32.xlu2 %v1043_v44, %s1599_s11 }
 0x757   : > { %v1156_v63 = vpop.xlane.xlu0 %1155 }
 0x758   : > { %1581 = vrcp.f32 %v1156_v63  ;;  %v1333_v63 = vunpack.c.l.bf16 %v1330_v54 }
 0x75e   : > { %v1582_v0 = vpop.eup %1581 }
 0x75f   : > { %v1166_v3 = vmul.f32 %v1582_v0, %v1574_v39  ;;  %v1500_v39 = vld [vmem:[%s1994_s5] sm:$0xff] }
 0x760   : > { %1317 = vmatpush.bf16.msra.mxu2 %v1500_v39 }
 0x761   : > { %v1169_v53 = vpack.c.bf16 %v1166_v3, %v1166_v3 }
 0x76a   : > { %v1173_v1 = vpop.permute.xlu0 %1172  ;;  %v1159_v2 = vpop.xlane.xlu2 %1158 }
 0x76b   : > { %v1174_v4 = vrot.slane %v1173_v1, 4  ;;  %1583 = vrcp.f32 %v1159_v2 }
 0x76d   : > { %v1179_v47 = vsel %vm605_vm12, %v1174_v4, 0  ;;  %v1162_v5 = vpop.xlane.xlu1 %1161 }
 0x76e   : > { %1585 = vrcp.f32 %v1162_v5  ;;  %1188 = vmatpush.bf16.msrb.mxu3 %v1179_v47 }
 0x771   : > { %v1584_v6 = vpop.eup %1583  ;;  %1464 = vmatmul.msk.bf16.vlgmr.msrb.gmra.mxu3 %vm564_vm14, %v1169_v53 }
 0x772   : > { %v1217_v7 = vpop.permute.xlu0 %1216  ;;  %v1195_v8 = vpop.permute.xlu2 %1194  ;;  %v1167_v9 = vmul.f32 %v1584_v6, %v1576_v50 }
 0x773   : > { %v1218_v10 = vrot.slane %v1217_v7, 4  ;;  %v1196_v12 = vrot.slane %v1195_v8, 4 }
 0x774   : > { %v1586_v13 = vpop.eup %1585  ;;  %v1170_v19 = vpack.c.bf16 %v1167_v9, %v1167_v9 }
 0x775   : > { %v1168_v15 = vmul.f32 %v1586_v13, %v1578_v52  ;;  %v1223_v16 = vsel %vm605_vm12, %v1218_v10, 0  ;;  %v1201_v18 = vsel %vm605_vm12, %v1196_v12, 0  ;;  %v1509_v52 = vld [vmem:[%s1659_s30] sm:$0xff]  }
 0x776   : > { %1210 = vmatpush.bf16.msrb.mxu0 %v1201_v18  ;;  %1232 = vmatpush.bf16.msrb.mxu1 %v1223_v16  ;;  %v1510_v57 = vunpack.c.l.bf16 %v1509_v52  ;;  %v1511_v56 = vunpack.c.h.bf16 %v1509_v52 }
 0x777   : > { %v1171_v20 = vpack.c.bf16 %v1168_v15, %v1168_v15 }
 0x779   : > { %1465 = vmatmul.msk.bf16.vlgmr.msrb.gmra.mxu0 %vm564_vm14, %v1170_v19  ;;  %1466 = vmatmul.msk.bf16.vlgmr.msrb.gmra.mxu1 %vm564_vm14, %v1171_v20 }
 0x77a   : > { %v853_v21 = vpop.permute.xlu0 %852  ;;  %v855_v22 = vpop.permute.xlu2 %854 }
 0x77b   : > { %862 = vst.msk [vmem:[#allocation2] sm:$0xf] %vm861_vm1, %v853_v21 }
 0x77c   : > { %863 = vst.msk [vmem:[#allocation2 + $0x4] sm:$0xf] %vm861_vm1, %v855_v22 }
 0x782   : > { %v1049_v17 = vpop.permute.xlu0 %1048  ;;  %v1051_v23 = vpop.permute.xlu2 %1050 }
 0x783   : > { %1058 = vst.msk [vmem:[#allocation2] sm:$0xf] %vm1057_vm2, %v1049_v17 }
 0x784   : > { %1059 = vst.msk [vmem:[#allocation2 + $0x4] sm:$0xf] %vm1057_vm2, %v1051_v23 }
 0x78f   : > { %v1038_v26 = vpop.f32.mrf.mxu3 }
 0x790   : > { %v1044_v27 = vpack.c.bf16 %v1038_v26, %v1038_v26 }
 0x792   : > { %1052 = vrot.lane.b32.xlu1 %v1044_v27, %s1599_s11 }
 0x797   : > { %v1040_v28 = vpop.f32.mrf.mxu3 }
 0x7f4   : > { %v1190_v29 = vpop.f32.mrf.mxu3 }
 0x7f5   : > { %v1238_v30 = vpack.c.bf16 %v1190_v29, %v1190_v29 }
 0x7f6   : > { %v1212_v24 = vpop.f32.mrf.mxu0  ;;  %v1234_v31 = vpop.f32.mrf.mxu1 }
 0x7f7   : > { %v1239_v32 = vpack.c.bf16 %v1212_v24, %v1212_v24  ;;  %1244 = vrot.lane.b32.xlu0 %v1238_v30, %s1597_s9  ;;  %v1240_v37 = vpack.c.bf16 %v1234_v31, %v1234_v31 }
 0x7f9   : > { %1246 = vrot.lane.b32.xlu2 %v1239_v32, %s1597_s9 }
 0x7fc   : > { %v1192_v33 = vpop.f32.mrf.mxu3 }
 0x7fe   : > { %v1214_v35 = vpop.f32.mrf.mxu0  ;;  %v1236_v36 = vpop.f32.mrf.mxu1 }
 0x7ff   : > { %856 = vrot.lane.b32.xlu0 %v848_v34, %s1601_s13 }
 0x801   : > { %1248 = vrot.lane.b32.xlu2 %v1240_v37, %s1597_s9 }
 0x804   : > { %v1053_v45 = vpop.permute.xlu1 %1052 }
 0x853   : > { %v1247_v40 = vpop.permute.xlu2 %1246 }
 0x854   : > { %1255 = vst.msk [vmem:[#allocation2 + $0x4] sm:$0xf] %vm1253_vm3, %v1247_v40 }
 0x85b   : > { %v1249_v46 = vpop.permute.xlu2 %1248 }
 0x869   : > { %v1245_v25 = vpop.permute.xlu0 %1244 }
 0x86a   : > { %1254 = vst.msk [vmem:[#allocation2] sm:$0xf] %vm1253_vm3, %v1245_v25 }
 0x871   : > { %v857_v43 = vpop.permute.xlu0 %856  ;;  %v1499_v14 = vld [vmem:[#allocation2] sm:$0xff] }
 0x872   : > { %864 = vst.msk [vmem:[#allocation2 + $0x8] sm:$0xf] %vm861_vm1, %v857_v43  ;;  %1487 = vmatmul.msk.bf16.vlgmr.msra.gmra.mxu2 %vm289_vm0, %v1499_v14 }
 0x873   : > { %1060 = vst.msk [vmem:[#allocation2 + $0x8] sm:$0xf] %vm1057_vm2, %v1053_v45 }
 0x874   : > { %1256 = vst.msk [vmem:[#allocation2 + $0x8] sm:$0xf] %vm1253_vm3, %v1249_v46 }
 0x87b   : > { %v1259_v48 = vld [vmem:[#allocation2 + $0x8] sm:$0xf] }
 0x87c   : > { %v1277_v50 = vunpack.c.l.b16 %v1259_v48 }
 0x87e   : > { %v1279_v51 = vpack.c.b16 %v1277_v50, %v1277_v50 }
 0x882   : > { %1488 = vmatmul.msk.bf16.gmra.mxu2 %vm289_vm0, %v1279_v51 }
 0x8f5   : > { %v1319_v58 = vpop.f32.mrf.mxu2 }
 0x8f6   : > { %v1320_v59 = vadd.f32 %v1530_v55, %v1319_v58 }
 0x8f8   : > { %v1334_v42 = vadd.f32 %v1510_v57, %v1320_v59 }
 0x8fa   : > { %v1337_v60 = vpack.c.bf16 %v1334_v42, %v1334_v42 }
 0x8fc   : > { %1341 = vst.msk [vmem:[%s280_s8] sm:$0xf] %vm1340_vm4, %v1337_v60 }
 0x8fd   : > { %v1321_v61 = vpop.f32.mrf.mxu2 }
 0x8fe   : > { %v1322_v41 = vadd.f32 %v1530_v55, %v1321_v61 }
 0x900   : > { %v1335_v62 = vadd.f32 %v1511_v56, %v1322_v41 }
 0x902   : > { %v1338_v44 = vpack.c.bf16 %v1335_v62, %v1335_v62 }
 0x904   : > { %1342 = vst.msk [vmem:[%s280_s8 + $0x4] sm:$0xf] %vm1340_vm4, %v1338_v44 }
 0x905   : > { %v1324_v0 = vpop.f32.mrf.mxu2 }
 0x906   : > { %v1325_v1 = vadd.f32 %v1530_v55, %v1324_v0 }
 0x908   : > { %v1336_v2 = vadd.f32 %v1333_v63, %v1325_v1 }
 0x90a   : > { %v1339_v3 = vpack.c.bf16 %v1336_v2, %v1336_v2 }
 0x90c   : > { %1343 = vst.msk [vmem:[%s280_s8 + $0x8] sm:$0xf] %vm1340_vm4, %v1339_v3 }
 0x90d   : > { %v1326_v4 = vpop.f32.mrf.mxu2 }
 0x90e PF: > { %s17_s24 = sadd.s32 1, %s1593_s24  }
 0x90f   : > { %p14_p4 = scmp.ge.s32.totalorder %s17_s24, 4  }
 0x911   :  { %16 = sbr.rel (!%p14_p4) target bundleno = 1 (0x1), region = 78 }

// kernel: _clip_forward.13
= control target key start
LH: loop header
LB: loop body
LE: loop exit
PB: predicated region body
PF: predicated region fallthrough
CT: control target
= control target key end

     0   :  { %vm15_vm0 = vcmask 254976   ;;  %s151_s0 = inlined_call_operand.vmem [shape: f32[2,32], index: 0, kind: input, shape index: {}]   ;;  %s152_s1 = inlined_call_operand.vmem [shape: bf16[32,5], index: 1, kind: input, shape index: {}]   ;;  %s153_s2 = inlined_call_operand.hbm [shape: f32[2,5], index: 2, kind: output, shape index: {}]  }
   0x1   :  { %v13_v0 = vld [vmem:[%s151_s0] sm:$0x3] }
   0x2   :  { %7 = vsyncpa [#allocation3], 0  ;;  %v14_v1 = vmul.f32 %v13_v0, %v13_v0  ;;  %v93_v3 = vld [vmem:[%s152_s1 + $0x8] sm:$0xff]  ;;  %v92_v4 = vld [vmem:[%s152_s1] sm:$0xff]  ;;  %vm48_vm4 = vcmask 261120   ;;  %s123_s0 = smov [#allocation2]  }
   0x3   :  { %58 = vmatpush.bf16.msra.mxu0 %v93_v3  ;;  %s72_s1 = sshll.u32 %s123_s0, 4  ;;  %s74_s17 = sshll.u32 %s153_s2, 4  ;;  %vm65_vm5 = vcmask 33792   ;;  %s73_s1 = int_to_ptr.vmem [resolvable:$true] %s72_s1  ;;  %s75_s17 = int_to_ptr.hbm [resolvable:$true] %s74_s17 }
   0x4   :  { %v16_v2 = vsel %vm15_vm0, %v14_v1, 0.0 }
   0x5   :  { %17 = vadd.xlane.f32.xlu0 %v16_v2 }
   0x7   :  { %59 = vmatpush.bf16.msra.mxu0 %v92_v4 }
  0x78   :  { %v18_v5 = vpop.xlane.xlu0 %17 }
  0x79   :  { %v19_v6 = vadd.f32 1e-12, %v18_v5 }
  0x7b   :  { %95 = vrsqrt.f32 %v19_v6  ;;  %vm26_vm2 = vweird.f32 %v19_v6 }
  0x81   :  { %v96_v7 = vpop.eup %95 }
  0x82   :  { %v21_v8 = vmul.f32 %v96_v7, %v19_v6  ;;  %vm27_vm1 = vweird.f32 %v96_v7 }
  0x83   :  { %vm28_vm3 = vmor %vm26_vm2, %vm27_vm1 }
  0x84   :  { %v22_v9 = vmul.f32 %v96_v7, %v21_v8 }
  0x86   :  { %v23_v10 = vmul.f32 0.5, %v22_v9 }
  0x88   :  { %v24_v11 = vsub.f32 1.5, %v23_v10 }
  0x8a   :  { %v25_v12 = vmul.f32 %v96_v7, %v24_v11 }
  0x8c   :  { %v29_v13 = vsel %vm28_vm3, %v96_v7, %v25_v12 }
  0x8d   :  { %v30_v14 = vmul.f32 %v29_v13, %v13_v0 }
  0x8f   :  { %v31_v15 = vpack.c.bf16 %v30_v14, %v30_v14 }
  0x91   :  { %91 = vmatmul.msk.bf16.vlgmr.msra.gmra.mxu0 %vm48_vm4, %v31_v15 }
 0x10e   :  { %v61_v16 = vpop.f32.mrf.mxu0 }
 0x10f   :  { %66 = vst.msk [vmem:[#allocation2] sm:$0x3] %vm65_vm5, %v61_v16 }
 0x110   :  { %77 = dma.vmem_to_hbm [thread:$0]  %s73_s1, 32, %s75_s17, [#allocation3]  }
 0x116   :  { %v63_v17 = vpop.f32.mrf.mxu0 }
 0x117   :  { %121 = dma.done.wait [#allocation3], 32  }
 0x118   :  { %122 = vsyncadd [#allocation3], 4294967264 }
 0x119   :  { %82 = vsyncpa [#allocation3], 1 }

</bundles_post_ra>
